<compile_context>
chip_gen: v6e
topology: v6e:2x2x1
jax: 0.10.0
libtpu: 0.0.40
codegen_flags: <defaults>
</compile_context>

<pallas_src>
import jax
import jax.numpy as jnp
from jax.experimental import pallas as pl
from jax.experimental.pallas import tpu as pltpu


_LANE = 128
_MAX_TILE_B = 2048          # ~26 MiB VMEM footprint at f32 -> safe on v5e/v6e/v7x
_STEP_OVERHEAD_ROWS = 128   # ~0.35 us fixed per-grid-step cost in row-equivalents


def _round_up(x, m):
    return (x + m - 1) // m * m


def _choose_tile_b(batch):
    """Pick a lane-aligned (multiple of 128) batch tile.

    Minimizes streamed rows (last-step padding) plus per-step pipeline
    overhead; ties prefer an even step count (v7x megacore balance), then the
    larger tile.
    """
    batch = max(int(batch), 1)
    upper = min(_MAX_TILE_B, _round_up(batch, _LANE))
    best_key, best_tile = None, _LANE
    for tile in range(_LANE, upper + 1, _LANE):
        padded = _round_up(batch, tile)
        steps = padded // tile
        key = (padded + steps * _STEP_OVERHEAD_ROWS, steps % 2, -tile)
        if best_key is None or key < best_key:
            best_key, best_tile = key, tile
    return best_tile


def mlp_kernel(x_ref, w1_ref, b1_ref, w2_ref, b2_ref, w3_ref, b3_ref, o_ref):
    # All operands are lane-dense (hidden/output dims padded to multiples of
    # 128), so every matmul and bias add is an unmasked MXU / VPU pass.
    h = jnp.dot(x_ref[...], w1_ref[...], preferred_element_type=jnp.float32)
    h = jnp.maximum(h + b1_ref[...], 0.0)
    h = jnp.dot(h, w2_ref[...], preferred_element_type=jnp.float32)
    h = jnp.maximum(h + b2_ref[...], 0.0)
    h = jnp.dot(h, w3_ref[...], preferred_element_type=jnp.float32)
    o_ref[...] = h + b3_ref[...]


def fully_connected_forward(x_nchw, params, tile_b=None):
    """x_nchw: (B, C, H, W) float32. params: dict of weights/biases."""
    B = x_nchw.shape[0]
    x = x_nchw.reshape(B, -1).astype(jnp.float32)  # torch.flatten(x, start_dim=1)
    in_size = x.shape[1]  # NOT padded: dominant HBM stream, K-tail is cheaper

    w1, b1 = params["w1"], params["b1"]
    w2, b2 = params["w2"], params["b2"]
    w3, b3 = params["w3"], params["b3"]
    h1, h2, out_true = w1.shape[1], w2.shape[1], w3.shape[1]

    # Lane-pad hidden and output dims (128-aligned only; no extra MXU padding).
    # Zero padding is exact: padded hidden columns produce relu(0 + 0) = 0 and
    # the matching padded contraction rows of the next weight are zero.
    h1p = _round_up(h1, _LANE)
    h2p = _round_up(h2, _LANE)
    outp = _round_up(out_true, _LANE)
    w1p = jnp.pad(w1, ((0, 0), (0, h1p - h1)))
    b1p = jnp.pad(b1, ((0, 0), (0, h1p - h1)))
    w2p = jnp.pad(w2, ((0, h1p - h1), (0, h2p - h2)))
    b2p = jnp.pad(b2, ((0, 0), (0, h2p - h2)))
    w3p = jnp.pad(w3, ((0, h2p - h2), (0, outp - out_true)))
    b3p = jnp.pad(b3, ((0, 0), (0, outp - out_true)))

    # Adaptive, lane-aligned batch tile; pad batch rows to a whole number of tiles.
    if tile_b is None:
        tile_b = _choose_tile_b(B)
    else:
        tile_b = _round_up(min(int(tile_b), _round_up(B, _LANE)), _LANE)
        tile_b = min(tile_b, _MAX_TILE_B)
    padded_b = _round_up(B, tile_b)
    if padded_b != B:
        x = jnp.pad(x, ((0, padded_b - B), (0, 0)))
    grid = (padded_b // tile_b,)

    flops = 2 * padded_b * (in_size * h1p + h1p * h2p + h2p * outp)
    bytes_accessed = 4 * (
        padded_b * in_size                        # x stream in
        + in_size * h1p + h1p * h2p + h2p * outp  # resident weights (DMA'd once)
        + h1p + h2p + outp                        # biases
        + padded_b * outp                         # output stream
    )

    const2d = lambda i: (0, 0)  # weights/biases stay resident across grid steps

    out = pl.pallas_call(
        mlp_kernel,
        out_shape=jax.ShapeDtypeStruct((padded_b, outp), jnp.float32),
        grid=grid,
        in_specs=[
            pl.BlockSpec((tile_b, in_size), lambda i: (i, 0)),  # x: tiled over batch
            pl.BlockSpec((in_size, h1p), const2d),              # w1 (lane-padded, resident)
            pl.BlockSpec((1, h1p), const2d),                    # b1
            pl.BlockSpec((h1p, h2p), const2d),                  # w2
            pl.BlockSpec((1, h2p), const2d),                    # b2
            pl.BlockSpec((h2p, outp), const2d),                 # w3
            pl.BlockSpec((1, outp), const2d),                   # b3
        ],
        out_specs=pl.BlockSpec((tile_b, outp), lambda i: (i, 0)),
        compiler_params=pltpu.CompilerParams(
            dimension_semantics=("parallel",),      # v7x: shard batch across 2 TCs
            vmem_limit_bytes=48 * 1024 * 1024,      # headroom for tile_b up to 2048
        ),
        cost_estimate=pl.CostEstimate(
            flops=flops, transcendentals=0, bytes_accessed=bytes_accessed),
    )(x, w1p, b1p, w2p, b2p, w3p, b3p)

    return out[:B, :out_true]


def init_params(key, input_size=784, h1=300, h2=100, output_size=10):
    """Deterministic init mimicking PyTorch Linear's U(-1/sqrt(fan_in), 1/sqrt(fan_in))."""
    ks = jax.random.split(key, 6)

    def linear_init(kw, kb, fan_in, fan_out):
        bound = 1.0 / jnp.sqrt(jnp.float32(fan_in))
        # stored as (in, out) so kernel does x @ W
        w = jax.random.uniform(kw, (fan_in, fan_out), jnp.float32, -bound, bound)
        b = jax.random.uniform(kb, (1, fan_out), jnp.float32, -bound, bound)
        return w, b

    w1, b1 = linear_init(ks[0], ks[1], input_size, h1)
    w2, b2 = linear_init(ks[2], ks[3], h1, h2)
    w3, b3 = linear_init(ks[4], ks[5], h2, output_size)
    return {"w1": w1, "b1": b1, "w2": w2, "b2": b2, "w3": w3, "b3": b3}


def reference_forward(x_nchw, params):
    x = x_nchw.reshape(x_nchw.shape[0], -1)
    h = jnp.maximum(x @ params["w1"] + params["b1"], 0.0)
    h = jnp.maximum(h @ params["w2"] + params["b2"], 0.0)
    return h @ params["w3"] + params["b3"]


if __name__ == "__main__":
    key = jax.random.PRNGKey(0)
    k_x, k_p = jax.random.split(key)

    # batch=2, NCHW input whose flatten gives input_size=784 (1x28x28)
    x = jax.random.normal(k_x, (2, 1, 28, 28), dtype=jnp.float32)
    params = init_params(k_p)

    out = jax.block_until_ready(fully_connected_forward(x, params))
    ref = reference_forward(x, params)
    assert out.shape == (2, 10), out.shape
    assert jnp.allclose(out, ref, atol=1e-4, rtol=1e-4), "mismatch vs reference"

    # Batch that exercises the adaptive-tile / padding path (single large tile).
    x_big = jax.random.normal(k_x, (1037, 1, 28, 28), dtype=jnp.float32)
    out_big = jax.block_until_ready(fully_connected_forward(x_big, params))
    ref_big = reference_forward(x_big, params)
    assert out_big.shape == (1037, 10), out_big.shape
    assert jnp.allclose(out_big, ref_big, atol=1e-4, rtol=1e-4), "mismatch (adaptive) vs reference"

    # Explicit tile override that exercises the multi-step streaming grid.
    out_multi = jax.block_until_ready(fully_connected_forward(x_big, params, tile_b=384))
    assert out_multi.shape == (1037, 10), out_multi.shape
    assert jnp.allclose(out_multi, ref_big, atol=1e-4, rtol=1e-4), "mismatch (tiled) vs reference"

    print("KERNEL_OK")
</pallas_src>

<mosaic_0001>
module attributes {stable_mosaic.version = 11 : i64} {
  func.func @mlp_kernel(%arg0: i32, %arg1: memref<128x784xf32, #tpu.memory_space<vmem>>, %arg2: memref<784x384xf32, #tpu.memory_space<vmem>>, %arg3: memref<1x384xf32, #tpu.memory_space<vmem>>, %arg4: memref<384x128xf32, #tpu.memory_space<vmem>>, %arg5: memref<1x128xf32, #tpu.memory_space<vmem>>, %arg6: memref<128x128xf32, #tpu.memory_space<vmem>>, %arg7: memref<1x128xf32, #tpu.memory_space<vmem>>, %arg8: memref<128x128xf32, #tpu.memory_space<vmem>>) attributes {dimension_semantics = [#tpu.dimension_semantics<parallel>], iteration_bounds = array<i64: 1>, scalar_prefetch = 0 : i64, scratch_operands = 0 : i64, tpu.core_type = #tpu.core_type<tc>, window_params = [{transform_indices = @transform_0, window_bounds = array<i64: 128, 784>}, {pipeline_mode = #tpu.pipeline_mode<synchronous>, transform_indices = @transform_1, window_bounds = array<i64: 784, 384>}, {pipeline_mode = #tpu.pipeline_mode<synchronous>, transform_indices = @transform_2, window_bounds = array<i64: 1, 384>}, {pipeline_mode = #tpu.pipeline_mode<synchronous>, transform_indices = @transform_3, window_bounds = array<i64: 384, 128>}, {pipeline_mode = #tpu.pipeline_mode<synchronous>, transform_indices = @transform_4, window_bounds = array<i64: 1, 128>}, {pipeline_mode = #tpu.pipeline_mode<synchronous>, transform_indices = @transform_5, window_bounds = array<i64: 128, 128>}, {pipeline_mode = #tpu.pipeline_mode<synchronous>, transform_indices = @transform_6, window_bounds = array<i64: 1, 128>}, {transform_indices = @transform_7, window_bounds = array<i64: 128, 128>}]} {
    %c0 = arith.constant 0 : index
    %c0_0 = arith.constant 0 : index
    %0 = vector.load %arg1[%c0, %c0_0] : memref<128x784xf32, #tpu.memory_space<vmem>>, vector<128x784xf32>
    %c0_1 = arith.constant 0 : index
    %c0_2 = arith.constant 0 : index
    %1 = vector.load %arg2[%c0_1, %c0_2] : memref<784x384xf32, #tpu.memory_space<vmem>>, vector<784x384xf32>
    %cst = arith.constant dense<0.000000e+00> : vector<128x384xf32>
    %2 = tpu.matmul %0, %1, %cst {dimension_numbers = #tpu.dot_dimension_numbers<[1], [0], [0], [1], [0, 0, 1, 1], [], []>} : vector<128x784xf32>, vector<784x384xf32>, vector<128x384xf32> -> vector<128x384xf32>
    %c0_3 = arith.constant 0 : index
    %c0_4 = arith.constant 0 : index
    %3 = vector.load %arg3[%c0_3, %c0_4] : memref<1x384xf32, #tpu.memory_space<vmem>>, vector<1x384xf32>
    %4 = vector.broadcast %3 : vector<1x384xf32> to vector<128x384xf32>
    %5 = arith.addf %2, %4 : vector<128x384xf32>
    %cst_5 = arith.constant 0.000000e+00 : f32
    %6 = vector.broadcast %cst_5 : f32 to vector<128x384xf32>
    %7 = arith.maximumf %5, %6 : vector<128x384xf32>
    %c0_6 = arith.constant 0 : index
    %c0_7 = arith.constant 0 : index
    %8 = vector.load %arg4[%c0_6, %c0_7] : memref<384x128xf32, #tpu.memory_space<vmem>>, vector<384x128xf32>
    %cst_8 = arith.constant dense<0.000000e+00> : vector<128x128xf32>
    %9 = tpu.matmul %7, %8, %cst_8 {dimension_numbers = #tpu.dot_dimension_numbers<[1], [0], [0], [1], [0, 0, 1, 1], [], []>} : vector<128x384xf32>, vector<384x128xf32>, vector<128x128xf32> -> vector<128x128xf32>
    %c0_9 = arith.constant 0 : index
    %c0_10 = arith.constant 0 : index
    %10 = vector.load %arg5[%c0_9, %c0_10] : memref<1x128xf32, #tpu.memory_space<vmem>>, vector<1x128xf32>
    %11 = vector.broadcast %10 : vector<1x128xf32> to vector<128x128xf32>
    %12 = arith.addf %9, %11 : vector<128x128xf32>
    %cst_11 = arith.constant 0.000000e+00 : f32
    %13 = vector.broadcast %cst_11 : f32 to vector<128x128xf32>
    %14 = arith.maximumf %12, %13 : vector<128x128xf32>
    %c0_12 = arith.constant 0 : index
    %c0_13 = arith.constant 0 : index
    %15 = vector.load %arg6[%c0_12, %c0_13] : memref<128x128xf32, #tpu.memory_space<vmem>>, vector<128x128xf32>
    %cst_14 = arith.constant dense<0.000000e+00> : vector<128x128xf32>
    %16 = tpu.matmul %14, %15, %cst_14 {dimension_numbers = #tpu.dot_dimension_numbers<[1], [0], [0], [1], [0, 0, 1, 1], [], []>} : vector<128x128xf32>, vector<128x128xf32>, vector<128x128xf32> -> vector<128x128xf32>
    %c0_15 = arith.constant 0 : index
    %c0_16 = arith.constant 0 : index
    %17 = vector.load %arg7[%c0_15, %c0_16] : memref<1x128xf32, #tpu.memory_space<vmem>>, vector<1x128xf32>
    %18 = vector.broadcast %17 : vector<1x128xf32> to vector<128x128xf32>
    %19 = arith.addf %16, %18 : vector<128x128xf32>
    %c0_17 = arith.constant 0 : index
    %c0_18 = arith.constant 0 : index
    %20 = vector.load %arg8[%c0_17, %c0_18] : memref<128x128xf32, #tpu.memory_space<vmem>>, vector<128x128xf32>
    tpu.vector_store %arg8[%c0_17, %c0_18], %19 {strides = array<i32>} : memref<128x128xf32, #tpu.memory_space<vmem>>, vector<128x128xf32>,
    return
  }
  func.func @transform_0(%arg0: i32) -> (i32, i32) {
    %c0_i32 = arith.constant 0 : i32
    %c0_i32_0 = arith.constant 0 : i32
    return %arg0, %c0_i32 : i32, i32
  }
  func.func @transform_1(%arg0: i32) -> (i32, i32) {
    %c0_i32 = arith.constant 0 : i32
    %c0_i32_0 = arith.constant 0 : i32
    %c0_i32_1 = arith.constant 0 : i32
    return %c0_i32, %c0_i32_0 : i32, i32
  }
  func.func @transform_2(%arg0: i32) -> (i32, i32) {
    %c0_i32 = arith.constant 0 : i32
    %c0_i32_0 = arith.constant 0 : i32
    %c0_i32_1 = arith.constant 0 : i32
    return %c0_i32, %c0_i32_0 : i32, i32
  }
  func.func @transform_3(%arg0: i32) -> (i32, i32) {
    %c0_i32 = arith.constant 0 : i32
    %c0_i32_0 = arith.constant 0 : i32
    %c0_i32_1 = arith.constant 0 : i32
    return %c0_i32, %c0_i32_0 : i32, i32
  }
  func.func @transform_4(%arg0: i32) -> (i32, i32) {
    %c0_i32 = arith.constant 0 : i32
    %c0_i32_0 = arith.constant 0 : i32
    %c0_i32_1 = arith.constant 0 : i32
    return %c0_i32, %c0_i32_0 : i32, i32
  }
  func.func @transform_5(%arg0: i32) -> (i32, i32) {
    %c0_i32 = arith.constant 0 : i32
    %c0_i32_0 = arith.constant 0 : i32
    %c0_i32_1 = arith.constant 0 : i32
    return %c0_i32, %c0_i32_0 : i32, i32
  }
  func.func @transform_6(%arg0: i32) -> (i32, i32) {
    %c0_i32 = arith.constant 0 : i32
    %c0_i32_0 = arith.constant 0 : i32
    %c0_i32_1 = arith.constant 0 : i32
    return %c0_i32, %c0_i32_0 : i32, i32
  }
  func.func @transform_7(%arg0: i32) -> (i32, i32) {
    %c0_i32 = arith.constant 0 : i32
    %c0_i32_0 = arith.constant 0 : i32
    return %arg0, %c0_i32 : i32, i32
  }
}

</mosaic_0001>

<bundles_post_ra>
// kernel: tpu_custom_call.1
= control target key start
LH: loop header
LB: loop body
LE: loop exit
PB: predicated region body
PF: predicated region fallthrough
CT: control target
= control target key end

     0   :  { %12 = vsyncpa [#allocation3], 0  ;;  %s4506_s0 = inlined_call_operand.vmem [shape: f32[128,784], index: 0, kind: input, shape index: {}]   ;;  %s4507_s1 = inlined_call_operand.hbm [shape: f32[784,384], index: 1, kind: input, shape index: {}]   ;;  %s4508_s2 = inlined_call_operand.hbm [shape: f32[1,384], index: 2, kind: input, shape index: {}]   ;;  %s4509_s3 = inlined_call_operand.hbm [shape: f32[384,128], index: 3, kind: input, shape index: {}]   ;;  %s4510_s4 = inlined_call_operand.hbm [shape: f32[1,128], index: 4, kind: input, shape index: {}]   ;;  %s4511_s5 = inlined_call_operand.hbm [shape: f32[128,128], index: 5, kind: input, shape index: {}]   ;;  %s4512_s6 = inlined_call_operand.hbm [shape: f32[1,128], index: 6, kind: input, shape index: {}]   ;;  %s4513_s7 = inlined_call_operand.hbm [shape: f32[128,128], index: 7, kind: output, shape index: {}]  }
   0x1   :  { %13 = vsyncpa [#allocation6], 0 }
   0x2   :  { %14 = vsyncpa [#allocation9], 0 }
   0x3   :  { %15 = vsyncpa [#allocation12], 0 }
   0x4   :  { %16 = vsyncpa [#allocation4], 0  ;;  %s3252_s24 = smov [#allocation5]   ;;  %s3253_s26 = smov [#allocation8]  }
   0x5   :  { %s37_s25 = sshll.u32 %s3252_s24, 4  ;;  %s59_s27 = sshll.u32 %s3253_s26, 4  ;;  %s38_s25 = int_to_ptr.vmem [resolvable:$true] %s37_s25  ;;  %s60_s27 = int_to_ptr.vmem [resolvable:$true] %s59_s27 }
   0x6   :  { %s3110_s28 = scalar_lea.vmem %s38_s25, 48  ;;  %s3114_s29 = scalar_lea.vmem %s38_s25, 64 }
   0x7   :  { %p3111_p0 = scmp.ne.s32.totalorder %s38_s25, %s3110_s28  ;;  %p3115_p1 = scmp.lt.s32.totalorder %s38_s25, %s38_s25 }
   0x8   :  { %p3116_p2 = scmp.lt.s32.totalorder %s3114_s29, %s3110_s28 }
   0xa   :  { %p3117_p3 = por %p3116_p2, %p3115_p1 }
   0xc   :  { %p3118_p4 = pnand %p3117_p3, %p3111_p0 }
   0xe   :  { %3121 = shalt.err (!%p3118_p4)
}
   0xf   :  { %40 = dma.hbm_to_vmem [thread:$0]  %s4508_s2, 48, %s38_s25, [#allocation6]  }
  0x10   :  { %s3130_s9 = scalar_lea.vmem %s60_s27, 16  ;;  %s3134_s10 = scalar_lea.vmem %s60_s27, 32 }
  0x11   :  { %p3131_p5 = scmp.ne.s32.totalorder %s60_s27, %s3130_s9  ;;  %p3135_p6 = scmp.lt.s32.totalorder %s60_s27, %s60_s27 }
  0x12   :  { %p3136_p7 = scmp.lt.s32.totalorder %s3134_s10, %s3130_s9 }
  0x14   :  { %p3137_p8 = por %p3136_p7, %p3135_p6 }
  0x16   :  { %p3138_p9 = pnand %p3137_p8, %p3131_p5 }
  0x18   :  { %3141 = shalt.err (!%p3138_p9)
}
  0x19   :  { %62 = dma.hbm_to_vmem [thread:$0]  %s4510_s4, 16, %s60_s27, [#allocation9]  }
  0x1a   :  { %s3254_s13 = smov [#allocation2]  }
  0x1b   :  { %s24_s14 = sshll.u32 %s3254_s13, 4  ;;  %s25_s14 = int_to_ptr.vmem [resolvable:$true] %s24_s14 }
  0x1c   :  { %s3150_s15 = scalar_lea.vmem %s25_s14, 37632  ;;  %p3155_p11 = scmp.lt.s32.totalorder %s25_s14, %s25_s14 }
  0x1d   :  { %p3151_p10 = scmp.ne.s32.totalorder %s25_s14, %s3150_s15  ;;  %p3156_p12 = scmp.lt.s32.totalorder %s3150_s15, %s3150_s15 }
  0x1f   :  { %p3157_p13 = por %p3156_p12, %p3155_p11 }
  0x21   :  { %p3158_p0 = pnand %p3157_p13, %p3151_p10 }
  0x23   :  { %3161 = shalt.err (!%p3158_p0)
}
  0x24   :  { %s3255_s2 = smov 384   ;;  %s3256_s16 = smov 24  }
  0x25   :  { %30 = dma.hbm_to_vmem [thread:$0]  %s4507_s1, 37632, %s25_s14, [#allocation3], %s3255_s2, %s3255_s2, %s3256_s16  }
  0x26   :  { %s3257_s19 = smov [#allocation7]  }
  0x27   :  { %s46_s20 = sshll.u32 %s3257_s19, 4  ;;  %s47_s20 = int_to_ptr.vmem [resolvable:$true] %s46_s20 }
  0x28   :  { %s3170_s4 = scalar_lea.vmem %s47_s20, 6144  ;;  %p3175_p2 = scmp.lt.s32.totalorder %s47_s20, %s47_s20 }
  0x29   :  { %p3171_p1 = scmp.ne.s32.totalorder %s47_s20, %s3170_s4  ;;  %p3176_p3 = scmp.lt.s32.totalorder %s3170_s4, %s3170_s4 }
  0x2b   :  { %p3177_p4 = por %p3176_p3, %p3175_p2 }
  0x2d   :  { %p3178_p5 = pnand %p3177_p4, %p3171_p1 }
  0x2f   :  { %3181 = shalt.err (!%p3178_p5)
}
  0x30   :  { %s3258_s21 = smov 128   ;;  %s3259_s22 = smov 8  }
  0x31   :  { %52 = dma.hbm_to_vmem [thread:$0]  %s4509_s3, 6144, %s47_s20, [#allocation6], %s3258_s21, %s3258_s21, %s3259_s22  }
  0x32   :  { %s3260_s1 = smov [#allocation10]   ;;  %s3261_s26 = smov [#allocation11]  }
  0x33   :  { %s68_s25 = sshll.u32 %s3260_s1, 4  ;;  %s81_s27 = sshll.u32 %s3261_s26, 4  ;;  %s69_s25 = int_to_ptr.vmem [resolvable:$true] %s68_s25  ;;  %s82_s27 = int_to_ptr.vmem [resolvable:$true] %s81_s27 }
  0x34   :  { %s3190_s28 = scalar_lea.vmem %s69_s25, 2048  ;;  %p3195_p7 = scmp.lt.s32.totalorder %s69_s25, %s69_s25 }
  0x35   :  { %p3191_p6 = scmp.ne.s32.totalorder %s69_s25, %s3190_s28  ;;  %p3196_p8 = scmp.lt.s32.totalorder %s3190_s28, %s3190_s28 }
  0x37   :  { %p3197_p9 = por %p3196_p8, %p3195_p7 }
  0x39   :  { %p3198_p10 = pnand %p3197_p9, %p3191_p6 }
  0x3b   :  { %3201 = shalt.err (!%p3198_p10)
}
  0x3c   :  { %74 = dma.hbm_to_vmem [thread:$0]  %s4511_s5, 2048, %s69_s25, [#allocation9], %s3258_s21, %s3258_s21, %s3259_s22  }
  0x3d   :  { %s3210_s3 = scalar_lea.vmem %s82_s27, 16  ;;  %s3214_s8 = scalar_lea.vmem %s82_s27, 32 }
  0x3e   :  { %p3211_p11 = scmp.ne.s32.totalorder %s82_s27, %s3210_s3  ;;  %p3215_p12 = scmp.lt.s32.totalorder %s82_s27, %s82_s27 }
  0x3f   :  { %p3216_p13 = scmp.lt.s32.totalorder %s3214_s8, %s3210_s3 }
  0x41   :  { %p3217_p0 = por %p3216_p13, %p3215_p12 }
  0x43   :  { %p3218_p1 = pnand %p3217_p0, %p3211_p11 }
  0x45   :  { %3221 = shalt.err (!%p3218_p1)
}
  0x46   :  { %84 = dma.hbm_to_vmem [thread:$0]  %s4512_s6, 16, %s82_s27, [#allocation12]  }
  0x47   :  { %3242 = dma.done.wait [#allocation3], 37632  }
  0x48   :  { %3243 = vsyncadd [#allocation3], 4294929664 }
  0x49   :  { %3244 = dma.done.wait [#allocation6], 6192  }
  0x4a   :  { %3245 = vsyncadd [#allocation6], 4294961104 }
  0x4b   :  { %3246 = dma.done.wait [#allocation9], 2064  }
  0x4c   :  { %3247 = vsyncadd [#allocation9], 4294965232 }
  0x4d   :  { %3248 = dma.done.wait [#allocation12], 16  }
  0x4e   :  { %3249 = vsyncadd [#allocation12], 4294967280  ;;  %v261_v0 = vld [vmem:[#allocation2 + $0x170] sm:$0xff]  ;;  %v260_v2 = vld [vmem:[#allocation2 + $0x168] sm:$0xff]  ;;  %vm526_vm0 = vcmask 130048  }
  0x4f   :  { %v357_v1 = vld [vmem:[#allocation2 + $0x470] sm:$0xff]  ;;  %575 = vmatprep.subr.mxu0 %v261_v0  ;;  %v356_v3 = vld [vmem:[#allocation2 + $0x468] sm:$0xff]  ;;  %v258_v4 = vld [vmem:[#allocation2 + $0x158] sm:$0xff] }
  0x50   :  { %736 = vmatprep.subr.mxu1 %v357_v1  ;;  %v354_v5 = vld [vmem:[#allocation2 + $0x458] sm:$0xff]  ;;  %576 = vmatpush1.msra.mxu0 %v260_v2  ;;  %v257_v6 = vld [vmem:[#allocation2 + $0x150] sm:$0xff]  ;;  %v255_v8 = vld [vmem:[#allocation2 + $0x140] sm:$0xff] }
  0x51   :  { %737 = vmatpush1.msra.mxu1 %v356_v3  ;;  %v353_v7 = vld [vmem:[#allocation2 + $0x450] sm:$0xff]  ;;  %577 = vmatprep.subr.mxu0 %v258_v4  ;;  %v351_v9 = vld [vmem:[#allocation2 + $0x440] sm:$0xff]  ;;  %v254_v10 = vld [vmem:[#allocation2 + $0x138] sm:$0xff] }
  0x52   :  { %738 = vmatprep.subr.mxu1 %v354_v5  ;;  %v350_v11 = vld [vmem:[#allocation2 + $0x438] sm:$0xff]  ;;  %578 = vmatpush1.msra.mxu0 %v257_v6  ;;  %v252_v12 = vld [vmem:[#allocation2 + $0x128] sm:$0xff]  ;;  %v251_v14 = vld [vmem:[#allocation2 + $0x120] sm:$0xff] }
  0x53   :  { %739 = vmatpush1.msra.mxu1 %v353_v7  ;;  %v348_v13 = vld [vmem:[#allocation2 + $0x428] sm:$0xff]  ;;  %579 = vmatprep.subr.mxu0 %v255_v8  ;;  %v347_v15 = vld [vmem:[#allocation2 + $0x420] sm:$0xff]  ;;  %v249_v16 = vld [vmem:[#allocation2 + $0x110] sm:$0xff] }
  0x54   :  { %740 = vmatprep.subr.mxu1 %v351_v9  ;;  %580 = vmatpush1.msra.mxu0 %v254_v10  ;;  %v345_v17 = vld [vmem:[#allocation2 + $0x410] sm:$0xff]  ;;  %v248_v18 = vld [vmem:[#allocation2 + $0x108] sm:$0xff]  ;;  %v246_v20 = vld [vmem:[#allocation2 + $0xf8] sm:$0xff] }
  0x55   :  { %741 = vmatpush1.msra.mxu1 %v350_v11  ;;  %581 = vmatprep.subr.mxu0 %v252_v12  ;;  %v344_v19 = vld [vmem:[#allocation2 + $0x408] sm:$0xff]  ;;  %v342_v21 = vld [vmem:[#allocation2 + $0x3f8] sm:$0xff]  ;;  %v245_v22 = vld [vmem:[#allocation2 + $0xf0] sm:$0xff] }
  0x56   :  { %742 = vmatprep.subr.mxu1 %v348_v13  ;;  %582 = vmatpush1.msra.mxu0 %v251_v14  ;;  %v341_v23 = vld [vmem:[#allocation2 + $0x3f0] sm:$0xff]  ;;  %v243_v24 = vld [vmem:[#allocation2 + $0xe0] sm:$0xff]  ;;  %v242_v26 = vld [vmem:[#allocation2 + $0xd8] sm:$0xff] }
  0x57   :  { %743 = vmatpush1.msra.mxu1 %v347_v15  ;;  %583 = vmatprep.subr.mxu0 %v249_v16  ;;  %v339_v25 = vld [vmem:[#allocation2 + $0x3e0] sm:$0xff]  ;;  %v338_v27 = vld [vmem:[#allocation2 + $0x3d8] sm:$0xff]  ;;  %v240_v28 = vld [vmem:[#allocation2 + $0xc8] sm:$0xff] }
  0x58   :  { %744 = vmatprep.subr.mxu1 %v345_v17  ;;  %584 = vmatpush1.msra.mxu0 %v248_v18  ;;  %v336_v29 = vld [vmem:[#allocation2 + $0x3c8] sm:$0xff]  ;;  %v239_v30 = vld [vmem:[#allocation2 + $0xc0] sm:$0xff]  ;;  %v237_v32 = vld [vmem:[#allocation2 + $0xb0] sm:$0xff] }
  0x59   :  { %745 = vmatpush1.msra.mxu1 %v344_v19  ;;  %585 = vmatprep.subr.mxu0 %v246_v20  ;;  %v335_v31 = vld [vmem:[#allocation2 + $0x3c0] sm:$0xff]  ;;  %v333_v33 = vld [vmem:[#allocation2 + $0x3b0] sm:$0xff]  ;;  %v236_v34 = vld [vmem:[#allocation2 + $0xa8] sm:$0xff] }
  0x5a   :  { %746 = vmatprep.subr.mxu1 %v342_v21  ;;  %586 = vmatpush1.msra.mxu0 %v245_v22  ;;  %v332_v35 = vld [vmem:[#allocation2 + $0x3a8] sm:$0xff]  ;;  %v234_v36 = vld [vmem:[#allocation2 + $0x98] sm:$0xff]  ;;  %v233_v38 = vld [vmem:[#allocation2 + $0x90] sm:$0xff] }
  0x5b   :  { %747 = vmatpush1.msra.mxu1 %v341_v23  ;;  %587 = vmatprep.subr.mxu0 %v243_v24  ;;  %v330_v37 = vld [vmem:[#allocation2 + $0x398] sm:$0xff]  ;;  %v329_v39 = vld [vmem:[#allocation2 + $0x390] sm:$0xff]  ;;  %v231_v40 = vld [vmem:[#allocation2 + $0x80] sm:$0xff] }
  0x5c   :  { %748 = vmatprep.subr.mxu1 %v339_v25  ;;  %588 = vmatpush1.msra.mxu0 %v242_v26  ;;  %v327_v41 = vld [vmem:[#allocation2 + $0x380] sm:$0xff]  ;;  %v230_v42 = vld [vmem:[#allocation2 + $0x78] sm:$0xff]  ;;  %v228_v44 = vld [vmem:[#allocation2 + $0x68] sm:$0xff] }
  0x5d   :  { %749 = vmatpush1.msra.mxu1 %v338_v27  ;;  %589 = vmatprep.subr.mxu0 %v240_v28  ;;  %v326_v43 = vld [vmem:[#allocation2 + $0x378] sm:$0xff]  ;;  %v324_v45 = vld [vmem:[#allocation2 + $0x368] sm:$0xff]  ;;  %v227_v46 = vld [vmem:[#allocation2 + $0x60] sm:$0xff] }
  0x5e   :  { %750 = vmatprep.subr.mxu1 %v336_v29  ;;  %590 = vmatpush1.msra.mxu0 %v239_v30  ;;  %v323_v47 = vld [vmem:[#allocation2 + $0x360] sm:$0xff]  ;;  %v225_v48 = vld [vmem:[#allocation2 + $0x50] sm:$0xff]  ;;  %v224_v50 = vld [vmem:[#allocation2 + $0x48] sm:$0xff] }
  0x5f   :  { %751 = vmatpush1.msra.mxu1 %v335_v31  ;;  %591 = vmatprep.subr.mxu0 %v237_v32  ;;  %v321_v49 = vld [vmem:[#allocation2 + $0x350] sm:$0xff]  ;;  %v320_v51 = vld [vmem:[#allocation2 + $0x348] sm:$0xff]  ;;  %v222_v52 = vld [vmem:[#allocation2 + $0x38] sm:$0xff] }
  0x60   :  { %752 = vmatprep.subr.mxu1 %v333_v33  ;;  %592 = vmatpush1.msra.mxu0 %v236_v34  ;;  %v318_v53 = vld [vmem:[#allocation2 + $0x338] sm:$0xff]  ;;  %v221_v54 = vld [vmem:[#allocation2 + $0x30] sm:$0xff]  ;;  %v219_v56 = vld [vmem:[#allocation2 + $0x20] sm:$0xff] }
  0x61   :  { %753 = vmatpush1.msra.mxu1 %v332_v35  ;;  %593 = vmatprep.subr.mxu0 %v234_v36  ;;  %v317_v55 = vld [vmem:[#allocation2 + $0x330] sm:$0xff]  ;;  %v315_v57 = vld [vmem:[#allocation2 + $0x320] sm:$0xff]  ;;  %v218_v58 = vld [vmem:[#allocation2 + $0x18] sm:$0xff] }
  0x62   :  { %754 = vmatprep.subr.mxu1 %v330_v37  ;;  %594 = vmatpush1.msra.mxu0 %v233_v38  ;;  %v314_v59 = vld [vmem:[#allocation2 + $0x318] sm:$0xff]  ;;  %v216_v60 = vld [vmem:[#allocation2 + $0x8] sm:$0xff]  ;;  %v215_v62 = vld [vmem:[#allocation2] sm:$0xff] }
  0x63   :  { %755 = vmatpush1.msra.mxu1 %v329_v39  ;;  %595 = vmatprep.subr.mxu0 %v231_v40  ;;  %v312_v61 = vld [vmem:[#allocation2 + $0x308] sm:$0xff]  ;;  %v311_v63 = vld [vmem:[#allocation2 + $0x300] sm:$0xff]  ;;  %v309_v0 = vld [vmem:[#allocation2 + $0x2f0] sm:$0xff] }
  0x64   :  { %756 = vmatprep.subr.mxu1 %v327_v41  ;;  %596 = vmatpush1.msra.mxu0 %v230_v42  ;;  %v405_v1 = vld [vmem:[#allocation2 + $0x5f0] sm:$0xff]  ;;  %v308_v2 = vld [vmem:[#allocation2 + $0x2e8] sm:$0xff]  ;;  %v306_v4 = vld [vmem:[#allocation2 + $0x2d8] sm:$0xff] }
  0x65   :  { %757 = vmatpush1.msra.mxu1 %v326_v43  ;;  %597 = vmatprep.subr.mxu0 %v228_v44  ;;  %v404_v3 = vld [vmem:[#allocation2 + $0x5e8] sm:$0xff]  ;;  %v402_v5 = vld [vmem:[#allocation2 + $0x5d8] sm:$0xff]  ;;  %v305_v6 = vld [vmem:[#allocation2 + $0x2d0] sm:$0xff] }
  0x66   :  { %758 = vmatprep.subr.mxu1 %v324_v45  ;;  %598 = vmatpush1.msra.mxu0 %v227_v46  ;;  %v401_v7 = vld [vmem:[#allocation2 + $0x5d0] sm:$0xff]  ;;  %v303_v8 = vld [vmem:[#allocation2 + $0x2c0] sm:$0xff]  ;;  %v302_v10 = vld [vmem:[#allocation2 + $0x2b8] sm:$0xff] }
  0x67   :  { %759 = vmatpush1.msra.mxu1 %v323_v47  ;;  %599 = vmatprep.subr.mxu0 %v225_v48  ;;  %v399_v9 = vld [vmem:[#allocation2 + $0x5c0] sm:$0xff]  ;;  %v398_v11 = vld [vmem:[#allocation2 + $0x5b8] sm:$0xff]  ;;  %v300_v12 = vld [vmem:[#allocation2 + $0x2a8] sm:$0xff] }
  0x68   :  { %760 = vmatprep.subr.mxu1 %v321_v49  ;;  %600 = vmatpush1.msra.mxu0 %v224_v50  ;;  %v396_v13 = vld [vmem:[#allocation2 + $0x5a8] sm:$0xff]  ;;  %v299_v14 = vld [vmem:[#allocation2 + $0x2a0] sm:$0xff]  ;;  %v297_v16 = vld [vmem:[#allocation2 + $0x290] sm:$0xff] }
  0x69   :  { %761 = vmatpush1.msra.mxu1 %v320_v51  ;;  %601 = vmatprep.subr.mxu0 %v222_v52  ;;  %v395_v15 = vld [vmem:[#allocation2 + $0x5a0] sm:$0xff]  ;;  %v393_v17 = vld [vmem:[#allocation2 + $0x590] sm:$0xff]  ;;  %v296_v18 = vld [vmem:[#allocation2 + $0x288] sm:$0xff] }
  0x6a   :  { %762 = vmatprep.subr.mxu1 %v318_v53  ;;  %602 = vmatpush1.msra.mxu0 %v221_v54  ;;  %v392_v19 = vld [vmem:[#allocation2 + $0x588] sm:$0xff]  ;;  %v294_v20 = vld [vmem:[#allocation2 + $0x278] sm:$0xff]  ;;  %v293_v22 = vld [vmem:[#allocation2 + $0x270] sm:$0xff] }
  0x6b   :  { %763 = vmatpush1.msra.mxu1 %v317_v55  ;;  %603 = vmatprep.subr.mxu0 %v219_v56  ;;  %v390_v21 = vld [vmem:[#allocation2 + $0x578] sm:$0xff]  ;;  %v389_v23 = vld [vmem:[#allocation2 + $0x570] sm:$0xff]  ;;  %v291_v24 = vld [vmem:[#allocation2 + $0x260] sm:$0xff] }
  0x6c   :  { %764 = vmatprep.subr.mxu1 %v315_v57  ;;  %604 = vmatpush1.msra.mxu0 %v218_v58  ;;  %v387_v25 = vld [vmem:[#allocation2 + $0x560] sm:$0xff]  ;;  %v290_v26 = vld [vmem:[#allocation2 + $0x258] sm:$0xff]  ;;  %v288_v28 = vld [vmem:[#allocation2 + $0x248] sm:$0xff] }
  0x6d   :  { %765 = vmatpush1.msra.mxu1 %v314_v59  ;;  %605 = vmatprep.subr.mxu0 %v216_v60  ;;  %v386_v27 = vld [vmem:[#allocation2 + $0x558] sm:$0xff]  ;;  %v384_v29 = vld [vmem:[#allocation2 + $0x548] sm:$0xff]  ;;  %v287_v30 = vld [vmem:[#allocation2 + $0x240] sm:$0xff] }
  0x6e   :  { %766 = vmatprep.subr.mxu1 %v312_v61  ;;  %606 = vmatpush1.msra.mxu0 %v215_v62  ;;  %v383_v31 = vld [vmem:[#allocation2 + $0x540] sm:$0xff]  ;;  %v285_v32 = vld [vmem:[#allocation2 + $0x230] sm:$0xff]  ;;  %v284_v34 = vld [vmem:[#allocation2 + $0x228] sm:$0xff] }
  0x6f   :  { %767 = vmatpush1.msra.mxu1 %v311_v63  ;;  %607 = vmatprep.subr.mxu0 %v309_v0  ;;  %v381_v33 = vld [vmem:[#allocation2 + $0x530] sm:$0xff]  ;;  %v380_v35 = vld [vmem:[#allocation2 + $0x528] sm:$0xff]  ;;  %v282_v36 = vld [vmem:[#allocation2 + $0x218] sm:$0xff] }
  0x70   :  { %768 = vmatprep.subr.mxu1 %v405_v1  ;;  %608 = vmatpush2.msra.mxu0 %v308_v2  ;;  %v378_v37 = vld [vmem:[#allocation2 + $0x518] sm:$0xff]  ;;  %v281_v38 = vld [vmem:[#allocation2 + $0x210] sm:$0xff]  ;;  %v279_v40 = vld [vmem:[#allocation2 + $0x200] sm:$0xff] }
  0x71   :  { %769 = vmatpush2.msra.mxu1 %v404_v3  ;;  %609 = vmatprep.subr.mxu0 %v306_v4  ;;  %v377_v39 = vld [vmem:[#allocation2 + $0x510] sm:$0xff]  ;;  %v375_v41 = vld [vmem:[#allocation2 + $0x500] sm:$0xff]  ;;  %v278_v42 = vld [vmem:[#allocation2 + $0x1f8] sm:$0xff] }
  0x72   :  { %770 = vmatprep.subr.mxu1 %v402_v5  ;;  %610 = vmatpush2.msra.mxu0 %v305_v6  ;;  %v374_v43 = vld [vmem:[#allocation2 + $0x4f8] sm:$0xff]  ;;  %v276_v44 = vld [vmem:[#allocation2 + $0x1e8] sm:$0xff]  ;;  %v275_v46 = vld [vmem:[#allocation2 + $0x1e0] sm:$0xff] }
  0x73   :  { %771 = vmatpush2.msra.mxu1 %v401_v7  ;;  %611 = vmatprep.subr.mxu0 %v303_v8  ;;  %v372_v45 = vld [vmem:[#allocation2 + $0x4e8] sm:$0xff]  ;;  %v371_v47 = vld [vmem:[#allocation2 + $0x4e0] sm:$0xff]  ;;  %v273_v48 = vld [vmem:[#allocation2 + $0x1d0] sm:$0xff] }
  0x74   :  { %772 = vmatprep.subr.mxu1 %v399_v9  ;;  %612 = vmatpush2.msra.mxu0 %v302_v10  ;;  %v369_v49 = vld [vmem:[#allocation2 + $0x4d0] sm:$0xff]  ;;  %v272_v50 = vld [vmem:[#allocation2 + $0x1c8] sm:$0xff]  ;;  %v270_v52 = vld [vmem:[#allocation2 + $0x1b8] sm:$0xff] }
  0x75   :  { %773 = vmatpush2.msra.mxu1 %v398_v11  ;;  %613 = vmatprep.subr.mxu0 %v300_v12  ;;  %v368_v51 = vld [vmem:[#allocation2 + $0x4c8] sm:$0xff]  ;;  %v366_v53 = vld [vmem:[#allocation2 + $0x4b8] sm:$0xff]  ;;  %v269_v54 = vld [vmem:[#allocation2 + $0x1b0] sm:$0xff] }
  0x76   :  { %774 = vmatprep.subr.mxu1 %v396_v13  ;;  %614 = vmatpush2.msra.mxu0 %v299_v14  ;;  %v365_v55 = vld [vmem:[#allocation2 + $0x4b0] sm:$0xff]  ;;  %v267_v56 = vld [vmem:[#allocation2 + $0x1a0] sm:$0xff]  ;;  %v266_v58 = vld [vmem:[#allocation2 + $0x198] sm:$0xff] }
  0x77   :  { %775 = vmatpush2.msra.mxu1 %v395_v15  ;;  %615 = vmatprep.subr.mxu0 %v297_v16  ;;  %v363_v57 = vld [vmem:[#allocation2 + $0x4a0] sm:$0xff]  ;;  %v362_v59 = vld [vmem:[#allocation2 + $0x498] sm:$0xff]  ;;  %v264_v60 = vld [vmem:[#allocation2 + $0x188] sm:$0xff] }
  0x78   :  { %776 = vmatprep.subr.mxu1 %v393_v17  ;;  %616 = vmatpush2.msra.mxu0 %v296_v18  ;;  %v360_v61 = vld [vmem:[#allocation2 + $0x488] sm:$0xff]  ;;  %v263_v62 = vld [vmem:[#allocation2 + $0x180] sm:$0xff]  ;;  %v106_v1 = vld [vmem:[%s4506_s0 + $0x18] sm:$0xff] }
  0x79   :  { %777 = vmatpush2.msra.mxu1 %v392_v19  ;;  %617 = vmatprep.subr.mxu0 %v294_v20  ;;  %v104_v63 = vld [vmem:[%s4506_s0 + $0x8] sm:$0xff]  ;;  %v359_v0 = vld [vmem:[#allocation2 + $0x480] sm:$0xff]  ;;  %v105_v3 = vld [vmem:[%s4506_s0 + $0x10] sm:$0xff] }
  0x7a   :  { %778 = vmatprep.subr.mxu1 %v390_v21  ;;  %618 = vmatpush2.msra.mxu0 %v293_v22  ;;  %v103_v2 = vld [vmem:[%s4506_s0] sm:$0xff]  ;;  %v453_v4 = vld [vmem:[#allocation2 + $0x770] sm:$0xff]  ;;  %v452_v5 = vld [vmem:[#allocation2 + $0x768] sm:$0xff] }
  0x7b   :  { %779 = vmatpush2.msra.mxu1 %v389_v23  ;;  %619 = vmatprep.subr.mxu0 %v291_v24  ;;  %v450_v6 = vld [vmem:[#allocation2 + $0x758] sm:$0xff]  ;;  %v111_v7 = vld [vmem:[%s4506_s0 + $0x40] sm:$0xff]  ;;  %v113_v8 = vld [vmem:[%s4506_s0 + $0x50] sm:$0xff] }
  0x7c   :  { %780 = vmatprep.subr.mxu1 %v387_v25  ;;  %620 = vmatpush2.msra.mxu0 %v290_v26  ;;  %v449_v9 = vld [vmem:[#allocation2 + $0x750] sm:$0xff]  ;;  %v3349_v10 = vld [vmem:[%s4506_s0 + $0x38] sm:$0xff]  ;;  %v112_v11 = vld [vmem:[%s4506_s0 + $0x48] sm:$0xff] }
  0x7d   :  { %781 = vmatpush2.msra.mxu1 %v386_v27  ;;  %621 = vmatprep.subr.mxu0 %v288_v28  ;;  %v447_v12 = vld [vmem:[#allocation2 + $0x740] sm:$0xff]  ;;  %v446_v13 = vld [vmem:[#allocation2 + $0x738] sm:$0xff]  ;;  %v444_v14 = vld [vmem:[#allocation2 + $0x728] sm:$0xff] }
  0x7e   :  { %782 = vmatprep.subr.mxu1 %v384_v29  ;;  %622 = vmatpush2.msra.mxu0 %v287_v30  ;;  %v3358_v15 = vld [vmem:[%s4506_s0 + $0x78] sm:$0xff]  ;;  %v120_v16 = vld [vmem:[%s4506_s0 + $0x88] sm:$0xff]  ;;  %v443_v17 = vld [vmem:[#allocation2 + $0x720] sm:$0xff] }
  0x7f   :  { %783 = vmatpush2.msra.mxu1 %v383_v31  ;;  %623 = vmatprep.subr.mxu0 %v285_v32  ;;  %v3366_v18 = vld [vmem:[%s4506_s0 + $0x70] sm:$0xff]  ;;  %v119_v19 = vld [vmem:[%s4506_s0 + $0x80] sm:$0xff]  ;;  %v440_v21 = vld [vmem:[#allocation2 + $0x708] sm:$0xff] }
  0x80   :  { %784 = vmatprep.subr.mxu1 %v381_v33  ;;  %624 = vmatpush2.msra.mxu0 %v284_v34  ;;  %v441_v20 = vld [vmem:[#allocation2 + $0x710] sm:$0xff]  ;;  %v438_v22 = vld [vmem:[#allocation2 + $0x6f8] sm:$0xff]  ;;  %v127_v24 = vld [vmem:[%s4506_s0 + $0xc0] sm:$0xff] }
  0x81   :  { %785 = vmatpush2.msra.mxu1 %v380_v35  ;;  %625 = vmatprep.subr.mxu0 %v282_v36  ;;  %v3376_v23 = vld [vmem:[%s4506_s0 + $0xb0] sm:$0xff]  ;;  %v3384_v26 = vld [vmem:[%s4506_s0 + $0xa8] sm:$0xff]  ;;  %v126_v27 = vld [vmem:[%s4506_s0 + $0xb8] sm:$0xff] }
  0x82   :  { %786 = vmatprep.subr.mxu1 %v378_v37  ;;  %626 = vmatpush2.msra.mxu0 %v281_v38  ;;  %v437_v25 = vld [vmem:[#allocation2 + $0x6f0] sm:$0xff]  ;;  %v435_v28 = vld [vmem:[#allocation2 + $0x6e0] sm:$0xff]  ;;  %v434_v29 = vld [vmem:[#allocation2 + $0x6d8] sm:$0xff] }
  0x83   :  { %787 = vmatpush2.msra.mxu1 %v377_v39  ;;  %627 = vmatprep.subr.mxu0 %v279_v40  ;;  %v432_v30 = vld [vmem:[#allocation2 + $0x6c8] sm:$0xff]  ;;  %v134_v32 = vld [vmem:[%s4506_s0 + $0xf8] sm:$0xff]  ;;  %v431_v33 = vld [vmem:[#allocation2 + $0x6c0] sm:$0xff] }
  0x84   :  { %788 = vmatprep.subr.mxu1 %v375_v41  ;;  %628 = vmatpush2.msra.mxu0 %v278_v42  ;;  %v3394_v31 = vld [vmem:[%s4506_s0 + $0xe8] sm:$0xff]  ;;  %v3402_v34 = vld [vmem:[%s4506_s0 + $0xe0] sm:$0xff]  ;;  %v133_v35 = vld [vmem:[%s4506_s0 + $0xf0] sm:$0xff] }
  0x85   :  { %789 = vmatpush2.msra.mxu1 %v374_v43  ;;  %629 = vmatprep.subr.mxu0 %v276_v44  ;;  %v429_v36 = vld [vmem:[#allocation2 + $0x6b0] sm:$0xff]  ;;  %v428_v37 = vld [vmem:[#allocation2 + $0x6a8] sm:$0xff]  ;;  %v426_v38 = vld [vmem:[#allocation2 + $0x698] sm:$0xff] }
  0x86   :  { %790 = vmatprep.subr.mxu1 %v372_v45  ;;  %630 = vmatpush2.msra.mxu0 %v275_v46  ;;  %v3412_v39 = vld [vmem:[%s4506_s0 + $0x120] sm:$0xff]  ;;  %v141_v40 = vld [vmem:[%s4506_s0 + $0x130] sm:$0xff]  ;;  %v3420_v42 = vld [vmem:[%s4506_s0 + $0x118] sm:$0xff] }
  0x87   :  { %791 = vmatpush2.msra.mxu1 %v371_v47  ;;  %631 = vmatprep.subr.mxu0 %v273_v48  ;;  %v425_v41 = vld [vmem:[#allocation2 + $0x690] sm:$0xff]  ;;  %v140_v43 = vld [vmem:[%s4506_s0 + $0x128] sm:$0xff]  ;;  %v423_v44 = vld [vmem:[#allocation2 + $0x680] sm:$0xff] }
  0x88   :  { %792 = vmatprep.subr.mxu1 %v369_v49  ;;  %632 = vmatpush2.msra.mxu0 %v272_v50  ;;  %v422_v45 = vld [vmem:[#allocation2 + $0x678] sm:$0xff]  ;;  %v420_v46 = vld [vmem:[#allocation2 + $0x668] sm:$0xff]  ;;  %v419_v49 = vld [vmem:[#allocation2 + $0x660] sm:$0xff] }
  0x89   :  { %793 = vmatpush2.msra.mxu1 %v368_v51  ;;  %633 = vmatprep.subr.mxu0 %v270_v52  ;;  %v3430_v47 = vld [vmem:[%s4506_s0 + $0x158] sm:$0xff]  ;;  %v148_v48 = vld [vmem:[%s4506_s0 + $0x168] sm:$0xff]  ;;  %v3438_v50 = vld [vmem:[%s4506_s0 + $0x150] sm:$0xff] }
  0x8a   :  { %794 = vmatprep.subr.mxu1 %v366_v53  ;;  %634 = vmatpush2.msra.mxu0 %v269_v54  ;;  %v147_v51 = vld [vmem:[%s4506_s0 + $0x160] sm:$0xff]  ;;  %v417_v52 = vld [vmem:[#allocation2 + $0x650] sm:$0xff]  ;;  %v416_v53 = vld [vmem:[#allocation2 + $0x648] sm:$0xff] }
  0x8b   :  { %795 = vmatpush2.msra.mxu1 %v365_v55  ;;  %635 = vmatprep.subr.mxu0 %v267_v56  ;;  %v414_v54 = vld [vmem:[#allocation2 + $0x638] sm:$0xff]  ;;  %v3448_v55 = vld [vmem:[%s4506_s0 + $0x190] sm:$0xff]  ;;  %v155_v56 = vld [vmem:[%s4506_s0 + $0x1a0] sm:$0xff] }
  0x8c   :  { %796 = vmatprep.subr.mxu1 %v363_v57  ;;  %636 = vmatpush2.msra.mxu0 %v266_v58  ;;  %v413_v57 = vld [vmem:[#allocation2 + $0x630] sm:$0xff]  ;;  %v3456_v58 = vld [vmem:[%s4506_s0 + $0x188] sm:$0xff] }
  0x8d   :  { %797 = vmatpush2.msra.mxu1 %v362_v59  ;;  %637 = vmatprep.subr.mxu0 %v264_v60  ;;  %v154_v59 = vld [vmem:[%s4506_s0 + $0x198] sm:$0xff]  ;;  %v411_v60 = vld [vmem:[#allocation2 + $0x620] sm:$0xff] }
  0x8e   :  { %798 = vmatprep.subr.mxu1 %v360_v61  ;;  %638 = vmatpush2.msra.mxu0 %v263_v62  ;;  %v410_v61 = vld [vmem:[#allocation2 + $0x618] sm:$0xff]  ;;  %v408_v62 = vld [vmem:[#allocation2 + $0x608] sm:$0xff] }
  0x8f   :  { %639 = vmatprep.mubr.f32.mxu0 %v104_v63  ;;  %799 = vmatpush2.msra.mxu1 %v359_v0  ;;  %v3466_v63 = vld [vmem:[%s4506_s0 + $0x1c8] sm:$0xff]  ;;  %v162_v0 = vld [vmem:[%s4506_s0 + $0x1d8] sm:$0xff] }
  0x90   :  { %800 = vmatprep.mubr.f32.mxu1 %v106_v1  ;;  %640 = vmatmul.mubr.f32.vlgmr.msra.gmra.mxu0 %v103_v2  ;;  %v407_v1 = vld [vmem:[#allocation2 + $0x600] sm:$0xff] }
  0x91   :  { %801 = vmatmul.mubr.f32.vlgmr.msra.gmra.mxu1 %v105_v3  ;;  %897 = vmatprep.subr.mxu0 %v453_v4  ;;  %v3474_v2 = vld [vmem:[%s4506_s0 + $0x1c0] sm:$0xff]  ;;  %v161_v3 = vld [vmem:[%s4506_s0 + $0x1d0] sm:$0xff] }
  0x92   :  { %2988 = vmatprep.subr.mxu1 %v453_v4  ;;  %898 = vmatpush1.msra.mxu0 %v452_v5  ;;  %v501_v4 = vld [vmem:[#allocation2 + $0x8f0] sm:$0xff] }
  0x93   :  { %3020 = vmatpush1.msra.mxu1 %v452_v5  ;;  %899 = vmatprep.subr.mxu0 %v450_v6  ;;  %v500_v5 = vld [vmem:[#allocation2 + $0x8e8] sm:$0xff] }
  0x94   :  { %2989 = vmatprep.subr.mxu1 %v450_v6  ;;  %645 = vmatprep.mubr.f32.mxu0 %v111_v7  ;;  %v498_v6 = vld [vmem:[#allocation2 + $0x8d8] sm:$0xff]  ;;  %v3484_v7 = vld [vmem:[%s4506_s0 + $0x200] sm:$0xff] }
  0x95   :  { %806 = vmatprep.mubr.f32.mxu1 %v113_v8  ;;  %900 = vmatpush1.msra.mxu0 %v449_v9  ;;  %v169_v8 = vld [vmem:[%s4506_s0 + $0x210] sm:$0xff] }
  0x96   :  { %3021 = vmatpush1.msra.mxu1 %v449_v9  ;;  %646 = vmatmul.mubr.f32.gmra.mxu0 %v3349_v10  ;;  %v497_v9 = vld [vmem:[#allocation2 + $0x8d0] sm:$0xff] }
  0x97   :  { %807 = vmatmul.mubr.f32.gmra.mxu1 %v112_v11  ;;  %901 = vmatprep.subr.mxu0 %v447_v12  ;;  %v3492_v11 = vld [vmem:[%s4506_s0 + $0x1f8] sm:$0xff] }
  0x98   :  { %2990 = vmatprep.subr.mxu1 %v447_v12  ;;  %902 = vmatpush1.msra.mxu0 %v446_v13  ;;  %v168_v12 = vld [vmem:[%s4506_s0 + $0x208] sm:$0xff] }
  0x99   :  { %3022 = vmatpush1.msra.mxu1 %v446_v13  ;;  %903 = vmatprep.subr.mxu0 %v444_v14  ;;  %v495_v13 = vld [vmem:[#allocation2 + $0x8c0] sm:$0xff] }
  0x9a   :  { %2991 = vmatprep.subr.mxu1 %v444_v14  ;;  %651 = vmatprep.mubr.f32.mxu0 %v3358_v15  ;;  %v494_v14 = vld [vmem:[#allocation2 + $0x8b8] sm:$0xff] }
  0x9b   :  { %812 = vmatprep.mubr.f32.mxu1 %v120_v16  ;;  %904 = vmatpush1.msra.mxu0 %v443_v17  ;;  %v492_v16 = vld [vmem:[#allocation2 + $0x8a8] sm:$0xff] }
  0x9c   :  { %3023 = vmatpush1.msra.mxu1 %v443_v17  ;;  %652 = vmatmul.mubr.f32.gmra.mxu0 %v3366_v18  ;;  %v3502_v17 = vld [vmem:[%s4506_s0 + $0x238] sm:$0xff] }
  0x9d   :  { %813 = vmatmul.mubr.f32.gmra.mxu1 %v119_v19  ;;  %905 = vmatprep.subr.mxu0 %v441_v20  ;;  %v176_v19 = vld [vmem:[%s4506_s0 + $0x248] sm:$0xff] }
  0x9e   :  { %2992 = vmatprep.subr.mxu1 %v441_v20  ;;  %906 = vmatpush1.msra.mxu0 %v440_v21  ;;  %v491_v20 = vld [vmem:[#allocation2 + $0x8a0] sm:$0xff] }
  0x9f   :  { %3024 = vmatpush1.msra.mxu1 %v440_v21  ;;  %907 = vmatprep.subr.mxu0 %v438_v22  ;;  %v3510_v21 = vld [vmem:[%s4506_s0 + $0x230] sm:$0xff] }
  0xa0   :  { %2993 = vmatprep.subr.mxu1 %v438_v22  ;;  %657 = vmatprep.mubr.f32.mxu0 %v3376_v23  ;;  %v175_v22 = vld [vmem:[%s4506_s0 + $0x240] sm:$0xff] }
  0xa1   :  { %818 = vmatprep.mubr.f32.mxu1 %v127_v24  ;;  %908 = vmatpush1.msra.mxu0 %v437_v25  ;;  %v489_v24 = vld [vmem:[#allocation2 + $0x890] sm:$0xff] }
  0xa2   :  { %3025 = vmatpush1.msra.mxu1 %v437_v25  ;;  %658 = vmatmul.mubr.f32.gmra.mxu0 %v3384_v26  ;;  %v488_v25 = vld [vmem:[#allocation2 + $0x888] sm:$0xff] }
  0xa3   :  { %819 = vmatmul.mubr.f32.gmra.mxu1 %v126_v27  ;;  %909 = vmatprep.subr.mxu0 %v435_v28  ;;  %v486_v27 = vld [vmem:[#allocation2 + $0x878] sm:$0xff] }
  0xa4   :  { %2994 = vmatprep.subr.mxu1 %v435_v28  ;;  %910 = vmatpush1.msra.mxu0 %v434_v29  ;;  %v3520_v28 = vld [vmem:[%s4506_s0 + $0x270] sm:$0xff] }
  0xa5   :  { %3026 = vmatpush1.msra.mxu1 %v434_v29  ;;  %911 = vmatprep.subr.mxu0 %v432_v30  ;;  %v183_v29 = vld [vmem:[%s4506_s0 + $0x280] sm:$0xff] }
  0xa6   :  { %2995 = vmatprep.subr.mxu1 %v432_v30  ;;  %663 = vmatprep.mubr.f32.mxu0 %v3394_v31  ;;  %v485_v30 = vld [vmem:[#allocation2 + $0x870] sm:$0xff] }
  0xa7   :  { %824 = vmatprep.mubr.f32.mxu1 %v134_v32  ;;  %912 = vmatpush1.msra.mxu0 %v431_v33  ;;  %v3528_v32 = vld [vmem:[%s4506_s0 + $0x268] sm:$0xff] }
  0xa8   :  { %3027 = vmatpush1.msra.mxu1 %v431_v33  ;;  %664 = vmatmul.mubr.f32.gmra.mxu0 %v3402_v34  ;;  %v182_v33 = vld [vmem:[%s4506_s0 + $0x278] sm:$0xff] }
  0xa9   :  { %825 = vmatmul.mubr.f32.gmra.mxu1 %v133_v35  ;;  %913 = vmatprep.subr.mxu0 %v429_v36  ;;  %v483_v35 = vld [vmem:[#allocation2 + $0x860] sm:$0xff] }
  0xaa   :  { %2996 = vmatprep.subr.mxu1 %v429_v36  ;;  %914 = vmatpush1.msra.mxu0 %v428_v37  ;;  %v482_v36 = vld [vmem:[#allocation2 + $0x858] sm:$0xff] }
  0xab   :  { %3028 = vmatpush1.msra.mxu1 %v428_v37  ;;  %915 = vmatprep.subr.mxu0 %v426_v38  ;;  %v480_v37 = vld [vmem:[#allocation2 + $0x848] sm:$0xff] }
  0xac   :  { %2997 = vmatprep.subr.mxu1 %v426_v38  ;;  %669 = vmatprep.mubr.f32.mxu0 %v3412_v39  ;;  %v3538_v38 = vld [vmem:[%s4506_s0 + $0x2a8] sm:$0xff] }
  0xad   :  { %830 = vmatprep.mubr.f32.mxu1 %v141_v40  ;;  %916 = vmatpush1.msra.mxu0 %v425_v41  ;;  %v190_v40 = vld [vmem:[%s4506_s0 + $0x2b8] sm:$0xff] }
  0xae   :  { %3029 = vmatpush1.msra.mxu1 %v425_v41  ;;  %670 = vmatmul.mubr.f32.gmra.mxu0 %v3420_v42  ;;  %v479_v41 = vld [vmem:[#allocation2 + $0x840] sm:$0xff] }
  0xaf   :  { %831 = vmatmul.mubr.f32.gmra.mxu1 %v140_v43  ;;  %917 = vmatprep.subr.mxu0 %v423_v44  ;;  %v3546_v43 = vld [vmem:[%s4506_s0 + $0x2a0] sm:$0xff] }
  0xb0   :  { %2998 = vmatprep.subr.mxu1 %v423_v44  ;;  %918 = vmatpush1.msra.mxu0 %v422_v45  ;;  %v189_v44 = vld [vmem:[%s4506_s0 + $0x2b0] sm:$0xff] }
  0xb1   :  { %3030 = vmatpush1.msra.mxu1 %v422_v45  ;;  %919 = vmatprep.subr.mxu0 %v420_v46  ;;  %v477_v45 = vld [vmem:[#allocation2 + $0x830] sm:$0xff] }
  0xb2   :  { %2999 = vmatprep.subr.mxu1 %v420_v46  ;;  %675 = vmatprep.mubr.f32.mxu0 %v3430_v47  ;;  %v476_v46 = vld [vmem:[#allocation2 + $0x828] sm:$0xff] }
  0xb3   :  { %836 = vmatprep.mubr.f32.mxu1 %v148_v48  ;;  %920 = vmatpush1.msra.mxu0 %v419_v49  ;;  %v474_v48 = vld [vmem:[#allocation2 + $0x818] sm:$0xff] }
  0xb4   :  { %3031 = vmatpush1.msra.mxu1 %v419_v49  ;;  %676 = vmatmul.mubr.f32.gmra.mxu0 %v3438_v50  ;;  %v3556_v49 = vld [vmem:[%s4506_s0 + $0x2e0] sm:$0xff] }
  0xb5   :  { %837 = vmatmul.mubr.f32.gmra.mxu1 %v147_v51  ;;  %921 = vmatprep.subr.mxu0 %v417_v52  ;;  %v3561_v51 = vld [vmem:[%s4506_s0 + $0x2f0] sm:$0xff] }
  0xb6   :  { %3000 = vmatprep.subr.mxu1 %v417_v52  ;;  %922 = vmatpush1.msra.mxu0 %v416_v53  ;;  %v473_v52 = vld [vmem:[#allocation2 + $0x810] sm:$0xff] }
  0xb7   :  { %3032 = vmatpush1.msra.mxu1 %v416_v53  ;;  %923 = vmatprep.subr.mxu0 %v414_v54  ;;  %v3566_v53 = vld [vmem:[%s4506_s0 + $0x2d8] sm:$0xff] }
  0xb8   :  { %3001 = vmatprep.subr.mxu1 %v414_v54  ;;  %681 = vmatprep.mubr.f32.mxu0 %v3448_v55  ;;  %v3571_v54 = vld [vmem:[%s4506_s0 + $0x2e8] sm:$0xff] }
  0xb9   :  { %842 = vmatprep.mubr.f32.mxu1 %v155_v56  ;;  %924 = vmatpush1.msra.mxu0 %v413_v57  ;;  %v471_v56 = vld [vmem:[#allocation2 + $0x800] sm:$0xff] }
  0xba   :  { %3033 = vmatpush1.msra.mxu1 %v413_v57  ;;  %682 = vmatmul.mubr.f32.gmra.mxu0 %v3456_v58  ;;  %v470_v57 = vld [vmem:[#allocation2 + $0x7f8] sm:$0xff] }
  0xbb   :  { %843 = vmatmul.mubr.f32.gmra.mxu1 %v154_v59  ;;  %925 = vmatprep.subr.mxu0 %v411_v60  ;;  %v468_v59 = vld [vmem:[#allocation2 + $0x7e8] sm:$0xff] }
  0xbc   :  { %3002 = vmatprep.subr.mxu1 %v411_v60  ;;  %926 = vmatpush1.msra.mxu0 %v410_v61  ;;  %v3580_v60 = vld [vmem:[%s4506_s0 + $0x318] sm:$0xff] }
  0xbd   :  { %3034 = vmatpush1.msra.mxu1 %v410_v61  ;;  %927 = vmatprep.subr.mxu0 %v408_v62  ;;  %v3585_v61 = vld [vmem:[%s4506_s0 + $0x328] sm:$0xff] }
  0xbe   :  { %3003 = vmatprep.subr.mxu1 %v408_v62  ;;  %687 = vmatprep.mubr.f32.mxu0 %v3466_v63  ;;  %v467_v62 = vld [vmem:[#allocation2 + $0x7e0] sm:$0xff] }
  0xbf   :  { %848 = vmatprep.mubr.f32.mxu1 %v162_v0  ;;  %928 = vmatpush1.msra.mxu0 %v407_v1  ;;  %v3590_v0 = vld [vmem:[%s4506_s0 + $0x310] sm:$0xff] }
  0xc0   :  { %3035 = vmatpush1.msra.mxu1 %v407_v1  ;;  %688 = vmatmul.mubr.f32.gmra.mxu0 %v3474_v2  ;;  %v3595_v1 = vld [vmem:[%s4506_s0 + $0x320] sm:$0xff] }
  0xc1   :  { %849 = vmatmul.mubr.f32.gmra.mxu1 %v161_v3  ;;  %929 = vmatprep.subr.mxu0 %v501_v4  ;;  %v465_v3 = vld [vmem:[#allocation2 + $0x7d0] sm:$0xff] }
  0xc2   :  { %3004 = vmatprep.subr.mxu1 %v501_v4  ;;  %930 = vmatpush2.msra.mxu0 %v500_v5  ;;  %v464_v4 = vld [vmem:[#allocation2 + $0x7c8] sm:$0xff] }
  0xc3   :  { %3036 = vmatpush2.msra.mxu1 %v500_v5  ;;  %931 = vmatprep.subr.mxu0 %v498_v6  ;;  %v462_v5 = vld [vmem:[#allocation2 + $0x7b8] sm:$0xff] }
  0xc4   :  { %3005 = vmatprep.subr.mxu1 %v498_v6  ;;  %693 = vmatprep.mubr.f32.mxu0 %v3484_v7  ;;  %v3604_v6 = vld [vmem:[%s4506_s0 + $0x350] sm:$0xff] }
  0xc5   :  { %854 = vmatprep.mubr.f32.mxu1 %v169_v8  ;;  %932 = vmatpush2.msra.mxu0 %v497_v9  ;;  %v3609_v8 = vld [vmem:[%s4506_s0 + $0x360] sm:$0xff] }
  0xc6   :  { %3037 = vmatpush2.msra.mxu1 %v497_v9  ;;  %694 = vmatmul.mubr.f32.gmra.mxu0 %v3492_v11  ;;  %v461_v9 = vld [vmem:[#allocation2 + $0x7b0] sm:$0xff] }
  0xc7   :  { %855 = vmatmul.mubr.f32.gmra.mxu1 %v168_v12  ;;  %933 = vmatprep.subr.mxu0 %v495_v13  ;;  %v3614_v12 = vld [vmem:[%s4506_s0 + $0x348] sm:$0xff] }
  0xc8   :  { %3006 = vmatprep.subr.mxu1 %v495_v13  ;;  %934 = vmatpush2.msra.mxu0 %v494_v14  ;;  %v3619_v13 = vld [vmem:[%s4506_s0 + $0x358] sm:$0xff] }
  0xc9   :  { %3038 = vmatpush2.msra.mxu1 %v494_v14  ;;  %935 = vmatprep.subr.mxu0 %v492_v16  ;;  %v459_v14 = vld [vmem:[#allocation2 + $0x7a0] sm:$0xff] }
  0xca   :  { %3007 = vmatprep.subr.mxu1 %v492_v16  ;;  %699 = vmatprep.mubr.f32.mxu0 %v3502_v17  ;;  %v458_v16 = vld [vmem:[#allocation2 + $0x798] sm:$0xff] }
  0xcb   :  { %860 = vmatprep.mubr.f32.mxu1 %v176_v19  ;;  %936 = vmatpush2.msra.mxu0 %v491_v20  ;;  %v456_v19 = vld [vmem:[#allocation2 + $0x788] sm:$0xff] }
  0xcc   :  { %3039 = vmatpush2.msra.mxu1 %v491_v20  ;;  %700 = vmatmul.mubr.f32.gmra.mxu0 %v3510_v21  ;;  %v455_v20 = vld [vmem:[#allocation2 + $0x780] sm:$0xff] }
  0xcd   :  { %861 = vmatmul.mubr.f32.gmra.mxu1 %v175_v22  ;;  %937 = vmatprep.subr.mxu0 %v489_v24  ;;  %v3628_v22 = vld [vmem:[%s4506_s0 + $0x28] sm:$0xff] }
  0xce   :  { %3008 = vmatprep.subr.mxu1 %v489_v24  ;;  %938 = vmatpush2.msra.mxu0 %v488_v25  ;;  %v192_v24 = vld [vmem:[%s4506_s0 + $0x2c8] sm:$0xff] }
  0xcf   :  { %3040 = vmatpush2.msra.mxu1 %v488_v25  ;;  %939 = vmatprep.subr.mxu0 %v486_v27  ;;  %v3636_v25 = vld [vmem:[%s4506_s0 + $0x20] sm:$0xff] }
  0xd0   :  { %3009 = vmatprep.subr.mxu1 %v486_v27  ;;  %705 = vmatprep.mubr.f32.mxu0 %v3520_v28  ;;  %v191_v27 = vld [vmem:[%s4506_s0 + $0x2c0] sm:$0xff] }
  0xd1   :  { %866 = vmatprep.mubr.f32.mxu1 %v183_v29  ;;  %940 = vmatpush2.msra.mxu0 %v485_v30  ;;  %v310_v29 = vld [vmem:[#allocation2 + $0x2f8] sm:$0xff] }
  0xd2   :  { %3041 = vmatpush2.msra.mxu1 %v485_v30  ;;  %706 = vmatmul.mubr.f32.gmra.mxu0 %v3528_v32  ;;  %v3644_v30 = vld [vmem:[%s4506_s0 + $0x60] sm:$0xff] }
  0xd3   :  { %867 = vmatmul.mubr.f32.gmra.mxu1 %v182_v33  ;;  %941 = vmatprep.subr.mxu0 %v483_v35  ;;  %v262_v33 = vld [vmem:[#allocation2 + $0x178] sm:$0xff] }
  0xd4   :  { %3010 = vmatprep.subr.mxu1 %v483_v35  ;;  %942 = vmatpush2.msra.mxu0 %v482_v36  ;;  %v199_v35 = vld [vmem:[%s4506_s0 + $0x300] sm:$0xff] }
  0xd5   :  { %3042 = vmatpush2.msra.mxu1 %v482_v36  ;;  %943 = vmatprep.subr.mxu0 %v480_v37  ;;  %v507_v36 = vld [vmem:[#allocation2 + $0x920] sm:$0xff] }
  0xd6   :  { %3011 = vmatprep.subr.mxu1 %v480_v37  ;;  %711 = vmatprep.mubr.f32.mxu0 %v3538_v38  ;;  %v307_v37 = vld [vmem:[#allocation2 + $0x2e0] sm:$0xff] }
  0xd7   :  { %872 = vmatprep.mubr.f32.mxu1 %v190_v40  ;;  %944 = vmatpush2.msra.mxu0 %v479_v41  ;;  %v3655_v40 = vld [vmem:[%s4506_s0 + $0x58] sm:$0xff] }
  0xd8   :  { %3043 = vmatpush2.msra.mxu1 %v479_v41  ;;  %712 = vmatmul.mubr.f32.gmra.mxu0 %v3546_v43  ;;  %v198_v41 = vld [vmem:[%s4506_s0 + $0x2f8] sm:$0xff] }
  0xd9   :  { %873 = vmatmul.mubr.f32.gmra.mxu1 %v189_v44  ;;  %945 = vmatprep.subr.mxu0 %v477_v45  ;;  %v506_v44 = vld [vmem:[#allocation2 + $0x918] sm:$0xff] }
  0xda   :  { %3012 = vmatprep.subr.mxu1 %v477_v45  ;;  %946 = vmatpush2.msra.mxu0 %v476_v46  ;;  %v259_v45 = vld [vmem:[#allocation2 + $0x160] sm:$0xff] }
  0xdb   :  { %3044 = vmatpush2.msra.mxu1 %v476_v46  ;;  %947 = vmatprep.subr.mxu0 %v474_v48  ;;  %v304_v46 = vld [vmem:[#allocation2 + $0x2c8] sm:$0xff] }
  0xdc   :  { %3013 = vmatprep.subr.mxu1 %v474_v48  ;;  %717 = vmatprep.mubr.f32.mxu0 %v3556_v49  ;;  %v3663_v48 = vld [vmem:[%s4506_s0 + $0x98] sm:$0xff] }
  0xdd   :  { %878 = vmatprep.mubr.f32.mxu1 %v3561_v51  ;;  %948 = vmatpush2.msra.mxu0 %v473_v52 }
  0xde   :  { %3045 = vmatpush2.msra.mxu1 %v473_v52  ;;  %718 = vmatmul.mubr.f32.gmra.mxu0 %v3566_v53  ;;  %v206_v52 = vld [vmem:[%s4506_s0 + $0x338] sm:$0xff] }
  0xdf   :  { %879 = vmatmul.mubr.f32.gmra.mxu1 %v3571_v54  ;;  %949 = vmatprep.subr.mxu0 %v471_v56 }
  0xe0   :  { %3014 = vmatprep.subr.mxu1 %v471_v56  ;;  %950 = vmatpush2.msra.mxu0 %v470_v57  ;;  %v256_v56 = vld [vmem:[#allocation2 + $0x148] sm:$0xff] }
  0xe1   :  { %3046 = vmatpush2.msra.mxu1 %v470_v57  ;;  %951 = vmatprep.subr.mxu0 %v468_v59  ;;  %v3672_v57 = vld [vmem:[%s4506_s0 + $0x90] sm:$0xff] }
  0xe2   :  { %3015 = vmatprep.subr.mxu1 %v468_v59  ;;  %723 = vmatprep.mubr.f32.mxu0 %v3580_v60  ;;  %v205_v59 = vld [vmem:[%s4506_s0 + $0x330] sm:$0xff] }
  0xe3   :  { %884 = vmatprep.mubr.f32.mxu1 %v3585_v61  ;;  %952 = vmatpush2.msra.mxu0 %v467_v62 }
  0xe4   :  { %3047 = vmatpush2.msra.mxu1 %v467_v62  ;;  %724 = vmatmul.mubr.f32.gmra.mxu0 %v3590_v0  ;;  %v301_v62 = vld [vmem:[#allocation2 + $0x2b0] sm:$0xff] }
  0xe5   :  { %885 = vmatmul.mubr.f32.gmra.mxu1 %v3595_v1  ;;  %953 = vmatprep.subr.mxu0 %v465_v3 }
  0xe6   :  { %3016 = vmatprep.subr.mxu1 %v465_v3  ;;  %954 = vmatpush2.msra.mxu0 %v464_v4  ;;  %v3681_v3 = vld [vmem:[%s4506_s0 + $0xd0] sm:$0xff] }
  0xe7   :  { %3048 = vmatpush2.msra.mxu1 %v464_v4  ;;  %955 = vmatprep.subr.mxu0 %v462_v5  ;;  %v253_v4 = vld [vmem:[#allocation2 + $0x130] sm:$0xff] }
  0xe8   :  { %3017 = vmatprep.subr.mxu1 %v462_v5  ;;  %729 = vmatprep.mubr.f32.mxu0 %v3604_v6  ;;  %v213_v5 = vld [vmem:[%s4506_s0 + $0x370] sm:$0xff] }
  0xe9   :  { %890 = vmatprep.mubr.f32.mxu1 %v3609_v8  ;;  %956 = vmatpush2.msra.mxu0 %v461_v9 }
  0xea   :  { %3049 = vmatpush2.msra.mxu1 %v461_v9  ;;  %730 = vmatmul.mubr.f32.gmra.mxu0 %v3614_v12  ;;  %v504_v9 = vld [vmem:[#allocation2 + $0x908] sm:$0xff] }
  0xeb   :  { %891 = vmatmul.mubr.f32.gmra.mxu1 %v3619_v13  ;;  %957 = vmatprep.subr.mxu0 %v459_v14 }
  0xec   :  { %3018 = vmatprep.subr.mxu1 %v459_v14  ;;  %958 = vmatpush2.msra.mxu0 %v458_v16  ;;  %v298_v14 = vld [vmem:[#allocation2 + $0x298] sm:$0xff] }
  0xed   :  { %3050 = vmatpush2.msra.mxu1 %v458_v16  ;;  %959 = vmatprep.subr.mxu0 %v456_v19  ;;  %v3691_v16 = vld [vmem:[%s4506_s0 + $0xc8] sm:$0xff] }
  0xee   :  { %3019 = vmatprep.subr.mxu1 %v456_v19  ;;  %960 = vmatpush2.msra.mxu0 %v455_v20  ;;  %v212_v19 = vld [vmem:[%s4506_s0 + $0x368] sm:$0xff] }
  0xef   :  { %3051 = vmatpush2.msra.mxu1 %v455_v20  ;;  %961 = vmatprep.mubr.f32.mxu0 %v3628_v22  ;;  %v503_v20 = vld [vmem:[#allocation2 + $0x900] sm:$0xff] }
  0xf0   :  { %1033 = vmatprep.mubr.f32.mxu1 %v192_v24  ;;  %962 = vmatmul.mubr.f32.vlgmr.msra.gmra.mxu0 %v3636_v25  ;;  %v250_v24 = vld [vmem:[#allocation2 + $0x118] sm:$0xff] }
  0xf1   :  { %1034 = vmatmul.mubr.f32.vlgmr.msra.gmra.mxu1 %v191_v27  ;;  %2446 = vmatprep.subr.mxu0 %v310_v29  ;;  %v3699_v27 = vld [vmem:[%s4506_s0 + $0x108] sm:$0xff]  ;;  %v295_v29 = vld [vmem:[#allocation2 + $0x280] sm:$0xff] }
  0xf2   :  { %967 = vmatprep.mubr.f32.mxu0 %v3644_v30  ;;  %2447 = vmatpush3.msra.mxu0 %v262_v33  ;;  %v406_v33 = vld [vmem:[#allocation2 + $0x5f8] sm:$0xff] }
  0xf3   :  { %1039 = vmatprep.mubr.f32.mxu1 %v199_v35  ;;  %1086 = vmatprep.subr.mxu1 %v507_v36  ;;  %v3705_v35 = vld [vmem:[%s4506_s0 + $0x100] sm:$0xff]  ;;  %v3710_v36 = vld [vmem:[%s4506_s0 + $0x30] sm:$0xff] }
  0xf4   :  { %2448 = vmatprep.subr.mxu0 %v307_v37  ;;  %968 = vmatmul.mubr.f32.gmra.mxu0 %v3655_v40  ;;  %v4514_v37 = vmov 0.0  }
  0xf5   :  { %1040 = vmatmul.mubr.f32.gmra.mxu1 %v198_v41  ;;  %2449 = vmatpush3.msra.mxu0 %v259_v45  ;;  %v247_v41 = vld [vmem:[#allocation2 + $0x100] sm:$0xff]  ;;  %v292_v45 = vld [vmem:[#allocation2 + $0x268] sm:$0xff] }
  0xf6   :  { %1087 = vmatpush1.msra.mxu1 %v506_v44  ;;  %2450 = vmatprep.subr.mxu0 %v304_v46  ;;  %v3717_v44 = vld [vmem:[%s4506_s0 + $0x140] sm:$0xff]  ;;  %v244_v46 = vld [vmem:[#allocation2 + $0xe8] sm:$0xff] }
  0xf7   :  { %973 = vmatprep.mubr.f32.mxu0 %v3663_v48  ;;  %1045 = vmatprep.mubr.f32.mxu1 %v206_v52  ;;  %v358_v52 = vld [vmem:[#allocation2 + $0x478] sm:$0xff] }
  0xf8   :  { %2451 = vmatpush3.msra.mxu0 %v256_v56  ;;  %1088 = vmatprep.subr.mxu1 %v504_v9  ;;  %v3726_v56 = vld [vmem:[%s4506_s0 + $0x138] sm:$0xff]  ;;  %v403_v9 = vld [vmem:[#allocation2 + $0x5e0] sm:$0xff] }
  0xf9   :  { %974 = vmatmul.mubr.f32.gmra.mxu0 %v3672_v57  ;;  %1046 = vmatmul.mubr.f32.gmra.mxu1 %v205_v59  ;;  %v3731_v59 = vld [vmem:[%s4506_s0 + $0x68] sm:$0xff] }
  0xfa   :  { %2452 = vmatprep.subr.mxu0 %v301_v62  ;;  %979 = vmatprep.mubr.f32.mxu0 %v3681_v3  ;;  %4531 = vst [vmem:[#allocation19_spill] sm:$0xff] %v3731_v59  ;;  %v289_v62 = vld [vmem:[#allocation2 + $0x250] sm:$0xff] }
  0xfb   :  { %2453 = vmatpush3.msra.mxu0 %v253_v4  ;;  %1051 = vmatprep.mubr.f32.mxu1 %v213_v5  ;;  %v3737_v4 = vld [vmem:[%s4506_s0 + $0x178] sm:$0xff]  ;;  %v241_v5 = vld [vmem:[#allocation2 + $0xd0] sm:$0xff] }
  0xfc   :  { %2454 = vmatprep.subr.mxu0 %v298_v14  ;;  %1089 = vmatpush1.msra.mxu1 %v503_v20  ;;  %v286_v14 = vld [vmem:[#allocation2 + $0x238] sm:$0xff]  ;;  %v3751_v20 = vld [vmem:[%s4506_s0 + $0xa0] sm:$0xff] }
  0xfd   :  { %980 = vmatmul.mubr.f32.gmra.mxu0 %v3691_v16  ;;  %1052 = vmatmul.mubr.f32.gmra.mxu1 %v212_v19  ;;  %v3746_v19 = vld [vmem:[%s4506_s0 + $0x170] sm:$0xff]  ;;  %4532 = vst [vmem:[#allocation20_spill] sm:$0xff] %v3751_v20 }
  0xfe   :  { %2455 = vmatpush3.msra.mxu0 %v250_v24  ;;  %985 = vmatprep.mubr.f32.mxu0 %v3699_v27  ;;  %v355_v24 = vld [vmem:[#allocation2 + $0x460] sm:$0xff] }
  0xff   :  { %1122 = vmatprep.mubr.f32.mxu1 %v4514_v37  ;;  %2456 = vmatprep.subr.mxu0 %v295_v29  ;;  %v238_v29 = vld [vmem:[#allocation2 + $0xb8] sm:$0xff] }
 0x100   :  { %2526 = vmatprep.subr.mxu1 %v406_v33  ;;  %2457 = vmatpush3.msra.mxu0 %v247_v41  ;;  %v3757_v33 = vld [vmem:[%s4506_s0 + $0x1b0] sm:$0xff]  ;;  %v283_v41 = vld [vmem:[#allocation2 + $0x220] sm:$0xff] }
 0x101   :  { %986 = vmatmul.mubr.f32.gmra.mxu0 %v3705_v35  ;;  %2412 = vmatmul.mubr.msk.f32.vlgmr.msra.gmra.mxu1 %vm526_vm0, %v3710_v36 }
 0x102   :  { %991 = vmatprep.mubr.f32.mxu0 %v3717_v44  ;;  %2458 = vmatprep.subr.mxu0 %v292_v45  ;;  %v400_v45 = vld [vmem:[#allocation2 + $0x5c8] sm:$0xff] }
 0x103   :  { %1128 = vmatprep.mubr.f32.mxu1 %v4514_v37  ;;  %2459 = vmatpush3.msra.mxu0 %v244_v46  ;;  %v3765_v46 = vld [vmem:[%s4506_s0 + $0x1a8] sm:$0xff] }
 0x104   :  { %2527 = vmatpush3.msra.mxu1 %v358_v52  ;;  %2460 = vmatprep.subr.mxu0 %v289_v62  ;;  %v3770_v52 = vld [vmem:[%s4506_s0 + $0xd8] sm:$0xff]  ;;  %v235_v62 = vld [vmem:[#allocation2 + $0xa0] sm:$0xff] }
 0x105   :  { %992 = vmatmul.mubr.f32.gmra.mxu0 %v3726_v56  ;;  %2413 = vmatmul.mubr.msk.f32.gmra.mxu1 %vm526_vm0, %v3731_v59  ;;  %4533 = vst [vmem:[#allocation21_spill] sm:$0xff] %v3770_v52  ;;  %v3805_v59 = vld [vmem:[%s4506_s0 + $0x218] sm:$0xff] }
 0x106   :  { %997 = vmatprep.mubr.f32.mxu0 %v3737_v4  ;;  %2461 = vmatpush3.msra.mxu0 %v241_v5  ;;  %v352_v5 = vld [vmem:[#allocation2 + $0x448] sm:$0xff]  ;;  %4538 = vst [vmem:[#allocation25_spill] sm:$0xff] %v3805_v59 }
 0x107   :  { %1134 = vmatprep.mubr.f32.mxu1 %v4514_v37  ;;  %2528 = vmatprep.subr.mxu1 %v403_v9  ;;  %v280_v9 = vld [vmem:[#allocation2 + $0x208] sm:$0xff] }
 0x108   :  { %2462 = vmatprep.subr.mxu0 %v286_v14  ;;  %2529 = vmatpush3.msra.mxu1 %v355_v24  ;;  %v3777_v14 = vld [vmem:[%s4506_s0 + $0x1e8] sm:$0xff] }
 0x109   :  { %998 = vmatmul.mubr.f32.gmra.mxu0 %v3746_v19  ;;  %2414 = vmatmul.mubr.msk.f32.gmra.mxu1 %vm526_vm0, %v3751_v20  ;;  %v232_v24 = vld [vmem:[#allocation2 + $0x88] sm:$0xff]  ;;  %v4536_v20 = vmov 0.0  }
 0x10a   :  { %2463 = vmatpush3.msra.mxu0 %v238_v29  ;;  %1003 = vmatprep.mubr.f32.mxu0 %v3757_v33  ;;  %v397_v29 = vld [vmem:[#allocation2 + $0x5b0] sm:$0xff] }
 0x10b   :  { %1140 = vmatprep.mubr.f32.mxu1 %v4514_v37  ;;  %2464 = vmatprep.subr.mxu0 %v283_v41  ;;  %v3785_v41 = vld [vmem:[%s4506_s0 + $0x1e0] sm:$0xff]  ;;  %v277_v37 = vld [vmem:[#allocation2 + $0x1f0] sm:$0xff] }
 0x10c   :  { %2530 = vmatprep.subr.mxu1 %v400_v45  ;;  %2465 = vmatpush3.msra.mxu0 %v235_v62  ;;  %4534 = vst [vmem:[#allocation22_spill] sm:$0xff] %v3785_v41  ;;  %v3791_v45 = vld [vmem:[%s4506_s0 + $0x110] sm:$0xff] }
 0x10d   :  { %1004 = vmatmul.mubr.f32.gmra.mxu0 %v3765_v46  ;;  %2415 = vmatmul.mubr.msk.f32.gmra.mxu1 %vm526_vm0, %v3770_v52  ;;  %4535 = vst [vmem:[#allocation23_spill] sm:$0xff] %v3791_v45  ;;  %v349_v62 = vld [vmem:[#allocation2 + $0x430] sm:$0xff]  ;;  %v394_v52 = vld [vmem:[#allocation2 + $0x598] sm:$0xff] }
 0x10e   :  { %2531 = vmatpush3.msra.mxu1 %v352_v5  ;;  %2466 = vmatprep.subr.mxu0 %v280_v9  ;;  %v229_v5 = vld [vmem:[#allocation2 + $0x70] sm:$0xff]  ;;  %v3798_v9 = vld [vmem:[%s4506_s0 + $0x220] sm:$0xff] }
 0x10f   :  { %1009 = vmatprep.mubr.f32.mxu0 %v3777_v14  ;;  %1146 = vmatprep.mubr.f32.mxu1 %v4536_v20  ;;  %4537 = vst [vmem:[#allocation24_spill] sm:$0xff] %v3798_v9 }
 0x110   :  { %2467 = vmatpush3.msra.mxu0 %v232_v24  ;;  %2532 = vmatprep.subr.mxu1 %v397_v29  ;;  %v3810_v24 = vld [vmem:[%s4506_s0 + $0x148] sm:$0xff]  ;;  %v274_v29 = vld [vmem:[#allocation2 + $0x1d8] sm:$0xff] }
 0x111   :  { %1010 = vmatmul.mubr.f32.gmra.mxu0 %v3785_v41  ;;  %2416 = vmatmul.mubr.msk.f32.gmra.mxu1 %vm526_vm0, %v3791_v45  ;;  %4539 = vst [vmem:[#allocation26_spill] sm:$0xff] %v3810_v24  ;;  %v346_v45 = vld [vmem:[#allocation2 + $0x418] sm:$0xff]  ;;  %v391_v41 = vld [vmem:[#allocation2 + $0x580] sm:$0xff] }
 0x112   :  { %2468 = vmatprep.subr.mxu0 %v277_v37  ;;  %2533 = vmatpush3.msra.mxu1 %v349_v62  ;;  %v226_v37 = vld [vmem:[#allocation2 + $0x58] sm:$0xff] }
 0x113   :  { %2469 = vmatpush3.msra.mxu0 %v229_v5  ;;  %1015 = vmatprep.mubr.f32.mxu0 %v3798_v9  ;;  %v3818_v62 = vld [vmem:[%s4506_s0 + $0x258] sm:$0xff]  ;;  %v271_v5 = vld [vmem:[#allocation2 + $0x1c0] sm:$0xff]  ;;  %v3825_v9 = vld [vmem:[%s4506_s0 + $0x250] sm:$0xff] }
 0x114   :  { %1152 = vmatprep.mubr.f32.mxu1 %v4536_v20  ;;  %2534 = vmatprep.subr.mxu1 %v394_v52  ;;  %4540 = vst [vmem:[#allocation27_spill] sm:$0xff] %v3818_v62  ;;  %4541 = vst [vmem:[#allocation28_spill] sm:$0xff] %v3825_v9  ;;  %v3830_v52 = vld [vmem:[%s4506_s0 + $0x180] sm:$0xff] }
 0x115   :  { %1016 = vmatmul.mubr.f32.gmra.mxu0 %v3805_v59  ;;  %2417 = vmatmul.mubr.msk.f32.gmra.mxu1 %vm526_vm0, %v3810_v24  ;;  %4542 = vst [vmem:[#allocation29_spill] sm:$0xff] %v3830_v52  ;;  %v223_v24 = vld [vmem:[#allocation2 + $0x40] sm:$0xff]  ;;  %v220_v59 = vld [vmem:[#allocation2 + $0x28] sm:$0xff] }
 0x116   :  { %2470 = vmatprep.subr.mxu0 %v274_v29  ;;  %2535 = vmatpush3.msra.mxu1 %v346_v45  ;;  %v343_v29 = vld [vmem:[#allocation2 + $0x400] sm:$0xff]  ;;  %v268_v45 = vld [vmem:[#allocation2 + $0x1a8] sm:$0xff] }
 0x117   :  { %2471 = vmatpush3.msra.mxu0 %v226_v37  ;;  %1021 = vmatprep.mubr.f32.mxu0 %v3818_v62  ;;  %v3837_v37 = vld [vmem:[%s4506_s0 + $0x290] sm:$0xff]  ;;  %v388_v62 = vld [vmem:[#allocation2 + $0x568] sm:$0xff] }
 0x118   :  { %1158 = vmatprep.mubr.f32.mxu1 %v4536_v20  ;;  %2472 = vmatprep.subr.mxu0 %v271_v5  ;;  %4543 = vst [vmem:[#allocation30_spill] sm:$0xff] %v3837_v37  ;;  %v3845_v5 = vld [vmem:[%s4506_s0 + $0x288] sm:$0xff] }
 0x119   :  { %2536 = vmatprep.subr.mxu1 %v391_v41  ;;  %1022 = vmatmul.mubr.f32.gmra.mxu0 %v3825_v9  ;;  %4544 = vst [vmem:[#allocation31_spill] sm:$0xff] %v3845_v5  ;;  %v3851_v41 = vld [vmem:[%s4506_s0 + $0x1b8] sm:$0xff]  ;;  %v265_v9 = vld [vmem:[#allocation2 + $0x190] sm:$0xff] }
 0x11a   :  { %2418 = vmatmul.mubr.msk.f32.gmra.mxu1 %vm526_vm0, %v3830_v52  ;;  %2473 = vmatpush3.msra.mxu0 %v223_v24  ;;  %4545 = vst [vmem:[#allocation32_spill] sm:$0xff] %v3851_v41  ;;  %v340_v24 = vld [vmem:[#allocation2 + $0x3e8] sm:$0xff]  ;;  %v3860_v52 = vld [vmem:[%s4506_s0 + $0x1f0] sm:$0xff] }
 0x11b   :  { %2537 = vmatpush3.msra.mxu1 %v343_v29  ;;  %2474 = vmatprep.subr.mxu0 %v268_v45  ;;  %v217_v29 = vld [vmem:[#allocation2 + $0x10] sm:$0xff] }
 0x11c   :  { %1027 = vmatprep.mubr.f32.mxu0 %v3837_v37  ;;  %1164 = vmatprep.mubr.f32.mxu1 %v4536_v20  ;;  %v385_v45 = vld [vmem:[#allocation2 + $0x550] sm:$0xff]  ;;  %v502_v37 = vld [vmem:[#allocation2 + $0x8f8] sm:$0xff] }
 0x11d   :  { %2475 = vmatpush3.msra.mxu0 %v220_v59  ;;  %2538 = vmatprep.subr.mxu1 %v388_v62  ;;  %v3064_v59 = vld [vmem:[%s4506_s0 + $0x8] sm:$0xff]  ;;  %v337_v62 = vld [vmem:[#allocation2 + $0x3d0] sm:$0xff] }
 0x11e   :  { %1028 = vmatmul.mubr.f32.gmra.mxu0 %v3845_v5  ;;  %2419 = vmatmul.mubr.msk.f32.gmra.mxu1 %vm526_vm0, %v3851_v41  ;;  %v454_v5 = vld [vmem:[#allocation2 + $0x778] sm:$0xff]  ;;  %v451_v41 = vld [vmem:[#allocation2 + $0x760] sm:$0xff] }
 0x11f   :  { %2476 = vmatprep.subr.mxu0 %v265_v9  ;;  %2539 = vmatpush3.msra.mxu1 %v340_v24  ;;  %v3065_v9 = vld [vmem:[%s4506_s0] sm:$0xff]  ;;  %v382_v24 = vld [vmem:[#allocation2 + $0x538] sm:$0xff] }
 0x120   :  { %2477 = vmatpush3.msra.mxu0 %v217_v29  ;;  %1170 = vmatprep.mubr.f32.mxu1 %v4536_v20  ;;  %v3874_v29 = vld [vmem:[%s4506_s0 + $0x228] sm:$0xff] }
 0x121   :  { %1283 = vmatprep.mubr.f32.mxu0 %v3064_v59  ;;  %2540 = vmatprep.subr.mxu1 %v385_v45  ;;  %v499_v59 = vld [vmem:[#allocation2 + $0x8e0] sm:$0xff] }
 0x122   :  { %1284 = vmatmul.mubr.f32.vlgmr.msra.gmra.mxu0 %v3065_v9  ;;  %2420 = vmatmul.mubr.msk.f32.gmra.mxu1 %vm526_vm0, %v3860_v52  ;;  %v3066_v45 = vld [vmem:[%s4506_s0 + $0x40] sm:$0xff]  ;;  %v334_v9 = vld [vmem:[#allocation2 + $0x3b8] sm:$0xff] }
 0x123   :  { %2606 = vmatprep.subr.mxu0 %v502_v37  ;;  %2541 = vmatpush3.msra.mxu1 %v337_v62  ;;  %v379_v37 = vld [vmem:[#allocation2 + $0x520] sm:$0xff]  ;;  %v496_v62 = vld [vmem:[#allocation2 + $0x8c8] sm:$0xff] }
 0x124   :  { %2607 = vmatpush3.msra.mxu0 %v454_v5  ;;  %1176 = vmatprep.mubr.f32.mxu1 %v4536_v20  ;;  %v3886_v5 = vld [vmem:[%s4506_s0 + $0x260] sm:$0xff] }
 0x125   :  { %1288 = vmatprep.mubr.f32.mxu0 %v3066_v45  ;;  %2542 = vmatprep.subr.mxu1 %v382_v24  ;;  %v331_v24 = vld [vmem:[#allocation2 + $0x3a0] sm:$0xff]  ;;  %v448_v45 = vld [vmem:[#allocation2 + $0x748] sm:$0xff] }
 0x126   :  { %1289 = vmatmul.mubr.f32.gmra.mxu0 %v3349_v10  ;;  %2421 = vmatmul.mubr.msk.f32.gmra.mxu1 %vm526_vm0, %v3874_v29  ;;  %v376_v10 = vld [vmem:[#allocation2 + $0x508] sm:$0xff] }
 0x127   :  { %2608 = vmatprep.subr.mxu0 %v499_v59  ;;  %2543 = vmatpush3.msra.mxu1 %v334_v9  ;;  %v493_v59 = vld [vmem:[#allocation2 + $0x8b0] sm:$0xff] }
 0x128   :  { %2609 = vmatpush3.msra.mxu0 %v451_v41  ;;  %1182 = vmatprep.mubr.f32.mxu1 %v4536_v20  ;;  %v3896_v41 = vld [vmem:[%s4506_s0 + $0x298] sm:$0xff]  ;;  %v445_v9 = vld [vmem:[#allocation2 + $0x730] sm:$0xff] }
 0x129   :  { %1293 = vmatprep.mubr.f32.mxu0 %v3358_v15  ;;  %2544 = vmatprep.subr.mxu1 %v379_v37  ;;  %v328_v15 = vld [vmem:[#allocation2 + $0x388] sm:$0xff]  ;;  %v3906_v37 = vld [vmem:[%s4506_s0 + $0x2d0] sm:$0xff] }
 0x12a   :  { %1294 = vmatmul.mubr.f32.gmra.mxu0 %v3366_v18  ;;  %2422 = vmatmul.mubr.msk.f32.gmra.mxu1 %vm526_vm0, %v3886_v5  ;;  %v373_v18 = vld [vmem:[#allocation2 + $0x4f0] sm:$0xff] }
 0x12b   :  { %2610 = vmatprep.subr.mxu0 %v496_v62  ;;  %2545 = vmatpush3.msra.mxu1 %v331_v24  ;;  %v490_v62 = vld [vmem:[#allocation2 + $0x898] sm:$0xff] }
 0x12c   :  { %2611 = vmatpush3.msra.mxu0 %v448_v45  ;;  %1188 = vmatprep.mubr.f32.mxu1 %v4536_v20  ;;  %v442_v24 = vld [vmem:[#allocation2 + $0x718] sm:$0xff]  ;;  %v3916_v45 = vld [vmem:[%s4506_s0 + $0x308] sm:$0xff] }
 0x12d   :  { %1298 = vmatprep.mubr.f32.mxu0 %v3376_v23  ;;  %2546 = vmatprep.subr.mxu1 %v376_v10  ;;  %v325_v23 = vld [vmem:[#allocation2 + $0x370] sm:$0xff]  ;;  %v487_v10 = vld [vmem:[#allocation2 + $0x880] sm:$0xff] }
 0x12e   :  { %1299 = vmatmul.mubr.f32.gmra.mxu0 %v3384_v26  ;;  %2423 = vmatmul.mubr.msk.f32.gmra.mxu1 %vm526_vm0, %v3896_v41  ;;  %v370_v26 = vld [vmem:[#allocation2 + $0x4d8] sm:$0xff] }
 0x12f   :  { %2612 = vmatprep.subr.mxu0 %v493_v59  ;;  %2547 = vmatpush3.msra.mxu1 %v328_v15  ;;  %v439_v59 = vld [vmem:[#allocation2 + $0x700] sm:$0xff] }
 0x130   :  { %2613 = vmatpush3.msra.mxu0 %v445_v9  ;;  %1194 = vmatprep.mubr.f32.mxu1 %v4536_v20  ;;  %v3926_v15 = vld [vmem:[%s4506_s0 + $0x340] sm:$0xff]  ;;  %v484_v9 = vld [vmem:[#allocation2 + $0x868] sm:$0xff] }
 0x131   :  { %1303 = vmatprep.mubr.f32.mxu0 %v3394_v31  ;;  %2548 = vmatprep.subr.mxu1 %v373_v18  ;;  %v322_v31 = vld [vmem:[#allocation2 + $0x358] sm:$0xff]  ;;  %v436_v18 = vld [vmem:[#allocation2 + $0x6e8] sm:$0xff] }
 0x132   :  { %1304 = vmatmul.mubr.f32.gmra.mxu0 %v3402_v34  ;;  %2424 = vmatmul.mubr.msk.f32.gmra.mxu1 %vm526_vm0, %v3906_v37  ;;  %v367_v34 = vld [vmem:[#allocation2 + $0x4c0] sm:$0xff] }
 0x133   :  { %2614 = vmatprep.subr.mxu0 %v490_v62  ;;  %2549 = vmatpush3.msra.mxu1 %v325_v23  ;;  %v3936_v62 = vld [vmem:[%s4506_s0 + $0x378] sm:$0xff]  ;;  %v481_v23 = vld [vmem:[#allocation2 + $0x850] sm:$0xff] }
 0x134   :  { %2615 = vmatpush3.msra.mxu0 %v442_v24  ;;  %1200 = vmatprep.mubr.f32.mxu1 %v4536_v20  ;;  %v433_v24 = vld [vmem:[#allocation2 + $0x6d0] sm:$0xff] }
 0x135   :  { %1308 = vmatprep.mubr.f32.mxu0 %v3412_v39  ;;  %2550 = vmatprep.subr.mxu1 %v370_v26  ;;  %v319_v39 = vld [vmem:[#allocation2 + $0x340] sm:$0xff]  ;;  %v313_v26 = vld [vmem:[#allocation2 + $0x310] sm:$0xff] }
 0x136   :  { %1309 = vmatmul.mubr.f32.gmra.mxu0 %v3420_v42  ;;  %2425 = vmatmul.mubr.msk.f32.gmra.mxu1 %vm526_vm0, %v3916_v45  ;;  %v364_v42 = vld [vmem:[#allocation2 + $0x4a8] sm:$0xff] }
 0x137   :  { %2616 = vmatprep.subr.mxu0 %v487_v10  ;;  %2551 = vmatpush3.msra.mxu1 %v322_v31  ;;  %v478_v10 = vld [vmem:[#allocation2 + $0x838] sm:$0xff]  ;;  %v3068_v31 = vld [vmem:[%s4506_s0 + $0x10] sm:$0xff] }
 0x138   :  { %2617 = vmatpush3.msra.mxu0 %v439_v59  ;;  %1206 = vmatprep.mubr.f32.mxu1 %v4536_v20  ;;  %v508_v59 = vld [vmem:[#allocation2 + $0x928] sm:$0xff] }
 0x139   :  { %1313 = vmatprep.mubr.f32.mxu0 %v3430_v47  ;;  %2552 = vmatprep.subr.mxu1 %v367_v34  ;;  %v316_v47 = vld [vmem:[#allocation2 + $0x328] sm:$0xff]  ;;  %v475_v34 = vld [vmem:[#allocation2 + $0x820] sm:$0xff] }
 0x13a   :  { %1314 = vmatmul.mubr.f32.gmra.mxu0 %v3438_v50  ;;  %2426 = vmatmul.mubr.msk.f32.gmra.mxu1 %vm526_vm0, %v3926_v15  ;;  %v361_v50 = vld [vmem:[#allocation2 + $0x490] sm:$0xff] }
 0x13b   :  { %2618 = vmatprep.subr.mxu0 %v484_v9  ;;  %2553 = vmatpush3.msra.mxu1 %v319_v39  ;;  %v427_v9 = vld [vmem:[#allocation2 + $0x6a0] sm:$0xff]  ;;  %v3070_v39 = vld [vmem:[%s4506_s0 + $0x48] sm:$0xff] }
 0x13c   :  { %2619 = vmatpush3.msra.mxu0 %v436_v18  ;;  %1212 = vmatprep.mubr.f32.mxu1 %v4536_v20  ;;  %v430_v20 = vld [vmem:[#allocation2 + $0x6b8] sm:$0xff]  ;;  %v472_v18 = vld [vmem:[#allocation2 + $0x808] sm:$0xff] }
 0x13d   :  { %1318 = vmatprep.mubr.f32.mxu0 %v3448_v55  ;;  %2554 = vmatprep.subr.mxu1 %v364_v42  ;;  %v3067_v55 = vld [vmem:[%s4506_s0 + $0x18] sm:$0xff]  ;;  %v3071_v42 = vld [vmem:[%s4506_s0 + $0x88] sm:$0xff] }
 0x13e   :  { %1319 = vmatmul.mubr.f32.gmra.mxu0 %v3456_v58  ;;  %2427 = vmatmul.mubr.msk.f32.gmra.mxu1 %vm526_vm0, %v3936_v62  ;;  %v511_v58 = vlaneseq }
 0x13f   :  { %2620 = vmatprep.subr.mxu0 %v481_v23  ;;  %2555 = vmatpush3.msra.mxu1 %v316_v47  ;;  %v424_v23 = vld [vmem:[#allocation2 + $0x688] sm:$0xff]  ;;  %v469_v47 = vld [vmem:[#allocation2 + $0x7f0] sm:$0xff] }
 0x140   :  { %2621 = vmatpush3.msra.mxu0 %v433_v24  ;;  %2556 = vmatprep.subr.mxu1 %v361_v50  ;;  %v3072_v24 = vld [vmem:[%s4506_s0 + $0x80] sm:$0xff]  ;;  %v421_v50 = vld [vmem:[#allocation2 + $0x670] sm:$0xff] }
 0x141   :  { %1323 = vmatprep.mubr.f32.mxu0 %v3466_v63  ;;  %2557 = vmatpush3.msra.mxu1 %v313_v26  ;;  %v3069_v63 = vld [vmem:[%s4506_s0 + $0x50] sm:$0xff] }
 0x142   :  { %1428 = vmatprep.mubr.f32.mxu1 %v3067_v55  ;;  %1324 = vmatmul.mubr.f32.gmra.mxu0 %v3474_v2  ;;  %v3955_v2 = vshrl.u32 %v511_v58, 7  ;;  %v418_v58 = vld [vmem:[#allocation2 + $0x658] sm:$0xff] }
 0x143   :  { %1429 = vmatmul.mubr.f32.vlgmr.msra.gmra.mxu1 %v3068_v31  ;;  %2622 = vmatprep.subr.mxu0 %v478_v10  ;;  %v3073_v10 = vld [vmem:[%s4506_s0 + $0xc0] sm:$0xff]  ;;  %v3075_v31 = vld [vmem:[%s4506_s0 + $0xf8] sm:$0xff] }
 0x144   :  { %1328 = vmatprep.mubr.f32.mxu0 %v3484_v7  ;;  %2623 = vmatpush3.msra.mxu0 %v430_v20  ;;  %4546 = vst [vmem:[#allocation33_spill] sm:$0xff] %v3955_v2  ;;  %v505_v7 = vld [vmem:[#allocation2 + $0x910] sm:$0xff]  ;;  %v517_v26 = vsub.s32 1, %v3955_v2 }
 0x145   :  { %1433 = vmatprep.mubr.f32.mxu1 %v3069_v63  ;;  %2848 = vmatprep.subr.mxu1 %v508_v59  ;;  %v1878_v20 = vld [vmem:[#allocation7 + $0xf8] sm:$0xff] }
 0x146   :  { %2624 = vmatprep.subr.mxu0 %v475_v34  ;;  %1329 = vmatmul.mubr.f32.gmra.mxu0 %v3492_v11  ;;  %v513_v11 = vsub.s32 0, %v3955_v2  ;;  %v1882_v2 = vld [vmem:[#allocation7 + $0x118] sm:$0xff] }
 0x147   :  { %1434 = vmatmul.mubr.f32.gmra.mxu1 %v3070_v39  ;;  %2625 = vmatpush3.msra.mxu0 %v427_v9  ;;  %v415_v39 = vld [vmem:[#allocation2 + $0x640] sm:$0xff] }
 0x148   :  { %2849 = vmatpush3.msra.mxu1 %v508_v59  ;;  %1333 = vmatprep.mubr.f32.mxu0 %v3502_v17  ;;  %v509_v17 = vld [vmem:[#allocation5] sm:$0x7] }
 0x149   :  { %1438 = vmatprep.mubr.f32.mxu1 %v3071_v42  ;;  %2626 = vmatprep.subr.mxu0 %v472_v18  ;;  %v3975_v55 = vrot.slane %v509_v17, %v513_v11  ;;  %v3985_v59 = vrot.slane %v509_v17, %v517_v26  ;;  %v3077_v42 = vld [vmem:[%s4506_s0 + $0x130] sm:$0xff]  ;;  %v3079_v26 = vld [vmem:[%s4506_s0 + $0x168] sm:$0xff] }
 0x14a   :  { %2850 = vmatprep.subr.mxu1 %v505_v7  ;;  %1334 = vmatmul.mubr.f32.gmra.mxu0 %v3510_v21  ;;  %v466_v21 = vld [vmem:[#allocation2 + $0x7d8] sm:$0xff] }
 0x14b   :  { %1439 = vmatmul.mubr.f32.gmra.mxu1 %v3072_v24  ;;  %2627 = vmatpush3.msra.mxu0 %v424_v23  ;;  %v412_v24 = vld [vmem:[#allocation2 + $0x628] sm:$0xff] }
 0x14c   :  { %1338 = vmatprep.mubr.f32.mxu0 %v3520_v28  ;;  %1443 = vmatprep.mubr.f32.mxu1 %v3073_v10  ;;  %v3074_v28 = vld [vmem:[%s4506_s0 + $0xb8] sm:$0xff] }
 0x14d   :  { %2628 = vmatprep.subr.mxu0 %v469_v47  ;;  %2851 = vmatpush3.msra.mxu1 %v505_v7 }
 0x14e   :  { %2629 = vmatpush3.msra.mxu0 %v421_v50  ;;  %2704 = vmatprep.subr.mxu1 %v1878_v20  ;;  %v457_v20 = vld [vmem:[#allocation2 + $0x790] sm:$0xff] }
 0x14f   :  { %1339 = vmatmul.mubr.f32.gmra.mxu0 %v3528_v32  ;;  %1444 = vmatmul.mubr.f32.gmra.mxu1 %v3074_v28  ;;  %v463_v32 = vld [vmem:[#allocation2 + $0x7c0] sm:$0xff] }
 0x150   :  { %1343 = vmatprep.mubr.f32.mxu0 %v3538_v38  ;;  %1448 = vmatprep.mubr.f32.mxu1 %v3075_v31  ;;  %v641_v34 = vpop.f32.mrf.mxu0  ;;  %v3076_v38 = vld [vmem:[%s4506_s0 + $0xf0] sm:$0xff] }
 0x151   :  { %2630 = vmatprep.subr.mxu0 %v466_v21  ;;  %v802_v63 = vpop.f32.mrf.mxu1  ;;  %v642_v9 = vadd.f32 %v641_v34, %v3975_v55  ;;  %v409_v31 = vld [vmem:[#allocation2 + $0x610] sm:$0xff]  ;;  %v3081_v34 = vld [vmem:[%s4506_s0 + $0x1a0] sm:$0xff] }
 0x152   :  { %2631 = vmatpush3.msra.mxu0 %v418_v58  ;;  %v643_v18 = vpop.f32.mrf.mxu0 }
 0x153   :  { %1344 = vmatmul.mubr.f32.gmra.mxu0 %v3546_v43  ;;  %1449 = vmatmul.mubr.f32.gmra.mxu1 %v3076_v38  ;;  %v804_v7 = vpop.f32.mrf.mxu1  ;;  %v3996_v23 = vadd.f32 %v802_v63, %v642_v9  ;;  %v644_v47 = vadd.f32 %v643_v18, %v3985_v59  ;;  %v460_v43 = vld [vmem:[#allocation2 + $0x7a8] sm:$0xff]  ;;  %v3082_v38 = vld [vmem:[%s4506_s0 + $0x198] sm:$0xff] }
 0x154   :  { %1348 = vmatprep.mubr.f32.mxu0 %v3556_v49  ;;  %1453 = vmatprep.mubr.f32.mxu1 %v3077_v42  ;;  %v3078_v49 = vld [vmem:[%s4506_s0 + $0x128] sm:$0xff]  ;;  %v3083_v18 = vld [vmem:[%s4506_s0 + $0x1d8] sm:$0xff] }
 0x155   :  { %2632 = vmatprep.subr.mxu0 %v463_v32  ;;  %v3999_v11 = vadd.f32 %v804_v7, %v644_v47 }
 0x156   :  { %2633 = vmatpush3.msra.mxu0 %v415_v39  ;;  %v647_v50 = vpop.f32.mrf.mxu0 }
 0x157   :  { %1349 = vmatmul.mubr.f32.gmra.mxu0 %v3566_v53  ;;  %1454 = vmatmul.mubr.f32.gmra.mxu1 %v3078_v49  ;;  %v808_v17 = vpop.f32.mrf.mxu1  ;;  %v648_v10 = vadd.f32 %v647_v50, %v3975_v55 }
 0x158   :  { %1353 = vmatprep.mubr.f32.mxu0 %v3580_v60  ;;  %1458 = vmatprep.mubr.f32.mxu1 %v3079_v26  ;;  %v649_v21 = vpop.f32.mrf.mxu0  ;;  %v3080_v60 = vld [vmem:[%s4506_s0 + $0x160] sm:$0xff] }
 0x159   :  { %2634 = vmatprep.subr.mxu0 %v460_v43  ;;  %v810_v53 = vpop.f32.mrf.mxu1  ;;  %v4010_v28 = vadd.f32 %v808_v17, %v648_v10  ;;  %v650_v58 = vadd.f32 %v649_v21, %v3985_v59  ;;  %v3087_v21 = vld [vmem:[%s4506_s0 + $0x248] sm:$0xff] }
 0x15a   :  { %2635 = vmatpush3.msra.mxu0 %v412_v24  ;;  %v3085_v24 = vld [vmem:[%s4506_s0 + $0x210] sm:$0xff] }
 0x15b   :  { %1354 = vmatmul.mubr.f32.gmra.mxu0 %v3590_v0  ;;  %1459 = vmatmul.mubr.f32.gmra.mxu1 %v3080_v60  ;;  %v4021_v63 = vadd.f32 %v810_v53, %v650_v58  ;;  %v3088_v60 = vld [vmem:[%s4506_s0 + $0x240] sm:$0xff] }
 0x15c   :  { %1358 = vmatprep.mubr.f32.mxu0 %v3604_v6  ;;  %1463 = vmatprep.mubr.f32.mxu1 %v3081_v34  ;;  %v653_v32 = vpop.f32.mrf.mxu0 }
 0x15d   :  { %2636 = vmatprep.subr.mxu0 %v457_v20  ;;  %v814_v9 = vpop.f32.mrf.mxu1  ;;  %v654_v0 = vadd.f32 %v653_v32, %v3975_v55  ;;  %v3090_v32 = vld [vmem:[%s4506_s0 + $0x278] sm:$0xff] }
 0x15e   :  { %2637 = vmatpush3.msra.mxu0 %v409_v31  ;;  %v655_v6 = vpop.f32.mrf.mxu0 }
 0x15f   :  { %1359 = vmatmul.mubr.f32.gmra.mxu0 %v3614_v12  ;;  %1464 = vmatmul.mubr.f32.gmra.mxu1 %v3082_v38  ;;  %v816_v39 = vpop.f32.mrf.mxu1  ;;  %v4032_v7 = vadd.f32 %v814_v9, %v654_v0  ;;  %v656_v42 = vadd.f32 %v655_v6, %v3985_v59  ;;  %v3084_v12 = vld [vmem:[%s4506_s0 + $0x1d0] sm:$0xff]  ;;  %v3091_v0 = vld [vmem:[%s4506_s0 + $0x2b8] sm:$0xff] }
 0x160   :  { %1468 = vmatprep.mubr.f32.mxu1 %v3083_v18  ;;  %1573 = vmatprep.mubr.f32.mxu0 %v3628_v22 }
 0x161   :  { %v4035_v47 = vadd.f32 %v816_v39, %v656_v42 }
 0x162   :  { %v659_v43 = vpop.f32.mrf.mxu0 }
 0x163   :  { %1469 = vmatmul.mubr.f32.gmra.mxu1 %v3084_v12  ;;  %1574 = vmatmul.mubr.f32.vlgmr.msra.gmra.mxu0 %v3636_v25  ;;  %v820_v49 = vpop.f32.mrf.mxu1  ;;  %v660_v22 = vadd.f32 %v659_v43, %v3975_v55  ;;  %v3086_v25 = vld [vmem:[%s4506_s0 + $0x208] sm:$0xff] }
 0x164   :  { %1473 = vmatprep.mubr.f32.mxu1 %v3085_v24  ;;  %1578 = vmatprep.mubr.f32.mxu0 %v3644_v30  ;;  %v661_v50 = vpop.f32.mrf.mxu0  ;;  %v4548_v24 = vld [vmem:[#allocation19_spill] sm:$0xff] }
 0x165   :  { %v822_v17 = vpop.f32.mrf.mxu1  ;;  %v4046_v26 = vadd.f32 %v820_v49, %v660_v22  ;;  %v662_v10 = vadd.f32 %v661_v50, %v3985_v59  ;;  %v4549_v50 = vld [vmem:[#allocation24_spill] sm:$0xff] }
 0x167   :  { %1474 = vmatmul.mubr.f32.gmra.mxu1 %v3086_v25  ;;  %1579 = vmatmul.mubr.f32.gmra.mxu0 %v3655_v40  ;;  %v4057_v30 = vadd.f32 %v822_v17, %v662_v10  ;;  %v1861_v17 = vld [vmem:[#allocation7 + $0x70] sm:$0xff] }
 0x168   :  { %1478 = vmatprep.mubr.f32.mxu1 %v3087_v21  ;;  %1583 = vmatprep.mubr.f32.mxu0 %v3663_v48  ;;  %v665_v53 = vpop.f32.mrf.mxu0  ;;  %v3089_v48 = vld [vmem:[%s4506_s0 + $0x280] sm:$0xff]  ;;  %v4551_v10 = vld [vmem:[#allocation25_spill] sm:$0xff] }
 0x169   :  { %v826_v20 = vpop.f32.mrf.mxu1  ;;  %v666_v58 = vadd.f32 %v665_v53, %v3975_v55  ;;  %v4552_v25 = vld [vmem:[#allocation21_spill] sm:$0xff] }
 0x16a   :  { %v4064_v40 = vpop.f32.mrf.mxu0 }
 0x16b   :  { %1479 = vmatmul.mubr.f32.gmra.mxu1 %v3088_v60  ;;  %1584 = vmatmul.mubr.f32.gmra.mxu0 %v3672_v57  ;;  %v4066_v31 = vpop.f32.mrf.mxu1  ;;  %v4072_v34 = vadd.f32 %v826_v20, %v666_v58  ;;  %v1876_v20 = vld [vmem:[#allocation7 + $0xe8] sm:$0xff] }
 0x16c   :  { %1483 = vmatprep.mubr.f32.mxu1 %v3089_v48  ;;  %1588 = vmatprep.mubr.f32.mxu0 %v3681_v3  ;;  %v4553_v58 = vld [vmem:[#allocation27_spill] sm:$0xff] }
 0x16d   :  { %v4554_v60 = vld [vmem:[#allocation23_spill] sm:$0xff] }
 0x16e   :  { %v671_v57 = vpop.f32.mrf.mxu0 }
 0x16f   :  { %1484 = vmatmul.mubr.f32.gmra.mxu1 %v3090_v32  ;;  %1589 = vmatmul.mubr.f32.gmra.mxu0 %v3691_v16  ;;  %v832_v9 = vpop.f32.mrf.mxu1  ;;  %v672_v3 = vadd.f32 %v671_v57, %v3975_v55  ;;  %v3092_v16 = vld [vmem:[%s4506_s0 + $0x2b0] sm:$0xff] }
 0x170   :  { %1488 = vmatprep.mubr.f32.mxu1 %v3091_v0  ;;  %1593 = vmatprep.mubr.f32.mxu0 %v3699_v27  ;;  %v4083_v38 = vpop.f32.mrf.mxu0  ;;  %v1860_v0 = vld [vmem:[#allocation7 + $0x68] sm:$0xff] }
 0x171   :  { %v4085_v6 = vpop.f32.mrf.mxu1  ;;  %v4087_v39 = vadd.f32 %v832_v9, %v672_v3  ;;  %v4555_v3 = vld [vmem:[#allocation28_spill] sm:$0xff] }
 0x173   :  { %1489 = vmatmul.mubr.f32.gmra.mxu1 %v3092_v16  ;;  %1594 = vmatmul.mubr.f32.gmra.mxu0 %v3705_v35  ;;  %v4556_v16 = vld [vmem:[#allocation26_spill] sm:$0xff] }
 0x174   :  { %1493 = vmatprep.mubr.f32.mxu1 %v3561_v51  ;;  %1598 = vmatprep.mubr.f32.mxu0 %v3717_v44  ;;  %v677_v27 = vpop.f32.mrf.mxu0 }
 0x175   :  { %v838_v18 = vpop.f32.mrf.mxu1  ;;  %v678_v42 = vadd.f32 %v677_v27, %v3975_v55  ;;  %v1875_v27 = vld [vmem:[#allocation7 + $0xe0] sm:$0xff] }
 0x176   :  { %v4098_v12 = vpop.f32.mrf.mxu0 }
 0x177   :  { %1494 = vmatmul.mubr.f32.gmra.mxu1 %v3571_v54  ;;  %1599 = vmatmul.mubr.f32.gmra.mxu0 %v3726_v56  ;;  %v4100_v43 = vpop.f32.mrf.mxu1  ;;  %v4104_v35 = vadd.f32 %v838_v18, %v678_v42  ;;  %v4557_v18 = vld [vmem:[#allocation30_spill] sm:$0xff]  ;;  %v4558_v42 = vld [vmem:[#allocation29_spill] sm:$0xff] }
 0x178   :  { %1498 = vmatprep.mubr.f32.mxu1 %v3585_v61  ;;  %1603 = vmatprep.mubr.f32.mxu0 %v3737_v4 }
 0x17a   :  { %v683_v51 = vpop.f32.mrf.mxu0 }
 0x17b   :  { %1499 = vmatmul.mubr.f32.gmra.mxu1 %v3595_v1  ;;  %1604 = vmatmul.mubr.f32.gmra.mxu0 %v3746_v19  ;;  %v844_v44 = vpop.f32.mrf.mxu1  ;;  %v684_v54 = vadd.f32 %v683_v51, %v3975_v55  ;;  %v1862_v19 = vld [vmem:[#allocation7 + $0x78] sm:$0xff] }
 0x17c   :  { %1503 = vmatprep.mubr.f32.mxu1 %v3609_v8  ;;  %1608 = vmatprep.mubr.f32.mxu0 %v3757_v33  ;;  %v4111_v56 = vpop.f32.mrf.mxu0  ;;  %v4547_v33 = vld [vmem:[#allocation22_spill] sm:$0xff] }
 0x17d   :  { %v4113_v49 = vpop.f32.mrf.mxu1  ;;  %v4115_v61 = vadd.f32 %v844_v44, %v684_v54 }
 0x17f   :  { %1504 = vmatmul.mubr.f32.gmra.mxu1 %v3619_v13  ;;  %1609 = vmatmul.mubr.f32.gmra.mxu0 %v3765_v46  ;;  %v1877_v46 = vld [vmem:[#allocation7 + $0xf0] sm:$0xff] }
 0x180   :  { %1613 = vmatprep.mubr.f32.mxu0 %v3777_v14  ;;  %2852 = vmatprep.mubr.msk.f32.mxu1 %vm526_vm0, %v3710_v36  ;;  %v689_v1 = vpop.f32.mrf.mxu0  ;;  %v4550_v14 = vld [vmem:[#allocation20_spill] sm:$0xff] }
 0x181   :  { %v850_v8 = vpop.f32.mrf.mxu1  ;;  %v690_v4 = vadd.f32 %v689_v1, %v3975_v55  ;;  %v1859_v1 = vld [vmem:[#allocation7 + $0x60] sm:$0xff] }
 0x182   :  { %v4126_v22 = vpop.f32.mrf.mxu0 }
 0x183   :  { %1614 = vmatmul.mubr.f32.gmra.mxu0 %v4547_v33  ;;  %2853 = vmatmul.mubr.msk.f32.vlgmr.msra.gmra.mxu1 %vm526_vm0, %v4548_v24  ;;  %v4128_v13 = vpop.f32.mrf.mxu1  ;;  %v4133_v36 = vadd.f32 %v850_v8, %v690_v4  ;;  %v4559_v8 = vld [vmem:[#allocation31_spill] sm:$0xff]  ;;  %v4560_v4 = vld [vmem:[#allocation32_spill] sm:$0xff]  ;;  %v1874_v24 = vld [vmem:[#allocation7 + $0xd8] sm:$0xff] }
 0x184   :  { %1618 = vmatprep.mubr.f32.mxu0 %v4549_v50  ;;  %2855 = vmatprep.mubr.msk.f32.mxu1 %vm526_vm0, %v4550_v14  ;;  %v1894_v14 = vld [vmem:[#allocation7 + $0x178] sm:$0xff] }
 0x185   :  { %2705 = vmatpush3.msra.mxu1 %v1862_v19  ;;  %2876 = vmatprep.subr.mxu0 %v1894_v14 }
 0x186   :  { %2706 = vmatprep.subr.mxu1 %v1877_v46  ;;  %v695_v21 = vpop.f32.mrf.mxu0  ;;  %v3093_v46 = vld [vmem:[%s4506_s0 + $0x2c8] sm:$0xff]  ;;  %2877 = vmatpush3.msra.mxu0 %v1894_v14 }
 0x187   :  { %1619 = vmatmul.mubr.f32.gmra.mxu0 %v4551_v10  ;;  %2856 = vmatmul.mubr.msk.f32.gmra.mxu1 %vm526_vm0, %v4552_v25  ;;  %v856_v53 = vpop.f32.mrf.mxu1  ;;  %v696_v48 = vadd.f32 %v695_v21, %v3975_v55  ;;  %v3094_v10 = vld [vmem:[%s4506_s0 + $0x2c0] sm:$0xff]  ;;  %v3100_v14 = vld [vmem:[%s4506_s0 + $0x368] sm:$0xff] }
 0x188   :  { %1623 = vmatprep.mubr.f32.mxu0 %v4553_v58  ;;  %2858 = vmatprep.mubr.msk.f32.mxu1 %vm526_vm0, %v4554_v60  ;;  %v4142_v32 = vpop.f32.mrf.mxu0  ;;  %v1893_v58 = vld [vmem:[#allocation7 + $0x170] sm:$0xff] }
 0x189   :  { %v4144_v57 = vpop.f32.mrf.mxu1  ;;  %2707 = vmatpush3.msra.mxu1 %v1861_v17  ;;  %v4146_v9 = vadd.f32 %v856_v53, %v696_v48  ;;  %v1858_v17 = vld [vmem:[#allocation7 + $0x58] sm:$0xff]  ;;  %v1873_v53 = vld [vmem:[#allocation7 + $0xd0] sm:$0xff]  ;;  %2878 = vmatprep.subr.mxu0 %v1893_v58 }
 0x18a   :  { %2708 = vmatprep.subr.mxu1 %v1876_v20  ;;  %2879 = vmatpush3.msra.mxu0 %v1893_v58  ;;  %v1853_v58 = vld [vmem:[#allocation7 + $0x30] sm:$0xff] }
 0x18b   :  { %1624 = vmatmul.mubr.f32.gmra.mxu0 %v4555_v3  ;;  %2859 = vmatmul.mubr.msk.f32.gmra.mxu1 %vm526_vm0, %v4556_v16  ;;  %v3096_v3 = vld [vmem:[%s4506_s0 + $0x2f8] sm:$0xff] }
 0x18c   :  { %1628 = vmatprep.mubr.f32.mxu0 %v4557_v18  ;;  %2861 = vmatprep.mubr.msk.f32.mxu1 %vm526_vm0, %v4558_v42  ;;  %v701_v51 = vpop.f32.mrf.mxu0  ;;  %v3097_v16 = vld [vmem:[%s4506_s0 + $0x338] sm:$0xff] }
 0x18d   :  { %v862_v44 = vpop.f32.mrf.mxu1  ;;  %2709 = vmatpush3.msra.mxu1 %v1860_v0  ;;  %v702_v54 = vadd.f32 %v701_v51, %v3975_v55  ;;  %v1857_v0 = vld [vmem:[#allocation7 + $0x50] sm:$0xff] }
 0x18e   :  { %2710 = vmatprep.subr.mxu1 %v1875_v27  ;;  %v4158_v19 = vpop.f32.mrf.mxu0  ;;  %v1892_v27 = vld [vmem:[#allocation7 + $0x168] sm:$0xff] }
 0x18f   :  { %1629 = vmatmul.mubr.f32.gmra.mxu0 %v4559_v8  ;;  %2862 = vmatmul.mubr.msk.f32.gmra.mxu1 %vm526_vm0, %v4560_v4  ;;  %v4160_v33 = vpop.f32.mrf.mxu1  ;;  %v4167_v50 = vadd.f32 %v862_v44, %v702_v54  ;;  %v1856_v44 = vld [vmem:[#allocation7 + $0x48] sm:$0xff]  ;;  %v3099_v8 = vld [vmem:[%s4506_s0 + $0x370] sm:$0xff] }
 0x190   :  { %1633 = vmatprep.mubr.f32.mxu0 %v3093_v46  ;;  %2864 = vmatprep.mubr.msk.f32.mxu1 %vm526_vm0, %v3860_v52  ;;  %v3095_v52 = vld [vmem:[%s4506_s0 + $0x300] sm:$0xff]  ;;  %v1855_v46 = vld [vmem:[#allocation7 + $0x40] sm:$0xff] }
 0x191   :  { %2711 = vmatpush3.msra.mxu1 %v1859_v1  ;;  %2880 = vmatprep.subr.mxu0 %v1892_v27  ;;  %v1871_v1 = vld [vmem:[#allocation7 + $0xc0] sm:$0xff] }
 0x192   :  { %2712 = vmatprep.subr.mxu1 %v1874_v24  ;;  %v707_v25 = vpop.f32.mrf.mxu0  ;;  %2881 = vmatpush3.msra.mxu0 %v1892_v27  ;;  %v1891_v24 = vld [vmem:[#allocation7 + $0x160] sm:$0xff] }
 0x193   :  { %1634 = vmatmul.mubr.f32.gmra.mxu0 %v3094_v10  ;;  %2865 = vmatmul.mubr.msk.f32.gmra.mxu1 %vm526_vm0, %v3874_v29  ;;  %v868_v21 = vpop.f32.mrf.mxu1  ;;  %v708_v20 = vadd.f32 %v707_v25, %v3975_v55 }
 0x194   :  { %1638 = vmatprep.mubr.f32.mxu0 %v3095_v52  ;;  %2867 = vmatprep.mubr.msk.f32.mxu1 %vm526_vm0, %v3886_v5  ;;  %v4180_v60 = vpop.f32.mrf.mxu0  ;;  %v1872_v5 = vld [vmem:[#allocation7 + $0xc8] sm:$0xff] }
 0x195   :  { %v4182_v48 = vpop.f32.mrf.mxu1  ;;  %2713 = vmatpush3.msra.mxu1 %v1858_v17  ;;  %v4184_v29 = vadd.f32 %v868_v21, %v708_v20  ;;  %2882 = vmatprep.subr.mxu0 %v1891_v24  ;;  %v1869_v21 = vld [vmem:[#allocation7 + $0xb0] sm:$0xff] }
 0x196   :  { %2714 = vmatprep.subr.mxu1 %v1873_v53  ;;  %2883 = vmatpush3.msra.mxu0 %v1891_v24  ;;  %v1890_v53 = vld [vmem:[#allocation7 + $0x158] sm:$0xff] }
 0x197   :  { %1639 = vmatmul.mubr.f32.gmra.mxu0 %v3096_v3  ;;  %2868 = vmatmul.mubr.msk.f32.gmra.mxu1 %vm526_vm0, %v3896_v41  ;;  %v3098_v41 = vld [vmem:[%s4506_s0 + $0x330] sm:$0xff]  ;;  %v1868_v3 = vld [vmem:[#allocation7 + $0xa8] sm:$0xff]  ;;  %s3263_s0 = smov [#allocation13]  }
 0x198   :  { %1643 = vmatprep.mubr.f32.mxu0 %v3097_v16  ;;  %2870 = vmatprep.mubr.msk.f32.mxu1 %vm526_vm0, %v3906_v37  ;;  %v713_v18 = vpop.f32.mrf.mxu0  ;;  %v1889_v16 = vld [vmem:[#allocation7 + $0x150] sm:$0xff]  ;;  %s2397_s6 = sshll.u32 %s3263_s0, 4  ;;  %s2398_s6 = int_to_ptr.vmem [resolvable:$true] %s2397_s6 }
 0x199   :  { %v874_v42 = vpop.f32.mrf.mxu1  ;;  %2715 = vmatpush3.msra.mxu1 %v1857_v0  ;;  %v714_v51 = vadd.f32 %v713_v18, %v3975_v55  ;;  %2884 = vmatprep.subr.mxu0 %v1890_v53  ;;  %s3222_s11 = scalar_lea.vmem %s2398_s6, 2048  ;;  %p3227_p3 = scmp.lt.s32.totalorder %s2398_s6, %s2398_s6 }
 0x19a   :  { %2716 = vmatprep.subr.mxu1 %v1872_v5  ;;  %v4202_v54 = vpop.f32.mrf.mxu0  ;;  %2885 = vmatpush3.msra.mxu0 %v1890_v53  ;;  %v1867_v5 = vld [vmem:[#allocation7 + $0xa0] sm:$0xff]  ;;  %p3223_p2 = scmp.ne.s32.totalorder %s2398_s6, %s3222_s11  ;;  %p3228_p4 = scmp.lt.s32.totalorder %s3222_s11, %s3222_s11 }
 0x19b   :  { %1644 = vmatmul.mubr.f32.gmra.mxu0 %v3098_v41  ;;  %2871 = vmatmul.mubr.msk.f32.gmra.mxu1 %vm526_vm0, %v3916_v45  ;;  %v4204_v37 = vpop.f32.mrf.mxu1  ;;  %v4211_v4 = vadd.f32 %v874_v42, %v714_v51  ;;  %v1870_v45 = vld [vmem:[#allocation7 + $0xb8] sm:$0xff]  ;;  %v1851_v42 = vld [vmem:[#allocation7 + $0x20] sm:$0xff] }
 0x19c   :  { %1648 = vmatprep.mubr.f32.mxu0 %v3099_v8  ;;  %2873 = vmatprep.mubr.msk.f32.mxu1 %vm526_vm0, %v3926_v15  ;;  %v1854_v15 = vld [vmem:[#allocation7 + $0x38] sm:$0xff]  ;;  %v1863_v53 = vld [vmem:[#allocation7 + $0x80] sm:$0xff]  ;;  %p3229_p5 = por %p3228_p4, %p3227_p3 }
 0x19d   :  { %2717 = vmatpush3.msra.mxu1 %v1856_v44  ;;  %2886 = vmatprep.subr.mxu0 %v1889_v16  ;;  %v1866_v44 = vld [vmem:[#allocation7 + $0x98] sm:$0xff] }
 0x19e   :  { %2718 = vmatprep.subr.mxu1 %v1871_v1  ;;  %v719_v17 = vpop.f32.mrf.mxu0  ;;  %2887 = vmatpush3.msra.mxu0 %v1889_v16  ;;  %v1850_v8 = vld [vmem:[#allocation7 + $0x18] sm:$0xff]  ;;  %p3230_p6 = pnand %p3229_p5, %p3223_p2 }
 0x19f   :  { %1649 = vmatmul.mubr.f32.gmra.mxu0 %v3100_v14  ;;  %2874 = vmatmul.mubr.msk.f32.gmra.mxu1 %vm526_vm0, %v3936_v62  ;;  %v880_v10 = vpop.f32.mrf.mxu1  ;;  %v720_v25 = vadd.f32 %v719_v17, %v3975_v55  ;;  %v1852_v62 = vld [vmem:[#allocation7 + $0x28] sm:$0xff]  ;;  %v1849_v14 = vld [vmem:[#allocation7 + $0x10] sm:$0xff] }
 0x1a0   :  { %2719 = vmatpush3.msra.mxu1 %v1855_v46  ;;  %v4219_v52 = vpop.f32.mrf.mxu0  ;;  %v1865_v46 = vld [vmem:[#allocation7 + $0x90] sm:$0xff]  ;;  %v1864_v17 = vld [vmem:[#allocation7 + $0x88] sm:$0xff] }
 0x1a1   :  { %v4221_v20 = vpop.f32.mrf.mxu1  ;;  %2720 = vmatprep.subr.mxu1 %v1870_v45  ;;  %v881_v0 = vadd.f32 %v880_v10, %v720_v25  ;;  %v1888_v45 = vld [vmem:[#allocation7 + $0x148] sm:$0xff] }
 0x1a2   :  { %2721 = vmatpush3.msra.mxu1 %v1854_v15  ;;  %2888 = vmatprep.subr.mxu0 %v1888_v45  ;;  %v1848_v25 = vld [vmem:[#allocation7 + $0x8] sm:$0xff] }
 0x1a3   :  { %2722 = vmatprep.subr.mxu1 %v1869_v21  ;;  %2889 = vmatpush3.msra.mxu0 %v1888_v45 }
 0x1a4   :  { %2723 = vmatpush3.msra.mxu1 %v1853_v58  ;;  %v725_v27 = vpop.f32.mrf.mxu0  ;;  %v1887_v58 = vld [vmem:[#allocation7 + $0x140] sm:$0xff] }
 0x1a5   :  { %v886_v18 = vpop.f32.mrf.mxu1  ;;  %2724 = vmatprep.subr.mxu1 %v1868_v3  ;;  %v726_v51 = vadd.f32 %v725_v27, %v3975_v55  ;;  %2890 = vmatprep.subr.mxu0 %v1887_v58  ;;  %v1886_v27 = vld [vmem:[#allocation7 + $0x138] sm:$0xff] }
 0x1a6   :  { %2725 = vmatpush3.msra.mxu1 %v1852_v62  ;;  %v4224_v41 = vpop.f32.mrf.mxu0  ;;  %2891 = vmatpush3.msra.mxu0 %v1887_v58 }
 0x1a7   :  { %4561 = vst [vmem:[#allocation22_spill] sm:$0xff] %v4224_v41  ;;  %v4226_v1 = vpop.f32.mrf.mxu1  ;;  %2726 = vmatprep.subr.mxu1 %v1867_v5  ;;  %v887_v24 = vadd.f32 %v886_v18, %v726_v51  ;;  %v1847_v5 = vld [vmem:[#allocation7] sm:$0xff]  ;;  %2892 = vmatprep.subr.mxu0 %v1886_v27 }
 0x1a8   :  { %4562 = vst [vmem:[#allocation19_spill] sm:$0xff] %v4226_v1  ;;  %2727 = vmatpush3.msra.mxu1 %v1851_v42  ;;  %2893 = vmatpush3.msra.mxu0 %v1886_v27 }
 0x1a9   :  { %2728 = vmatprep.subr.mxu1 %v1866_v44 }
 0x1aa   :  { %2729 = vmatpush3.msra.mxu1 %v1850_v8  ;;  %v731_v10 = vpop.f32.mrf.mxu0  ;;  %v1885_v8 = vld [vmem:[#allocation7 + $0x130] sm:$0xff] }
 0x1ab   :  { %v892_v15 = vpop.f32.mrf.mxu1  ;;  %2730 = vmatprep.subr.mxu1 %v1865_v46  ;;  %v732_v21 = vadd.f32 %v731_v10, %v3975_v55  ;;  %2894 = vmatprep.subr.mxu0 %v1885_v8 }
 0x1ac   :  { %2731 = vmatpush3.msra.mxu1 %v1849_v14  ;;  %v4229_v3 = vpop.f32.mrf.mxu0  ;;  %2895 = vmatpush3.msra.mxu0 %v1885_v8 }
 0x1ad   :  { %4563 = vst [vmem:[#allocation24_spill] sm:$0xff] %v4229_v3  ;;  %v4231_v62 = vpop.f32.mrf.mxu1  ;;  %2732 = vmatprep.subr.mxu1 %v1864_v17  ;;  %v893_v16 = vadd.f32 %v892_v15, %v732_v21  ;;  %v1884_v15 = vld [vmem:[#allocation7 + $0x128] sm:$0xff] }
 0x1ae   :  { %4564 = vst [vmem:[#allocation20_spill] sm:$0xff] %v4231_v62  ;;  %2733 = vmatpush3.msra.mxu1 %v1848_v25  ;;  %2896 = vmatprep.subr.mxu0 %v1884_v15 }
 0x1af   :  { %2734 = vmatprep.subr.mxu1 %v1863_v53  ;;  %2897 = vmatpush3.msra.mxu0 %v1884_v15 }
 0x1b0   :  { %2735 = vmatpush3.msra.mxu1 %v1847_v5  ;;  %v963_v18 = vpop.f32.mrf.mxu0  ;;  %v1883_v5 = vld [vmem:[#allocation7 + $0x120] sm:$0xff] }
 0x1b1   :  { %v1035_v42 = vpop.f32.mrf.mxu1  ;;  %2898 = vmatprep.subr.mxu0 %v1883_v5  ;;  %v964_v62 = vadd.f32 %v963_v18, %v3996_v23  ;;  %v1880_v23 = vld [vmem:[#allocation7 + $0x108] sm:$0xff] }
 0x1b2   :  { %v4234_v55 = vadd.f32 %v1035_v42, %v4211_v4  ;;  %v965_v51 = vpop.f32.mrf.mxu0  ;;  %2899 = vmatpush3.msra.mxu0 %v1883_v5 }
 0x1b3   :  { %v4236_v44 = vpop.f32.mrf.mxu1  ;;  %2900 = vmatprep.subr.mxu0 %v1882_v2  ;;  %v966_v15 = vadd.f32 %v965_v51, %v3999_v11 }
 0x1b4   :  { %v969_v46 = vpop.f32.mrf.mxu0  ;;  %2901 = vmatpush3.msra.mxu0 %v1882_v2 }
 0x1b5   :  { %v1041_v45 = vpop.f32.mrf.mxu1 }
 0x1b6   :  { %v4238_v14 = vadd.f32 %v1041_v45, %v881_v0  ;;  %v971_v17 = vpop.f32.mrf.mxu0 }
 0x1b7   :  { %v4240_v10 = vpop.f32.mrf.mxu1 }
 0x1b8   :  { %4565 = vst [vmem:[#allocation25_spill] sm:$0xff] %v4238_v14  ;;  %4566 = vst [vmem:[#allocation21_spill] sm:$0xff] %v4240_v10  ;;  %v1881_v14 = vld [vmem:[#allocation7 + $0x110] sm:$0xff] }
 0x1b9   :  { %v975_v25 = vpop.f32.mrf.mxu0  ;;  %v1047_v21 = vpop.f32.mrf.mxu1  ;;  %2902 = vmatprep.subr.mxu0 %v1881_v14 }
 0x1ba   :  { %v4242_v4 = vadd.f32 %v1047_v21, %v887_v24  ;;  %2903 = vmatpush3.msra.mxu0 %v1881_v14  ;;  %v976_v51 = vadd.f32 %v975_v25, %v4032_v7 }
 0x1bb   :  { %v977_v53 = vpop.f32.mrf.mxu0  ;;  %v4244_v58 = vpop.f32.mrf.mxu1  ;;  %2904 = vmatprep.subr.mxu0 %v1880_v23 }
 0x1bc   :  { %4567 = vst [vmem:[#allocation27_spill] sm:$0xff] %v4242_v4  ;;  %4568 = vst [vmem:[#allocation23_spill] sm:$0xff] %v4244_v58  ;;  %2905 = vmatpush3.msra.mxu0 %v1880_v23 }
 0x1bd   :  { %v981_v27 = vpop.f32.mrf.mxu0  ;;  %v1053_v42 = vpop.f32.mrf.mxu1 }
 0x1be   :  { %v4246_v0 = vadd.f32 %v1053_v42, %v893_v16  ;;  %v970_v16 = vadd.f32 %v969_v46, %v4010_v28 }
 0x1bf   :  { %v983_v8 = vpop.f32.mrf.mxu0  ;;  %v4248_v45 = vpop.f32.mrf.mxu1 }
 0x1c0   :  { %4569 = vst [vmem:[#allocation28_spill] sm:$0xff] %v4246_v0  ;;  %4570 = vst [vmem:[#allocation26_spill] sm:$0xff] %v4248_v45  ;;  %v972_v0 = vadd.f32 %v971_v17, %v4021_v63  ;;  %v978_v63 = vadd.f32 %v977_v53, %v4035_v47 }
 0x1c1   :  { %v987_v3 = vpop.f32.mrf.mxu0  ;;  %v1124_v24 = vpop.f32.mrf.mxu1 }
 0x1c2   :  { %v1125_v21 = vadd.f32 %v1124_v24, %v964_v62  ;;  %v1879_v62 = vld [vmem:[#allocation7 + $0x100] sm:$0xff] }
 0x1c3   :  { %v989_v4 = vpop.f32.mrf.mxu0  ;;  %v1126_v58 = vpop.f32.mrf.mxu1  ;;  %2906 = vmatprep.subr.mxu0 %v1879_v62 }
 0x1c4   :  { %v1127_v1 = vadd.f32 %v1126_v58, %v966_v15  ;;  %v1799_v18 = vmax.f32 %v1125_v21, 0.0  ;;  %2907 = vmatpush3.msra.mxu0 %v1879_v62  ;;  %v984_v21 = vadd.f32 %v983_v8, %v4057_v30 }
 0x1c5   :  { %v993_v5 = vpop.f32.mrf.mxu0  ;;  %v1130_v42 = vpop.f32.mrf.mxu1 }
 0x1c6   :  { %v1800_v45 = vmax.f32 %v1127_v1, 0.0  ;;  %v1131_v10 = vadd.f32 %v1130_v42, %v970_v16 }
 0x1c7   :  { %v995_v41 = vpop.f32.mrf.mxu0  ;;  %v1132_v11 = vpop.f32.mrf.mxu1 }
 0x1c8   :  { %v1133_v2 = vadd.f32 %v1132_v11, %v972_v0  ;;  %1966 = vmatprep.mubr.f32.mxu1 %v1800_v45  ;;  %v1802_v14 = vmax.f32 %v1131_v10, 0.0  ;;  %v668_v0 = vadd.f32 %v4064_v40, %v3985_v59  ;;  %v982_v45 = vadd.f32 %v981_v27, %v4046_v26 }
 0x1c9   :  { %v999_v28 = vpop.f32.mrf.mxu0  ;;  %v1136_v46 = vpop.f32.mrf.mxu1  ;;  %1967 = vmatmul.mubr.f32.vlgmr.msra.gmra.mxu1 %v1799_v18  ;;  %v674_v11 = vadd.f32 %v4083_v38, %v3985_v59  ;;  %v988_v26 = vadd.f32 %v987_v3, %v4072_v34  ;;  %v994_v38 = vadd.f32 %v993_v5, %v4087_v39 }
 0x1ca   :  { %v1803_v1 = vmax.f32 %v1133_v2, 0.0  ;;  %v1137_v17 = vadd.f32 %v1136_v46, %v976_v51  ;;  %v829_v18 = vadd.f32 %v4066_v31, %v668_v0  ;;  %v680_v31 = vadd.f32 %v4098_v12, %v3985_v59 }
 0x1cb   :  { %v1001_v58 = vpop.f32.mrf.mxu0  ;;  %v1138_v24 = vpop.f32.mrf.mxu1  ;;  %v1000_v12 = vadd.f32 %v999_v28, %v4104_v35 }
 0x1cc   :  { %v1139_v15 = vadd.f32 %v1138_v24, %v978_v63  ;;  %1971 = vmatprep.mubr.f32.mxu1 %v1803_v1  ;;  %v1805_v47 = vmax.f32 %v1137_v17, 0.0  ;;  %v990_v62 = vadd.f32 %v989_v4, %v829_v18  ;;  %v835_v63 = vadd.f32 %v4085_v6, %v674_v11 }
 0x1cd   :  { %v1005_v7 = vpop.f32.mrf.mxu0  ;;  %v1142_v25 = vpop.f32.mrf.mxu1  ;;  %1972 = vmatmul.mubr.f32.gmra.mxu1 %v1802_v14  ;;  %v686_v6 = vadd.f32 %v4111_v56, %v3985_v59  ;;  %v692_v18 = vadd.f32 %v4126_v22, %v3985_v59 }
 0x1ce   :  { %v1806_v16 = vmax.f32 %v1139_v15, 0.0  ;;  %v1143_v53 = vadd.f32 %v1142_v25, %v982_v45  ;;  %v996_v34 = vadd.f32 %v995_v41, %v835_v63  ;;  %v841_v45 = vadd.f32 %v4100_v43, %v680_v31 }
 0x1cf   :  { %v1007_v42 = vpop.f32.mrf.mxu0  ;;  %v1144_v10 = vpop.f32.mrf.mxu1  ;;  %v847_v43 = vadd.f32 %v4113_v49, %v686_v6  ;;  %v1006_v35 = vadd.f32 %v1005_v7, %v4115_v61  ;;  %v698_v49 = vadd.f32 %v4142_v32, %v3985_v59 }
 0x1d0   :  { %v1145_v23 = vadd.f32 %v1144_v10, %v984_v21  ;;  %1976 = vmatprep.mubr.f32.mxu1 %v1806_v16  ;;  %v1808_v30 = vmax.f32 %v1143_v53, 0.0  ;;  %v1002_v39 = vadd.f32 %v1001_v58, %v841_v45 }
 0x1d1   :  { %v1011_v40 = vpop.f32.mrf.mxu0  ;;  %1977 = vmatmul.mubr.f32.gmra.mxu1 %v1805_v47  ;;  %v1148_v2 = vpop.f32.mrf.mxu1 }
 0x1d2   :  { %v1809_v27 = vmax.f32 %v1145_v23, 0.0  ;;  %v1149_v51 = vadd.f32 %v1148_v2, %v988_v26  ;;  %v1008_v26 = vadd.f32 %v1007_v42, %v847_v43  ;;  %v1012_v22 = vadd.f32 %v1011_v40, %v4133_v36 }
 0x1d3   :  { %v1013_v8 = vpop.f32.mrf.mxu0  ;;  %v1150_v46 = vpop.f32.mrf.mxu1 }
 0x1d4   :  { %1981 = vmatprep.mubr.f32.mxu1 %v1809_v27  ;;  %v1151_v1 = vadd.f32 %v1150_v46, %v990_v62  ;;  %v1811_v4 = vmax.f32 %v1149_v51, 0.0 }
 0x1d5   :  { %v1017_v14 = vpop.f32.mrf.mxu0  ;;  %1982 = vmatmul.mubr.f32.gmra.mxu1 %v1808_v30  ;;  %v1154_v17 = vpop.f32.mrf.mxu1  ;;  %v853_v30 = vadd.f32 %v4128_v13, %v692_v18  ;;  %v704_v13 = vadd.f32 %v4158_v19, %v3985_v59  ;;  %v710_v19 = vadd.f32 %v4180_v60, %v3985_v59  ;;  %v716_v60 = vadd.f32 %v4202_v54, %v3985_v59 }
 0x1d6   :  { %v1812_v3 = vmax.f32 %v1151_v1, 0.0  ;;  %v1155_v15 = vadd.f32 %v1154_v17, %v994_v38  ;;  %v722_v54 = vadd.f32 %v4219_v52, %v3985_v59 }
 0x1d7   :  { %v1019_v24 = vpop.f32.mrf.mxu0  ;;  %v1156_v0 = vpop.f32.mrf.mxu1  ;;  %v1014_v61 = vadd.f32 %v1013_v8, %v853_v30 }
 0x1d8   :  { %v1157_v25 = vadd.f32 %v1156_v0, %v996_v34  ;;  %1986 = vmatprep.mubr.f32.mxu1 %v1812_v3  ;;  %v1814_v41 = vmax.f32 %v1155_v15, 0.0  ;;  %v859_v34 = vadd.f32 %v4144_v57, %v698_v49  ;;  %v865_v57 = vadd.f32 %v4160_v33, %v704_v13 }
 0x1d9   :  { %v1023_v21 = vpop.f32.mrf.mxu0  ;;  %1987 = vmatmul.mubr.f32.gmra.mxu1 %v1811_v4  ;;  %v1018_v4 = vadd.f32 %v1017_v14, %v4146_v9  ;;  %v871_v33 = vadd.f32 %v4182_v48, %v710_v19  ;;  %v877_v48 = vadd.f32 %v4204_v37, %v716_v60  ;;  %v883_v37 = vadd.f32 %v4221_v20, %v722_v54 }
 0x1da   :  { %v1160_v16 = vpop.f32.mrf.mxu1  ;;  %v1815_v5 = vmax.f32 %v1157_v25, 0.0  ;;  %v1020_v40 = vadd.f32 %v1019_v24, %v859_v34  ;;  %v1024_v9 = vadd.f32 %v1023_v21, %v4167_v50 }
 0x1db   :  { %v1161_v47 = vadd.f32 %v1160_v16, %v1000_v12  ;;  %v1025_v53 = vpop.f32.mrf.mxu0 }
 0x1dc   :  { %v1162_v10 = vpop.f32.mrf.mxu1  ;;  %1991 = vmatprep.mubr.f32.mxu1 %v1815_v5  ;;  %v1026_v24 = vadd.f32 %v1025_v53, %v865_v57 }
 0x1dd   :  { %v1163_v23 = vadd.f32 %v1162_v10, %v1002_v39  ;;  %1992 = vmatmul.mubr.f32.gmra.mxu1 %v1814_v41  ;;  %v1817_v58 = vmax.f32 %v1161_v47, 0.0 }
 0x1de   :  { %v1029_v11 = vpop.f32.mrf.mxu0  ;;  %v1166_v28 = vpop.f32.mrf.mxu1 }
 0x1df   :  { %v1818_v56 = vmax.f32 %v1163_v23, 0.0  ;;  %v1167_v2 = vadd.f32 %v1166_v28, %v1006_v35  ;;  %v1030_v50 = vadd.f32 %v1029_v11, %v4184_v29  ;;  %v1038_v29 = vadd.f32 %v4236_v44, %v877_v48 }
 0x1e0   :  { %v1031_v27 = vpop.f32.mrf.mxu0  ;;  %v1168_v62 = vpop.f32.mrf.mxu1 }
 0x1e1   :  { %1996 = vmatprep.mubr.f32.mxu1 %v1818_v56  ;;  %v1169_v51 = vadd.f32 %v1168_v62, %v1008_v26  ;;  %v1820_v42 = vmax.f32 %v1167_v2, 0.0  ;;  %v1032_v53 = vadd.f32 %v1031_v27, %v871_v33  ;;  %v4579_v33 = vld [vmem:[#allocation26_spill] sm:$0xff] }
 0x1e2   :  { %v2478_v46 = vpop.f32.mrf.mxu0  ;;  %1997 = vmatmul.mubr.f32.gmra.mxu1 %v1817_v58  ;;  %v1172_v63 = vpop.f32.mrf.mxu1 }
 0x1e3   :  { %v1821_v7 = vmax.f32 %v1169_v51, 0.0  ;;  %v1173_v1 = vadd.f32 %v1172_v63, %v1012_v22 }
 0x1e4   :  { %v2479_v31 = vpop.f32.mrf.mxu0  ;;  %v1174_v38 = vpop.f32.mrf.mxu1 }
 0x1e5   :  { %v4280_v17 = vadd.f32 %v2479_v31, %v2478_v46  ;;  %v1175_v32 = vadd.f32 %v1174_v38, %v1014_v61  ;;  %2001 = vmatprep.mubr.f32.mxu1 %v1821_v7  ;;  %v1823_v0 = vmax.f32 %v1173_v1, 0.0  ;;  %v4571_v61 = vld [vmem:[#allocation22_spill] sm:$0xff]  ;;  %v4572_v1 = vld [vmem:[#allocation21_spill] sm:$0xff] }
 0x1e6   :  { %v2481_v3 = vpop.f32.mrf.mxu0  ;;  %v1178_v36 = vpop.f32.mrf.mxu1  ;;  %2002 = vmatmul.mubr.f32.gmra.mxu1 %v1820_v42  ;;  %v728_v52 = vadd.f32 %v4571_v61, %v3985_v59  ;;  %v1044_v44 = vadd.f32 %v4572_v1, %v883_v37 }
 0x1e7   :  { %v1824_v8 = vmax.f32 %v1175_v32, 0.0  ;;  %v1179_v45 = vadd.f32 %v1178_v36, %v1018_v4  ;;  %v4573_v32 = vld [vmem:[#allocation25_spill] sm:$0xff]  ;;  %v4574_v36 = vld [vmem:[#allocation19_spill] sm:$0xff] }
 0x1e8   :  { %v2482_v15 = vpop.f32.mrf.mxu0  ;;  %v1180_v25 = vpop.f32.mrf.mxu1  ;;  %v889_v20 = vadd.f32 %v4574_v36, %v728_v52 }
 0x1e9   :  { %v4286_v6 = vadd.f32 %v2482_v15, %v2481_v3  ;;  %v1181_v12 = vadd.f32 %v1180_v25, %v1020_v40  ;;  %2006 = vmatprep.mubr.f32.mxu1 %v1824_v8  ;;  %v1826_v41 = vmax.f32 %v1179_v45, 0.0  ;;  %v4575_v40 = vld [vmem:[#allocation24_spill] sm:$0xff]  ;;  %v4576_v25 = vld [vmem:[#allocation23_spill] sm:$0xff] }
 0x1ea   :  { %v2484_v16 = vpop.f32.mrf.mxu0  ;;  %v1184_v14 = vpop.f32.mrf.mxu1  ;;  %2007 = vmatmul.mubr.f32.gmra.mxu1 %v1823_v0  ;;  %v734_v8 = vadd.f32 %v4575_v40, %v3985_v59  ;;  %v1050_v57 = vadd.f32 %v4576_v25, %v889_v20 }
 0x1eb   :  { %v1827_v39 = vmax.f32 %v1181_v12, 0.0  ;;  %v1185_v47 = vadd.f32 %v1184_v14, %v1024_v9  ;;  %v4577_v9 = vld [vmem:[#allocation27_spill] sm:$0xff] }
 0x1ec   :  { %v2485_v5 = vpop.f32.mrf.mxu0  ;;  %v1186_v10 = vpop.f32.mrf.mxu1 }
 0x1ed   :  { %v4292_v23 = vadd.f32 %v2485_v5, %v2484_v16  ;;  %v1187_v43 = vadd.f32 %v1186_v10, %v1026_v24  ;;  %2011 = vmatprep.mubr.f32.mxu1 %v1827_v39  ;;  %v1829_v28 = vmax.f32 %v1185_v47, 0.0  ;;  %v4578_v5 = vld [vmem:[#allocation20_spill] sm:$0xff] }
 0x1ee   :  { %v2487_v18 = vpop.f32.mrf.mxu0  ;;  %v1190_v21 = vpop.f32.mrf.mxu1  ;;  %2012 = vmatmul.mubr.f32.gmra.mxu1 %v1826_v41  ;;  %v895_v41 = vadd.f32 %v4578_v5, %v734_v8 }
 0x1ef   :  { %v1830_v35 = vmax.f32 %v1187_v43, 0.0  ;;  %v1191_v26 = vadd.f32 %v1190_v21, %v1030_v50  ;;  %v4580_v21 = vld [vmem:[#allocation28_spill] sm:$0xff] }
 0x1f0   :  { %v2488_v56 = vpop.f32.mrf.mxu0  ;;  %v1192_v58 = vpop.f32.mrf.mxu1  ;;  %v1056_v60 = vadd.f32 %v4579_v33, %v895_v41 }
 0x1f1   :  { %v4298_v2 = vadd.f32 %v2488_v56, %v2487_v18  ;;  %v1193_v62 = vadd.f32 %v1192_v58, %v1032_v53  ;;  %2016 = vmatprep.mubr.f32.mxu1 %v1830_v35  ;;  %v1832_v51 = vmax.f32 %v1191_v26, 0.0 }
 0x1f2   :  { %v2490_v30 = vpop.f32.mrf.mxu0  ;;  %v1196_v49 = vpop.f32.mrf.mxu1  ;;  %2017 = vmatmul.mubr.f32.gmra.mxu1 %v1829_v28 }
 0x1f3   :  { %v1833_v11 = vmax.f32 %v1193_v62, 0.0  ;;  %v1197_v46 = vadd.f32 %v1196_v49, %v4234_v55 }
 0x1f4   :  { %v2491_v27 = vpop.f32.mrf.mxu0  ;;  %v1198_v22 = vpop.f32.mrf.mxu1 }
 0x1f5   :  { %v4305_v63 = vadd.f32 %v2491_v27, %v2490_v30  ;;  %v1199_v7 = vadd.f32 %v1198_v22, %v1038_v29  ;;  %2021 = vmatprep.mubr.f32.mxu1 %v1833_v11  ;;  %v1835_v13 = vmax.f32 %v1197_v46, 0.0 }
 0x1f6   :  { %v2493_v31 = vpop.f32.mrf.mxu0  ;;  %v1202_v42 = vpop.f32.mrf.mxu1  ;;  %2022 = vmatmul.mubr.f32.gmra.mxu1 %v1832_v51 }
 0x1f7   :  { %v1836_v38 = vmax.f32 %v1199_v7, 0.0  ;;  %v1203_v55 = vadd.f32 %v1202_v42, %v4573_v32 }
 0x1f8   :  { %v2494_v34 = vpop.f32.mrf.mxu0  ;;  %v1204_v3 = vpop.f32.mrf.mxu1 }
 0x1f9   :  { %v4312_v4 = vadd.f32 %v2494_v34, %v2493_v31  ;;  %v1205_v15 = vadd.f32 %v1204_v3, %v1044_v44  ;;  %2026 = vmatprep.mubr.f32.mxu1 %v1836_v38  ;;  %v1838_v16 = vmax.f32 %v1203_v55, 0.0 }
 0x1fa   :  { %v2496_v0 = vpop.f32.mrf.mxu0  ;;  %v1208_v45 = vpop.f32.mrf.mxu1  ;;  %2027 = vmatmul.mubr.f32.gmra.mxu1 %v1835_v13 }
 0x1fb   :  { %v1839_v19 = vmax.f32 %v1205_v15, 0.0  ;;  %v1209_v14 = vadd.f32 %v1208_v45, %v4577_v9 }
 0x1fc   :  { %v2497_v12 = vpop.f32.mrf.mxu0  ;;  %v1210_v24 = vpop.f32.mrf.mxu1 }
 0x1fd   :  { %v4319_v39 = vadd.f32 %v2497_v12, %v2496_v0  ;;  %v1211_v47 = vadd.f32 %v1210_v24, %v1050_v57  ;;  %2031 = vmatprep.mubr.f32.mxu1 %v1839_v19  ;;  %v1841_v50 = vmax.f32 %v1209_v14, 0.0 }
 0x1fe   :  { %v2499_v59 = vpop.f32.mrf.mxu0  ;;  %v1214_v10 = vpop.f32.mrf.mxu1  ;;  %2032 = vmatmul.mubr.f32.gmra.mxu1 %v1838_v16 }
 0x1ff   :  { %v1842_v43 = vmax.f32 %v1211_v47, 0.0  ;;  %v1215_v53 = vadd.f32 %v1214_v10, %v4580_v21 }
 0x200   :  { %v2500_v18 = vpop.f32.mrf.mxu0  ;;  %v1216_v35 = vpop.f32.mrf.mxu1 }
 0x201   :  { %v4324_v56 = vadd.f32 %v2500_v18, %v2499_v59  ;;  %v1217_v28 = vadd.f32 %v1216_v35, %v1056_v60  ;;  %2036 = vmatprep.mubr.f32.mxu1 %v1842_v43  ;;  %v1844_v54 = vmax.f32 %v1215_v53, 0.0 }
 0x202   :  { %v2502_v26 = vpop.f32.mrf.mxu0  ;;  %2037 = vmatmul.mubr.f32.gmra.mxu1 %v1841_v50 }
 0x203   :  { %v4326_v58 = vpop.f32.mrf.mxu1  ;;  %v1845_v48 = vmax.f32 %v1217_v28, 0.0 }
 0x204   :  { %v2503_v62 = vpop.f32.mrf.mxu0 }
 0x205   :  { %v4328_v30 = vpop.f32.mrf.mxu1  ;;  %v4330_v49 = vadd.f32 %v2503_v62, %v2502_v26  ;;  %2041 = vmatprep.mubr.f32.mxu1 %v1845_v48 }
 0x206   :  { %v2505_v29 = vpop.f32.mrf.mxu0  ;;  %2042 = vmatmul.mubr.f32.gmra.mxu1 %v1844_v54 }
 0x207   :  { %v2561_v11 = vpop.f32.mrf.mxu1 }
 0x208   :  { %v2506_v27 = vpop.f32.mrf.mxu0 }
 0x209   :  { %v2562_v51 = vpop.f32.mrf.mxu1  ;;  %v4332_v46 = vadd.f32 %v2506_v27, %v2505_v29  ;;  %v4589_v27 = vld [vmem:[#allocation33_spill] sm:$0xff] }
 0x20a   :  { %v2508_v22 = vpop.f32.mrf.mxu0 }
 0x20b   :  { %v4334_v37 = vpop.f32.mrf.mxu1 }
 0x20c   :  { %v2509_v61 = vpop.f32.mrf.mxu0 }
 0x20d   :  { %v4336_v52 = vpop.f32.mrf.mxu1  ;;  %v4338_v7 = vadd.f32 %v2509_v61, %v2508_v22  ;;  %v521_v22 = vsub.s32 2, %v4589_v27 }
 0x20f   :  { %v2511_v31 = vpop.f32.mrf.mxu0  ;;  %v2567_v42 = vpop.f32.mrf.mxu1 }
 0x211   :  { %v2512_v1 = vpop.f32.mrf.mxu0  ;;  %v2568_v44 = vpop.f32.mrf.mxu1 }
 0x212   :  { %v4340_v38 = vadd.f32 %v2512_v1, %v2511_v31 }
 0x213   :  { %v2514_v34 = vpop.f32.mrf.mxu0  ;;  %v4342_v13 = vpop.f32.mrf.mxu1 }
 0x215   :  { %v2515_v32 = vpop.f32.mrf.mxu0  ;;  %v4344_v55 = vpop.f32.mrf.mxu1 }
 0x216   :  { %v4346_v3 = vadd.f32 %v2515_v32, %v2514_v34  ;;  %v3101_v32 = vld [vmem:[#allocation5] sm:$0x7] }
 0x217   :  { %v4348_v36 = vpop.f32.mrf.mxu0  ;;  %v4350_v20 = vpop.f32.mrf.mxu1 }
 0x218   :  { %4581 = vst [vmem:[#allocation30_spill] sm:$0xff] %v4346_v3  ;;  %v2560_v3 = vadd.f32 %v4328_v30, %v4326_v58  ;;  %v2566_v58 = vadd.f32 %v4336_v52, %v4334_v37 }
 0x219   :  { %v4352_v40 = vpop.f32.mrf.mxu0  ;;  %v4354_v8 = vpop.f32.mrf.mxu1 }
 0x21b   :  { %v4356_v15 = vpop.f32.mrf.mxu0  ;;  %v4358_v0 = vpop.f32.mrf.mxu1 }
 0x21c   :  { %4582 = vst [vmem:[#allocation29_spill] sm:$0xff] %v4356_v15 }
 0x21d   :  { %v4360_v45 = vpop.f32.mrf.mxu0  ;;  %v4362_v25 = vpop.f32.mrf.mxu1 }
 0x21e   :  { %4583 = vst [vmem:[#allocation31_spill] sm:$0xff] %v4360_v45 }
 0x21f   :  { %v4364_v57 = vpop.f32.mrf.mxu0  ;;  %v4366_v19 = vpop.f32.mrf.mxu1 }
 0x220   :  { %4584 = vst [vmem:[#allocation32_spill] sm:$0xff] %v4364_v57  ;;  %v2563_v57 = vadd.f32 %v2562_v51, %v2561_v11 }
 0x221   :  { %v4368_v12 = vpop.f32.mrf.mxu0  ;;  %v4370_v16 = vpop.f32.mrf.mxu1 }
 0x222   :  { %4585 = vst [vmem:[#allocation22_spill] sm:$0xff] %v4368_v12  ;;  %v4401_v12 = vrot.slane %v3101_v32, %v521_v22  ;;  %v2569_v32 = vadd.f32 %v2568_v44, %v2567_v42 }
 0x223   :  { %v4372_v9 = vpop.f32.mrf.mxu1  ;;  %v2638_v14 = vpop.f32.mrf.mxu0 }
 0x224   :  { %v1291_v27 = vadd.f32 %v4286_v6, %v4401_v12  ;;  %v1301_v6 = vadd.f32 %v4298_v2, %v4401_v12  ;;  %v2572_v2 = vadd.f32 %v4344_v55, %v4342_v13 }
 0x225   :  { %v4374_v24 = vpop.f32.mrf.mxu1  ;;  %v2639_v5 = vpop.f32.mrf.mxu0 }
 0x226   :  { %v1436_v22 = vadd.f32 %v2563_v57, %v1291_v27  ;;  %v1446_v44 = vadd.f32 %v2569_v32, %v1301_v6 }
 0x227   :  { %v4376_v41 = vpop.f32.mrf.mxu1  ;;  %v2641_v47 = vpop.f32.mrf.mxu0 }
 0x229   :  { %v4378_v59 = vpop.f32.mrf.mxu1  ;;  %v2642_v10 = vpop.f32.mrf.mxu0 }
 0x22b   :  { %v4380_v33 = vpop.f32.mrf.mxu1  ;;  %v2644_v60 = vpop.f32.mrf.mxu0 }
 0x22d   :  { %v4382_v43 = vpop.f32.mrf.mxu1  ;;  %v2645_v18 = vpop.f32.mrf.mxu0 }
 0x22e   :  { %v2646_v57 = vadd.f32 %v2645_v18, %v2644_v60 }
 0x22f   :  { %v4384_v50 = vpop.f32.mrf.mxu1  ;;  %v2647_v21 = vpop.f32.mrf.mxu0 }
 0x231   :  { %v4386_v53 = vpop.f32.mrf.mxu1  ;;  %v2648_v35 = vpop.f32.mrf.mxu0 }
 0x232   :  { %v2649_v30 = vadd.f32 %v2648_v35, %v2647_v21  ;;  %v1311_v35 = vadd.f32 %v4312_v4, %v4401_v12  ;;  %v1316_v4 = vadd.f32 %v4319_v39, %v4401_v12  ;;  %v1326_v39 = vadd.f32 %v4330_v49, %v4401_v12 }
 0x233   :  { %v4388_v28 = vpop.f32.mrf.mxu1  ;;  %v2650_v26 = vpop.f32.mrf.mxu0 }
 0x234   :  { %4586 = vst [vmem:[#allocation21_spill] sm:$0xff] %v4388_v28  ;;  %v2640_v28 = vadd.f32 %v2639_v5, %v2638_v14 }
 0x235   :  { %v4390_v48 = vpop.f32.mrf.mxu1  ;;  %v2651_v54 = vpop.f32.mrf.mxu0 }
 0x236   :  { %4587 = vst [vmem:[#allocation25_spill] sm:$0xff] %v4390_v48  ;;  %v2652_v18 = vadd.f32 %v2651_v54, %v2650_v26  ;;  %v2222_v26 = vld [vmem:[#allocation10 + $0x70] sm:$0xff]  ;;  %v1321_v54 = vadd.f32 %v4324_v56, %v4401_v12 }
 0x237   :  { %v4392_v62 = vpop.f32.mrf.mxu1  ;;  %v2653_v29 = vpop.f32.mrf.mxu0 }
 0x238   :  { %4588 = vst [vmem:[#allocation19_spill] sm:$0xff] %v4392_v62  ;;  %v2643_v62 = vadd.f32 %v2642_v10, %v2641_v47 }
 0x239   :  { %v4395_v61 = vpop.f32.mrf.mxu1  ;;  %v2654_v31 = vpop.f32.mrf.mxu0 }
 0x23a   :  { %4590 = vst [vmem:[#allocation24_spill] sm:$0xff] %v4395_v61  ;;  %v1581_v10 = vadd.f32 %v2643_v62, %v1436_v22  ;;  %v2655_v62 = vadd.f32 %v2654_v31, %v2653_v29  ;;  %v2578_v31 = vadd.f32 %v4362_v25, %v4358_v0  ;;  %v2221_v25 = vld [vmem:[#allocation10 + $0x68] sm:$0xff] }
 0x23b   :  { %v4397_v1 = vpop.f32.mrf.mxu1  ;;  %v4399_v34 = vpop.f32.mrf.mxu0 }
 0x23c   :  { %4591 = vst [vmem:[#allocation23_spill] sm:$0xff] %v4397_v1  ;;  %v1286_v1 = vadd.f32 %v4280_v17, %v4401_v12  ;;  %v1296_v17 = vadd.f32 %v4292_v23, %v4401_v12  ;;  %v1591_v23 = vadd.f32 %v2649_v30, %v1446_v44  ;;  %v1461_v44 = vadd.f32 %v2578_v31, %v1316_v4 }
 0x23d   :  { %v4403_v45 = vpop.f32.mrf.mxu1  ;;  %v2657_v15 = vpop.f32.mrf.mxu0 }
 0x23e   :  { %4592 = vst [vmem:[#allocation27_spill] sm:$0xff] %v4403_v45  ;;  %v1431_v45 = vadd.f32 %v2560_v3, %v1286_v1  ;;  %v2575_v3 = vadd.f32 %v4354_v8, %v4350_v20  ;;  %v1441_v52 = vadd.f32 %v2566_v58, %v1296_v17  ;;  %v2658_v30 = vadd.f32 %v2657_v15, %v4399_v34  ;;  %v2220_v15 = vld [vmem:[#allocation10 + $0x60] sm:$0xff] }
 0x23f   :  { %v4409_v61 = vpop.f32.mrf.mxu1  ;;  %v2659_v48 = vpop.f32.mrf.mxu0  ;;  %v1331_v34 = vadd.f32 %v4332_v46, %v4401_v12 }
 0x240   :  { %4593 = vst [vmem:[#allocation20_spill] sm:$0xff] %v4409_v61  ;;  %v1576_v42 = vadd.f32 %v2640_v28, %v1431_v45  ;;  %v1306_v45 = vadd.f32 %v4305_v63, %v4401_v12  ;;  %v1586_v8 = vadd.f32 %v2646_v57, %v1441_v52  ;;  %v1456_v28 = vadd.f32 %v2575_v3, %v1311_v35  ;;  %v2223_v63 = vld [vmem:[#allocation10 + $0x78] sm:$0xff] }
 0x241   :  { %v4413_v11 = vpop.f32.mrf.mxu1  ;;  %v2660_v51 = vpop.f32.mrf.mxu0  ;;  %2932 = vmatprep.subr.mxu0 %v2223_v63  ;;  %v2587_v57 = vadd.f32 %v4378_v59, %v4376_v41  ;;  %v2584_v3 = vadd.f32 %v4374_v24, %v4372_v9  ;;  %v1336_v59 = vadd.f32 %v4338_v7, %v4401_v12  ;;  %v1606_v9 = vadd.f32 %v2658_v30, %v1461_v44  ;;  %v2219_v24 = vld [vmem:[#allocation10 + $0x58] sm:$0xff] }
 0x242   :  { %v1451_v29 = vadd.f32 %v2572_v2, %v1306_v45  ;;  %v2661_v58 = vadd.f32 %v2660_v51, %v2659_v48 }
 0x243   :  { %v4419_v47 = vpop.f32.mrf.mxu0  ;;  %v2854_v61 = vpop.f32.mrf.mxu1  ;;  %v1476_v35 = vadd.f32 %v2587_v57, %v1331_v34  ;;  %v1471_v45 = vadd.f32 %v2584_v3, %v1326_v39  ;;  %v4600_v39 = vld [vmem:[#allocation31_spill] sm:$0xff] }
 0x244   :  { %v1726_v14 = vadd.f32 %v2854_v61, %v1581_v10  ;;  %v2581_v61 = vadd.f32 %v4370_v16, %v4366_v19  ;;  %v1601_v16 = vadd.f32 %v2655_v62, %v1456_v28  ;;  %v1596_v0 = vadd.f32 %v2652_v18, %v1451_v29  ;;  %v4601_v44 = vld [vmem:[#allocation23_spill] sm:$0xff] }
 0x245   :  { %v2663_v5 = vpop.f32.mrf.mxu0  ;;  %v1720_v37 = vpop.f32.mrf.mxu1  ;;  %v2593_v62 = vadd.f32 %v4386_v53, %v4384_v50  ;;  %v2590_v18 = vadd.f32 %v4382_v43, %v4380_v33  ;;  %v2519_v53 = vadd.f32 %v4352_v40, %v4348_v36  ;;  %v2217_v33 = vld [vmem:[#allocation10 + $0x48] sm:$0xff]  ;;  %v2216_v36 = vld [vmem:[#allocation10 + $0x40] sm:$0xff] }
 0x246   :  { %v1721_v21 = vadd.f32 %v1720_v37, %v1576_v42  ;;  %v1804_v27 = vmax.f32 %v1726_v14, 0.0  ;;  %v1466_v17 = vadd.f32 %v2581_v61, %v1321_v54  ;;  %v2664_v2 = vadd.f32 %v2663_v5, %v4419_v47  ;;  %v2218_v47 = vld [vmem:[#allocation10 + $0x50] sm:$0xff]  ;;  %v4598_v40 = vld [vmem:[#allocation30_spill] sm:$0xff]  ;;  %v4602_v3 = vld [vmem:[#allocation27_spill] sm:$0xff] }
 0x247   :  { %v2665_v1 = vpop.f32.mrf.mxu0  ;;  %v2857_v60 = vpop.f32.mrf.mxu1  ;;  %v1341_v5 = vadd.f32 %v4340_v38, %v4401_v12  ;;  %v4597_v54 = vld [vmem:[#allocation24_spill] sm:$0xff] }
 0x248   :  { %v1801_v20 = vmax.f32 %v1721_v21, 0.0  ;;  %v1736_v13 = vadd.f32 %v2857_v60, %v1591_v23  ;;  %v1611_v52 = vadd.f32 %v2661_v58, %v1466_v17  ;;  %v1351_v17 = vadd.f32 %v2519_v53, %v4401_v12 }
 0x249   :  { %v2666_v55 = vpop.f32.mrf.mxu0  ;;  %v1730_v22 = vpop.f32.mrf.mxu1  ;;  %v1486_v43 = vadd.f32 %v2593_v62, %v1341_v5  ;;  %v4604_v62 = vld [vmem:[#allocation22_spill] sm:$0xff] }
 0x24a   :  { %v1731_v32 = vadd.f32 %v1730_v22, %v1586_v8  ;;  %2908 = vmatprep.mubr.f32.mxu0 %v1801_v20  ;;  %v1810_v56 = vmax.f32 %v1736_v13, 0.0  ;;  %v2667_v14 = vadd.f32 %v2666_v55, %v2665_v1  ;;  %v1616_v13 = vadd.f32 %v2664_v2, %v1471_v45  ;;  %v4594_v55 = vld [vmem:[#allocation21_spill] sm:$0xff]  ;;  %v2213_v45 = vld [vmem:[#allocation10 + $0x28] sm:$0xff] }
 0x24b   :  { %v2668_v19 = vpop.f32.mrf.mxu0  ;;  %v2860_v6 = vpop.f32.mrf.mxu1  ;;  %2909 = vmatmul.mubr.f32.vlgmr.msra.gmra.mxu0 %v1804_v27  ;;  %v4595_v22 = vld [vmem:[#allocation25_spill] sm:$0xff] }
 0x24c   :  { %v1807_v10 = vmax.f32 %v1731_v32, 0.0  ;;  %2933 = vmatpush3.msra.mxu0 %v2223_v63  ;;  %v1746_v48 = vadd.f32 %v2860_v6, %v1601_v16  ;;  %v1621_v28 = vadd.f32 %v2667_v14, %v1476_v35  ;;  %v2596_v4 = vadd.f32 %v4595_v22, %v4594_v55  ;;  %v4599_v6 = vld [vmem:[#allocation29_spill] sm:$0xff]  ;;  %v4603_v35 = vld [vmem:[#allocation32_spill] sm:$0xff] }
 0x24d   :  { %v2669_v51 = vpop.f32.mrf.mxu0  ;;  %v1740_v42 = vpop.f32.mrf.mxu1  ;;  %2934 = vmatprep.subr.mxu0 %v2222_v26  ;;  %v1481_v63 = vadd.f32 %v2590_v18, %v1336_v59  ;;  %v2522_v30 = vadd.f32 %v4600_v39, %v4599_v6  ;;  %v2214_v2 = vld [vmem:[#allocation10 + $0x30] sm:$0xff] }
 0x24e   :  { %v1741_v49 = vadd.f32 %v1740_v42, %v1596_v0  ;;  %2911 = vmatprep.mubr.f32.mxu0 %v1807_v10  ;;  %2935 = vmatpush3.msra.mxu0 %v2222_v26  ;;  %v1816_v46 = vmax.f32 %v1746_v48, 0.0  ;;  %v2670_v61 = vadd.f32 %v2669_v51, %v2668_v19  ;;  %v4596_v26 = vld [vmem:[#allocation19_spill] sm:$0xff]  ;;  %v1346_v19 = vadd.f32 %v4598_v40, %v4401_v12  ;;  %v2215_v51 = vld [vmem:[#allocation10 + $0x38] sm:$0xff] }
 0x24f   :  { %v2671_v37 = vpop.f32.mrf.mxu0  ;;  %v2863_v41 = vpop.f32.mrf.mxu1  ;;  %2912 = vmatmul.mubr.f32.gmra.mxu0 %v1810_v56  ;;  %2936 = vmatprep.subr.mxu0 %v2221_v25  ;;  %v2599_v58 = vadd.f32 %v4597_v54, %v4596_v26 }
 0x250   :  { %v1813_v21 = vmax.f32 %v1741_v49, 0.0  ;;  %2937 = vmatpush3.msra.mxu0 %v2221_v25  ;;  %v1756_v1 = vadd.f32 %v2863_v41, %v1611_v52  ;;  %v1626_v48 = vadd.f32 %v2670_v61, %v1481_v63  ;;  %v1491_v42 = vadd.f32 %v2596_v4, %v1346_v19  ;;  %v2212_v61 = vld [vmem:[#allocation10 + $0x20] sm:$0xff] }
 0x251   :  { %v2672_v23 = vpop.f32.mrf.mxu0  ;;  %v1750_v60 = vpop.f32.mrf.mxu1  ;;  %2938 = vmatprep.subr.mxu0 %v2220_v15  ;;  %v2602_v49 = vadd.f32 %v4602_v3, %v4601_v44  ;;  %v1496_v52 = vadd.f32 %v2599_v58, %v1351_v17  ;;  %v2210_v58 = vld [vmem:[#allocation10 + $0x10] sm:$0xff] }
 0x252   :  { %v1751_v7 = vadd.f32 %v1750_v60, %v1606_v9  ;;  %2914 = vmatprep.mubr.f32.mxu0 %v1813_v21  ;;  %2939 = vmatpush3.msra.mxu0 %v2220_v15  ;;  %v2673_v20 = vadd.f32 %v2672_v23, %v2671_v37  ;;  %v1822_v29 = vmax.f32 %v1756_v1, 0.0  ;;  %v1356_v21 = vadd.f32 %v2522_v30, %v4401_v12 }
 0x253   :  { %v2674_v8 = vpop.f32.mrf.mxu0  ;;  %v2866_v50 = vpop.f32.mrf.mxu1  ;;  %2915 = vmatmul.mubr.f32.gmra.mxu0 %v1816_v46  ;;  %2940 = vmatprep.subr.mxu0 %v2219_v24  ;;  %v2525_v46 = vadd.f32 %v4604_v62, %v4603_v35 }
 0x254   :  { %v1819_v27 = vmax.f32 %v1751_v7, 0.0  ;;  %2941 = vmatpush3.msra.mxu0 %v2219_v24  ;;  %v1766_v38 = vadd.f32 %v2866_v50, %v1621_v28  ;;  %v1631_v0 = vadd.f32 %v2673_v20, %v1486_v43  ;;  %v1501_v18 = vadd.f32 %v2602_v49, %v1356_v21  ;;  %v4605_v7 = vld [vmem:[#allocation20_spill] sm:$0xff] }
 0x255   :  { %v2675_v31 = vpop.f32.mrf.mxu0  ;;  %v1760_v32 = vpop.f32.mrf.mxu1  ;;  %2942 = vmatprep.subr.mxu0 %v2218_v47 }
 0x256   :  { %v1761_v16 = vadd.f32 %v1760_v32, %v1616_v13  ;;  %2917 = vmatprep.mubr.f32.mxu0 %v1819_v27  ;;  %2943 = vmatpush3.msra.mxu0 %v2218_v47  ;;  %v2676_v57 = vadd.f32 %v2675_v31, %v2674_v8  ;;  %v1828_v15 = vmax.f32 %v1766_v38, 0.0  ;;  %v2605_v47 = vadd.f32 %v4413_v11, %v4605_v7 }
 0x257   :  { %v2677_v10 = vpop.f32.mrf.mxu0  ;;  %v2869_v25 = vpop.f32.mrf.mxu1  ;;  %2918 = vmatmul.mubr.f32.gmra.mxu0 %v1822_v29  ;;  %2944 = vmatprep.subr.mxu0 %v2217_v33 }
 0x258   :  { %v1825_v56 = vmax.f32 %v1761_v16, 0.0  ;;  %2945 = vmatpush3.msra.mxu0 %v2217_v33  ;;  %v1776_v34 = vadd.f32 %v2869_v25, %v1631_v0  ;;  %v1636_v60 = vadd.f32 %v2676_v57, %v1491_v42  ;;  %v1361_v33 = vadd.f32 %v2525_v46, %v4401_v12  ;;  %v2211_v12 = vld [vmem:[#allocation10 + $0x18] sm:$0xff]  ;;  %v2209_v16 = vld [vmem:[#allocation10 + $0x8] sm:$0xff] }
 0x259   :  { %v2678_v14 = vpop.f32.mrf.mxu0  ;;  %v1770_v37 = vpop.f32.mrf.mxu1  ;;  %2946 = vmatprep.subr.mxu0 %v2216_v36 }
 0x25a   :  { %v2679_v41 = vadd.f32 %v2678_v14, %v2677_v10  ;;  %v1771_v59 = vadd.f32 %v1770_v37, %v1626_v48  ;;  %2920 = vmatprep.mubr.f32.mxu0 %v1825_v56  ;;  %2947 = vmatpush3.msra.mxu0 %v2216_v36  ;;  %v1834_v5 = vmax.f32 %v1776_v34, 0.0  ;;  %v1506_v29 = vadd.f32 %v2605_v47, %v1361_v33  ;;  %v2208_v36 = vld [vmem:[#allocation10] sm:$0xff] }
 0x25b   :  { %v2680_v9 = vpop.f32.mrf.mxu0  ;;  %v2872_v24 = vpop.f32.mrf.mxu1  ;;  %2921 = vmatmul.mubr.f32.gmra.mxu0 %v1828_v15  ;;  %2948 = vmatprep.subr.mxu0 %v2215_v51 }
 0x25c   :  { %v1831_v1 = vmax.f32 %v1771_v59, 0.0  ;;  %v1641_v23 = vadd.f32 %v2679_v41, %v1496_v52  ;;  %2949 = vmatpush3.msra.mxu0 %v2215_v51 }
 0x25d   :  { %v2681_v20 = vpop.f32.mrf.mxu0  ;;  %v1780_v8 = vpop.f32.mrf.mxu1  ;;  %2950 = vmatprep.subr.mxu0 %v2214_v2 }
 0x25e   :  { %v1786_v28 = vadd.f32 %v2872_v24, %v1641_v23  ;;  %v2682_v50 = vadd.f32 %v2681_v20, %v2680_v9  ;;  %v1781_v53 = vadd.f32 %v1780_v8, %v1636_v60  ;;  %2923 = vmatprep.mubr.f32.mxu0 %v1831_v1  ;;  %2951 = vmatpush3.msra.mxu0 %v2214_v2  ;;  %v4478_v24 = vld [vmem:[#allocation8] ss:$0 sm:$0xff] }
 0x25f   :  { %v2683_v27 = vpop.f32.mrf.mxu0  ;;  %v2875_v13 = vpop.f32.mrf.mxu1  ;;  %2924 = vmatmul.mubr.f32.gmra.mxu0 %v1834_v5  ;;  %2952 = vmatprep.subr.mxu0 %v2213_v45 }
 0x260   :  { %v1840_v43 = vmax.f32 %v1786_v28, 0.0  ;;  %v1837_v55 = vmax.f32 %v1781_v53, 0.0  ;;  %v1646_v22 = vadd.f32 %v2682_v50, %v1501_v18  ;;  %2953 = vmatpush3.msra.mxu0 %v2213_v45 }
 0x261   :  { %v2684_v11 = vpop.f32.mrf.mxu0  ;;  %v1790_v4 = vpop.f32.mrf.mxu1  ;;  %2954 = vmatprep.subr.mxu0 %v2212_v61 }
 0x262   :  { %v2685_v38 = vadd.f32 %v2684_v11, %v2683_v27  ;;  %v1791_v31 = vadd.f32 %v1790_v4, %v1646_v22  ;;  %2926 = vmatprep.mubr.f32.mxu0 %v1837_v55  ;;  %2955 = vmatpush3.msra.mxu0 %v2212_v61 }
 0x263   :  { %2927 = vmatmul.mubr.f32.gmra.mxu0 %v1840_v43  ;;  %2956 = vmatprep.subr.mxu0 %v2211_v12 }
 0x264   :  { %v1651_v32 = vadd.f32 %v2685_v38, %v1506_v29  ;;  %v1843_v63 = vmax.f32 %v1791_v31, 0.0  ;;  %2957 = vmatpush3.msra.mxu0 %v2211_v12 }
 0x265   :  { %2958 = vmatprep.subr.mxu0 %v2210_v58 }
 0x266   :  { %v1796_v26 = vadd.f32 %v2875_v13, %v1651_v32  ;;  %2929 = vmatprep.mubr.f32.mxu0 %v1843_v63  ;;  %2959 = vmatpush3.msra.mxu0 %v2210_v58 }
 0x267   :  { %2960 = vmatprep.subr.mxu0 %v2209_v16 }
 0x268   :  { %v1846_v54 = vmax.f32 %v1796_v26, 0.0  ;;  %2961 = vmatpush3.msra.mxu0 %v2209_v16 }
 0x269   :  { %2962 = vmatprep.subr.mxu0 %v2208_v36 }
 0x26a   :  { %2930 = vmatmul.mubr.f32.gmra.mxu0 %v1846_v54 }
 0x26b   :  { %2963 = vmatpush3.msra.mxu0 %v2208_v36 }
 0x289   :  { %v2736_v40 = vpop.f32.mrf.mxu1 }
 0x28b   :  { %v2737_v19 = vpop.f32.mrf.mxu1 }
 0x28c   :  { %v2738_v9 = vadd.f32 %v2737_v19, %v2736_v40 }
 0x28d   :  { %v2739_v6 = vpop.f32.mrf.mxu1 }
 0x28e   :  { %v1969_v60 = vadd.f32 %v2738_v9, %v4478_v24 }
 0x28f   :  { %v2740_v39 = vpop.f32.mrf.mxu1 }
 0x290   :  { %v2741_v2 = vadd.f32 %v2740_v39, %v2739_v6 }
 0x291   :  { %v2742_v30 = vpop.f32.mrf.mxu1 }
 0x292   :  { %v1974_v46 = vadd.f32 %v2741_v2, %v4478_v24 }
 0x293   :  { %v2743_v10 = vpop.f32.mrf.mxu1 }
 0x294   :  { %v2744_v23 = vadd.f32 %v2743_v10, %v2742_v30 }
 0x295   :  { %v2745_v0 = vpop.f32.mrf.mxu1 }
 0x296   :  { %v1979_v53 = vadd.f32 %v2744_v23, %v4478_v24 }
 0x297   :  { %v2746_v25 = vpop.f32.mrf.mxu1 }
 0x298   :  { %v2747_v35 = vadd.f32 %v2746_v25, %v2745_v0 }
 0x299   :  { %v2748_v17 = vpop.f32.mrf.mxu1 }
 0x29a   :  { %v1984_v20 = vadd.f32 %v2747_v35, %v4478_v24 }
 0x29b   :  { %v2749_v57 = vpop.f32.mrf.mxu1 }
 0x29c   :  { %v2750_v28 = vadd.f32 %v2749_v57, %v2748_v17 }
 0x29d   :  { %v2751_v56 = vpop.f32.mrf.mxu1 }
 0x29e   :  { %v1989_v38 = vadd.f32 %v2750_v28, %v4478_v24 }
 0x29f   :  { %v2752_v48 = vpop.f32.mrf.mxu1 }
 0x2a0   :  { %v2753_v47 = vadd.f32 %v2752_v48, %v2751_v56 }
 0x2a2   :  { %v2754_v51 = vpop.f32.mrf.mxu1  ;;  %v1994_v22 = vadd.f32 %v2753_v47, %v4478_v24 }
 0x2a4   :  { %v2755_v42 = vpop.f32.mrf.mxu1 }
 0x2a5   :  { %v2756_v4 = vadd.f32 %v2755_v42, %v2754_v51 }
 0x2a6   :  { %v2757_v44 = vpop.f32.mrf.mxu1 }
 0x2a7   :  { %v1999_v19 = vadd.f32 %v2756_v4, %v4478_v24 }
 0x2a8   :  { %v2758_v3 = vpop.f32.mrf.mxu1 }
 0x2a9   :  { %v2759_v43 = vadd.f32 %v2758_v3, %v2757_v44 }
 0x2aa   :  { %v2760_v49 = vpop.f32.mrf.mxu1 }
 0x2ab   :  { %v2004_v58 = vadd.f32 %v2759_v43, %v4478_v24 }
 0x2ac   :  { %v2761_v15 = vpop.f32.mrf.mxu1 }
 0x2ad   :  { %v2762_v36 = vadd.f32 %v2761_v15, %v2760_v49 }
 0x2ae   :  { %v2763_v34 = vpop.f32.mrf.mxu1 }
 0x2af   :  { %v2009_v51 = vadd.f32 %v2762_v36, %v4478_v24 }
 0x2b0   :  { %v2764_v14 = vpop.f32.mrf.mxu1 }
 0x2b1   :  { %v2765_v54 = vadd.f32 %v2764_v14, %v2763_v34 }
 0x2b2   :  { %v2766_v37 = vpop.f32.mrf.mxu1 }
 0x2b3   :  { %v2014_v17 = vadd.f32 %v2765_v54, %v4478_v24 }
 0x2b4   :  { %v2767_v52 = vpop.f32.mrf.mxu1 }
 0x2b5   :  { %v2768_v56 = vadd.f32 %v2767_v52, %v2766_v37 }
 0x2b6   :  { %v2769_v41 = vpop.f32.mrf.mxu1 }
 0x2b7   :  { %v2019_v37 = vadd.f32 %v2768_v56, %v4478_v24 }
 0x2b8   :  { %v2770_v59 = vpop.f32.mrf.mxu1 }
 0x2b9   :  { %v2771_v0 = vadd.f32 %v2770_v59, %v2769_v41 }
 0x2ba   :  { %v4476_v21 = vpop.f32.mrf.mxu1 }
 0x2bb   :  { %v2024_v14 = vadd.f32 %v2771_v0, %v4478_v24 }
 0x2bc   :  { %v4480_v62 = vpop.f32.mrf.mxu1 }
 0x2bd   :  { %v2774_v41 = vadd.f32 %v4480_v62, %v4476_v21 }
 0x2be   :  { %v2775_v5 = vpop.f32.mrf.mxu1 }
 0x2c0   :  { %v2776_v55 = vpop.f32.mrf.mxu1 }
 0x2c1   :  { %v2777_v15 = vadd.f32 %v2776_v55, %v2775_v5 }
 0x2c2   :  { %v2778_v12 = vpop.f32.mrf.mxu1 }
 0x2c3   :  { %v2034_v23 = vadd.f32 %v2777_v15, %v4478_v24 }
 0x2c4   :  { %v2779_v25 = vpop.f32.mrf.mxu1 }
 0x2c6   :  { %v2781_v34 = vpop.f32.mrf.mxu1 }
 0x30b   :  { %v2910_v1 = vpop.f32.mrf.mxu0 }
 0x30c   :  { %v2119_v45 = vadd.f32 %v2910_v1, %v1974_v46  ;;  %v2782_v1 = vpop.f32.mrf.mxu1 }
 0x30d   :  { %v2113_v18 = vpop.f32.mrf.mxu0  ;;  %v2783_v21 = vadd.f32 %v2782_v1, %v2781_v34 }
 0x30e   :  { %v2114_v7 = vadd.f32 %v2113_v18, %v1969_v60  ;;  %v2193_v61 = vmax.f32 %v2119_v45, 0.0  ;;  %v2029_v18 = vadd.f32 %v2774_v41, %v4478_v24 }
 0x30f   :  { %v2913_v8 = vpop.f32.mrf.mxu0 }
 0x310   :  { %v2192_v50 = vmax.f32 %v2114_v7, 0.0  ;;  %v2129_v27 = vadd.f32 %v2913_v8, %v1984_v20  ;;  %v2780_v20 = vadd.f32 %v2779_v25, %v2778_v12 }
 0x311   :  { %v2123_v13 = vpop.f32.mrf.mxu0 }
 0x312   :  { %v2124_v33 = vadd.f32 %v2123_v13, %v1979_v53  ;;  %2964 = vmatprep.mubr.f32.mxu0 %v2192_v50  ;;  %v2195_v31 = vmax.f32 %v2129_v27, 0.0  ;;  %v2044_v50 = vadd.f32 %v2783_v21, %v4478_v24 }
 0x313   :  { %v2916_v11 = vpop.f32.mrf.mxu0  ;;  %2965 = vmatmul.mubr.f32.vlgmr.msra.gmra.mxu0 %v2193_v61  ;;  %v2039_v61 = vadd.f32 %v2780_v20, %v4478_v24 }
 0x314   :  { %v2194_v29 = vmax.f32 %v2124_v33, 0.0  ;;  %v2139_v32 = vadd.f32 %v2916_v11, %v1994_v22  ;;  %v2445_v22 = vld [vmem:[#allocation11] ss:$0 sm:$0xff] }
 0x315   :  { %v2133_v63 = vpop.f32.mrf.mxu0 }
 0x316   :  { %v2134_v26 = vadd.f32 %v2133_v63, %v1989_v38  ;;  %2967 = vmatprep.mubr.f32.mxu0 %v2194_v29  ;;  %v2197_v6 = vmax.f32 %v2139_v32, 0.0 }
 0x317   :  { %v2919_v16 = vpop.f32.mrf.mxu0  ;;  %2968 = vmatmul.mubr.f32.gmra.mxu0 %v2195_v31 }
 0x318   :  { %v2196_v40 = vmax.f32 %v2134_v26, 0.0  ;;  %v2149_v39 = vadd.f32 %v2919_v16, %v2004_v58 }
 0x319   :  { %v2143_v30 = vpop.f32.mrf.mxu0 }
 0x31a   :  { %v2144_v10 = vadd.f32 %v2143_v30, %v1999_v19  ;;  %2970 = vmatprep.mubr.f32.mxu0 %v2196_v40  ;;  %v2199_v42 = vmax.f32 %v2149_v39, 0.0 }
 0x31b   :  { %v2922_v57 = vpop.f32.mrf.mxu0  ;;  %2971 = vmatmul.mubr.f32.gmra.mxu0 %v2197_v6 }
 0x31c   :  { %v2198_v48 = vmax.f32 %v2144_v10, 0.0  ;;  %v2159_v44 = vadd.f32 %v2922_v57, %v2014_v17 }
 0x31d   :  { %v2153_v3 = vpop.f32.mrf.mxu0 }
 0x31e   :  { %v2154_v49 = vadd.f32 %v2153_v3, %v2009_v51  ;;  %2973 = vmatprep.mubr.f32.mxu0 %v2198_v48  ;;  %v2201_v52 = vmax.f32 %v2159_v44, 0.0 }
 0x31f   :  { %v2925_v2 = vpop.f32.mrf.mxu0  ;;  %2974 = vmatmul.mubr.f32.gmra.mxu0 %v2199_v42 }
 0x320   :  { %v2200_v59 = vmax.f32 %v2154_v49, 0.0  ;;  %v2169_v9 = vadd.f32 %v2925_v2, %v2024_v14 }
 0x321   :  { %v2163_v35 = vpop.f32.mrf.mxu0 }
 0x322   :  { %v2164_v46 = vadd.f32 %v2163_v35, %v2019_v37  ;;  %2976 = vmatprep.mubr.f32.mxu0 %v2200_v59  ;;  %v2203_v7 = vmax.f32 %v2169_v9, 0.0 }
 0x323   :  { %v2928_v60 = vpop.f32.mrf.mxu0  ;;  %2977 = vmatmul.mubr.f32.gmra.mxu0 %v2201_v52 }
 0x324   :  { %v2202_v45 = vmax.f32 %v2164_v46, 0.0  ;;  %v2179_v47 = vadd.f32 %v2928_v60, %v2034_v23 }
 0x325   :  { %v2173_v5 = vpop.f32.mrf.mxu0 }
 0x326   :  { %v2174_v62 = vadd.f32 %v2173_v5, %v2029_v18  ;;  %2979 = vmatprep.mubr.f32.mxu0 %v2202_v45  ;;  %v2205_v28 = vmax.f32 %v2179_v47, 0.0 }
 0x327   :  { %2980 = vmatmul.mubr.f32.gmra.mxu0 %v2203_v7 }
 0x328   :  { %v2204_v8 = vmax.f32 %v2174_v62, 0.0 }
 0x32a   :  { %v2931_v53 = vpop.f32.mrf.mxu0  ;;  %2982 = vmatprep.mubr.f32.mxu0 %v2204_v8 }
 0x32b   :  { %2983 = vmatmul.mubr.f32.gmra.mxu0 %v2205_v28  ;;  %v2189_v27 = vadd.f32 %v2931_v53, %v2044_v50 }
 0x32c   :  { %v2183_v13 = vpop.f32.mrf.mxu0 }
 0x32d   :  { %v2184_v33 = vadd.f32 %v2183_v13, %v2039_v61  ;;  %v2207_v55 = vmax.f32 %v2189_v27, 0.0 }
 0x32f   :  { %v2206_v43 = vmax.f32 %v2184_v33, 0.0 }
 0x331   :  { %2985 = vmatprep.mubr.f32.mxu0 %v2206_v43 }
 0x332   :  { %2986 = vmatmul.mubr.f32.gmra.mxu0 %v2207_v55 }
 0x3d3   :  { %v2966_v11 = vpop.f32.mrf.mxu0 }
 0x3d4   :  { %v2303_v4 = vadd.f32 %v2966_v11, %v2445_v22 }
 0x3d5   :  { %v2297_v29 = vpop.f32.mrf.mxu0 }
 0x3d6   :  { %2377 = vst [vmem:[#allocation13 + $0x8] sm:$0xff] %v2303_v4  ;;  %v2298_v38 = vadd.f32 %v2445_v22, %v2297_v29 }
 0x3d7   :  { %v2969_v31 = vpop.f32.mrf.mxu0 }
 0x3d8   :  { %2376 = vst [vmem:[#allocation13] sm:$0xff] %v2298_v38  ;;  %v2313_v32 = vadd.f32 %v2969_v31, %v2445_v22 }
 0x3d9   :  { %v2307_v63 = vpop.f32.mrf.mxu0 }
 0x3da   :  { %2379 = vst [vmem:[#allocation13 + $0x18] sm:$0xff] %v2313_v32  ;;  %v2308_v26 = vadd.f32 %v2445_v22, %v2307_v63 }
 0x3db   :  { %v2972_v24 = vpop.f32.mrf.mxu0 }
 0x3dc   :  { %2378 = vst [vmem:[#allocation13 + $0x10] sm:$0xff] %v2308_v26  ;;  %v2323_v54 = vadd.f32 %v2972_v24, %v2445_v22 }
 0x3dd   :  { %v2317_v12 = vpop.f32.mrf.mxu0 }
 0x3de   :  { %2381 = vst [vmem:[#allocation13 + $0x28] sm:$0xff] %v2323_v54  ;;  %v2318_v58 = vadd.f32 %v2445_v22, %v2317_v12 }
 0x3df   :  { %v2975_v16 = vpop.f32.mrf.mxu0 }
 0x3e0   :  { %2380 = vst [vmem:[#allocation13 + $0x20] sm:$0xff] %v2318_v58  ;;  %v2333_v36 = vadd.f32 %v2975_v16, %v2445_v22 }
 0x3e1   :  { %v2327_v40 = vpop.f32.mrf.mxu0 }
 0x3e2   :  { %2383 = vst [vmem:[#allocation13 + $0x38] sm:$0xff] %v2333_v36  ;;  %v2328_v19 = vadd.f32 %v2445_v22, %v2327_v40 }
 0x3e3   :  { %v2978_v6 = vpop.f32.mrf.mxu0 }
 0x3e4   :  { %2382 = vst [vmem:[#allocation13 + $0x30] sm:$0xff] %v2328_v19  ;;  %v2343_v39 = vadd.f32 %v2978_v6, %v2445_v22 }
 0x3e5   :  { %v2337_v30 = vpop.f32.mrf.mxu0 }
 0x3e6   :  { %2385 = vst [vmem:[#allocation13 + $0x48] sm:$0xff] %v2343_v39  ;;  %v2338_v10 = vadd.f32 %v2445_v22, %v2337_v30 }
 0x3e7   :  { %v2981_v0 = vpop.f32.mrf.mxu0 }
 0x3e8   :  { %2384 = vst [vmem:[#allocation13 + $0x40] sm:$0xff] %v2338_v10  ;;  %v2353_v25 = vadd.f32 %v2981_v0, %v2445_v22 }
 0x3e9   :  { %v2347_v17 = vpop.f32.mrf.mxu0 }
 0x3ea   :  { %2387 = vst [vmem:[#allocation13 + $0x58] sm:$0xff] %v2353_v25  ;;  %v2348_v57 = vadd.f32 %v2445_v22, %v2347_v17 }
 0x3eb   :  { %v2984_v56 = vpop.f32.mrf.mxu0 }
 0x3ec   :  { %2386 = vst [vmem:[#allocation13 + $0x50] sm:$0xff] %v2348_v57  ;;  %v2363_v48 = vadd.f32 %v2984_v56, %v2445_v22 }
 0x3ed   :  { %v2357_v51 = vpop.f32.mrf.mxu0 }
 0x3ee   :  { %2389 = vst [vmem:[#allocation13 + $0x68] sm:$0xff] %v2363_v48  ;;  %v2358_v42 = vadd.f32 %v2445_v22, %v2357_v51 }
 0x3f0   :  { %2388 = vst [vmem:[#allocation13 + $0x60] sm:$0xff] %v2358_v42 }
 0x3f2   :  { %v2987_v44 = vpop.f32.mrf.mxu0 }
 0x3f3   :  { %v2373_v3 = vadd.f32 %v2987_v44, %v2445_v22 }
 0x3f4   :  { %v2367_v49 = vpop.f32.mrf.mxu0 }
 0x3f5   :  { %2391 = vst [vmem:[#allocation13 + $0x78] sm:$0xff] %v2373_v3  ;;  %v2368_v15 = vadd.f32 %v2445_v22, %v2367_v49 }
 0x3f7   :  { %2390 = vst [vmem:[#allocation13 + $0x70] sm:$0xff] %v2368_v15 }
 0x3f8   :  { %3233 = shalt.err (!%p3230_p6)
}
 0x3f9   :  { %2403 = dma.vmem_to_hbm [thread:$0]  %s2398_s6, 2048, %s4513_s7, [#allocation4], %s3258_s21, %s3258_s21, %s3259_s22  }
 0x3fa   :  { %3250 = dma.done.wait [#allocation4], 2048  }
 0x3fb   :  { %3251 = vsyncadd [#allocation4], 4294965248 }
 0x3fc   :  { %2407 = vsyncpa [#allocation3], 1 }
 0x3fd   :  { %2408 = vsyncpa [#allocation6], 1 }
 0x3fe   :  { %2409 = vsyncpa [#allocation9], 1 }
 0x3ff   :  { %2410 = vsyncpa [#allocation12], 1 }
 0x400   :  { %2411 = vsyncpa [#allocation4], 1 }

</bundles_post_ra>
